<compile_context>
chip_gen: v6e
topology: v6e:2x2x1
jax: 0.10.0
libtpu: 0.0.40
codegen_flags: <defaults>
</compile_context>

<pallas_src>
import functools

import jax
import jax.numpy as jnp
from jax.experimental import pallas as pl
from jax.experimental.pallas import tpu as pltpu

D_IN = 768
D_HID = 768 * 2
NEG_SLOPE = 0.01  # PyTorch LeakyReLU default


def _gating_kernel(x_ref, w1_ref, b1_ref, w2_ref, b2_ref, o_ref):
    # x_ref: (tm, 768) f32     w1_ref: (768, 1536) bf16   b1_ref: (1, 1536) f32
    # w2_ref: (1536, 768) bf16 b2_ref: (1, 768) f32       o_ref: (tm, 768) f32
    x = x_ref[...].astype(jnp.bfloat16)

    # Linear(768 -> 1536): bf16 operands on the MXU, f32 accumulation.
    h = jnp.dot(x, w1_ref[...], preferred_element_type=jnp.float32)
    h = h + b1_ref[...]

    # LeakyReLU in f32 (VPU): max(h, 0.01*h) == leaky_relu(h) since slope < 1.
    h = jnp.maximum(h, NEG_SLOPE * h)

    # Linear(1536 -> 768): bf16 operands on the MXU, f32 accumulation.
    y = jnp.dot(h.astype(jnp.bfloat16), w2_ref[...],
                preferred_element_type=jnp.float32)
    y = y + b2_ref[...]

    # Sigmoid in f32 (EUP exp path).
    o_ref[...] = jax.nn.sigmoid(y).astype(o_ref.dtype)


def _round_up(n, m):
    return ((n + m - 1) // m) * m


def _pick_tm(m, cap=512):
    """Row tile: multiple of 8 (f32 sublane), capped at `cap` (MXU-friendly)."""
    return min(cap, _round_up(max(m, 1), 8))


@functools.partial(jax.jit, static_argnames=("tm_cap",))
def phrase_gating(x, w1, b1, w2, b2, *, tm_cap=512):
    """x: (batch, seq, 768) float32 -> (batch, seq, 768) float32.

    w1: (768, 1536), w2: (1536, 768)  (transposed vs. PyTorch Linear.weight).
    Dropout layers are identity (inference / eval mode).
    """
    orig_shape = x.shape
    xf = x.reshape(-1, D_IN)
    M = xf.shape[0]

    tm = _pick_tm(M, tm_cap)
    grid_m = pl.cdiv(M, tm)  # partial last tile (if any) is masked by Pallas

    # bf16 weights: halves resident VMEM footprint and HBM->VMEM DMA.
    w1_bf = w1.astype(jnp.bfloat16)
    w2_bf = w2.astype(jnp.bfloat16)
    b1_2d = b1.reshape(1, D_HID).astype(jnp.float32)
    b2_2d = b2.reshape(1, D_IN).astype(jnp.float32)

    def _resident(shape):
        # Constant index_map -> fetched once, no re-fetch across grid steps;
        # single-buffer it to avoid wasting VMEM on a useless second buffer.
        return pl.BlockSpec(shape, lambda i: (0, 0),
                            pipeline_mode=pl.Buffered(1))

    out = pl.pallas_call(
        _gating_kernel,
        out_shape=jax.ShapeDtypeStruct((M, D_IN), x.dtype),
        grid_spec=pltpu.PrefetchScalarGridSpec(
            num_scalar_prefetch=0,
            grid=(grid_m,),
            in_specs=[
                pl.BlockSpec((tm, D_IN), lambda i: (i, 0)),   # x tile (pipelined)
                _resident((D_IN, D_HID)),                     # W1 (bf16, resident)
                _resident((1, D_HID)),                        # b1
                _resident((D_HID, D_IN)),                     # W2 (bf16, resident)
                _resident((1, D_IN)),                         # b2
            ],
            out_specs=pl.BlockSpec((tm, D_IN), lambda i: (i, 0)),
        ),
        compiler_params=pltpu.CompilerParams(
            dimension_semantics=("parallel",),   # row tiles shard across TCs
            vmem_limit_bytes=40 << 20,           # ~15 MiB working set + headroom
        ),
    )(xf, w1_bf, b1_2d, w2_bf, b2_2d)

    return out.reshape(orig_shape)


def _ref_forward_f32(x, w1, b1, w2, b2):
    h = x.reshape(-1, D_IN) @ w1 + b1
    h = jnp.where(h > 0, h, NEG_SLOPE * h)
    y = h @ w2 + b2
    return jax.nn.sigmoid(y).reshape(x.shape)


def _ref_forward_bf16(x, w1, b1, w2, b2):
    # Matches the kernel's mixed precision: bf16 matmul operands, f32 accumulate.
    xf = x.reshape(-1, D_IN).astype(jnp.bfloat16)
    h = jnp.dot(xf, w1.astype(jnp.bfloat16),
                preferred_element_type=jnp.float32) + b1
    h = jnp.where(h > 0, h, NEG_SLOPE * h)
    y = jnp.dot(h.astype(jnp.bfloat16), w2.astype(jnp.bfloat16),
                preferred_element_type=jnp.float32) + b2
    return jax.nn.sigmoid(y).reshape(x.shape)


if __name__ == "__main__":
    key = jax.random.PRNGKey(0)
    kx, k1, kb1, k2, kb2 = jax.random.split(key, 5)

    batch, seq = 2, 8
    x = jax.random.normal(kx, (batch, seq, D_IN), dtype=jnp.float32)

    # Deterministic parameter init (PyTorch Linear-style uniform bounds).
    bound1 = 1.0 / (D_IN ** 0.5)
    bound2 = 1.0 / (D_HID ** 0.5)
    w1 = jax.random.uniform(k1, (D_IN, D_HID), jnp.float32, -bound1, bound1)
    b1 = jax.random.uniform(kb1, (D_HID,), jnp.float32, -bound1, bound1)
    w2 = jax.random.uniform(k2, (D_HID, D_IN), jnp.float32, -bound2, bound2)
    b2 = jax.random.uniform(kb2, (D_IN,), jnp.float32, -bound2, bound2)

    out = phrase_gating(x, w1, b1, w2, b2)
    out = jax.block_until_ready(out)
    assert out.shape == x.shape

    # Tight check vs. a precision-matched (bf16-matmul) reference.
    ref_bf = _ref_forward_bf16(x, w1, b1, w2, b2)
    assert jnp.allclose(out, ref_bf, atol=1e-3, rtol=1e-3), (
        float(jnp.max(jnp.abs(out - ref_bf))))

    # Loose check vs. the full-f32 PyTorch-equivalent reference (bf16 matmul
    # loosens pre-sigmoid logits; post-sigmoid error stays small).
    ref32 = _ref_forward_f32(x, w1, b1, w2, b2)
    assert jnp.allclose(out, ref32, atol=2e-2, rtol=0.0), (
        float(jnp.max(jnp.abs(out - ref32))))

    print("KERNEL_OK")
</pallas_src>

<mosaic_0001>
module attributes {stable_mosaic.version = 11 : i64} {
  func.func @_gating_kernel(%arg0: i32, %arg1: memref<16x768xf32, #tpu.memory_space<vmem>>, %arg2: memref<768x1536xbf16, #tpu.memory_space<vmem>>, %arg3: memref<1x1536xf32, #tpu.memory_space<vmem>>, %arg4: memref<1536x768xbf16, #tpu.memory_space<vmem>>, %arg5: memref<1x768xf32, #tpu.memory_space<vmem>>, %arg6: memref<16x768xf32, #tpu.memory_space<vmem>>) attributes {dimension_semantics = [#tpu.dimension_semantics<parallel>], iteration_bounds = array<i64: 1>, scalar_prefetch = 0 : i64, scratch_operands = 0 : i64, tpu.core_type = #tpu.core_type<tc>, window_params = [{transform_indices = @transform_0, window_bounds = array<i64: 16, 768>}, {pipeline_mode = #tpu.pipeline_mode<synchronous>, transform_indices = @transform_1, window_bounds = array<i64: 768, 1536>}, {pipeline_mode = #tpu.pipeline_mode<synchronous>, transform_indices = @transform_2, window_bounds = array<i64: 1, 1536>}, {pipeline_mode = #tpu.pipeline_mode<synchronous>, transform_indices = @transform_3, window_bounds = array<i64: 1536, 768>}, {pipeline_mode = #tpu.pipeline_mode<synchronous>, transform_indices = @transform_4, window_bounds = array<i64: 1, 768>}, {transform_indices = @transform_5, window_bounds = array<i64: 16, 768>}]} {
    %c0 = arith.constant 0 : index
    %c0_0 = arith.constant 0 : index
    %0 = vector.load %arg1[%c0, %c0_0] : memref<16x768xf32, #tpu.memory_space<vmem>>, vector<16x768xf32>
    %1 = arith.truncf %0 : vector<16x768xf32> to vector<16x768xbf16>
    %c0_1 = arith.constant 0 : index
    %c0_2 = arith.constant 0 : index
    %2 = vector.load %arg2[%c0_1, %c0_2] : memref<768x1536xbf16, #tpu.memory_space<vmem>>, vector<768x1536xbf16>
    %cst = arith.constant dense<0.000000e+00> : vector<16x1536xf32>
    %3 = tpu.matmul %1, %2, %cst {dimension_numbers = #tpu.dot_dimension_numbers<[1], [0], [0], [1], [0, 0, 1, 1], [], []>} : vector<16x768xbf16>, vector<768x1536xbf16>, vector<16x1536xf32> -> vector<16x1536xf32>
    %c0_3 = arith.constant 0 : index
    %c0_4 = arith.constant 0 : index
    %4 = vector.load %arg3[%c0_3, %c0_4] : memref<1x1536xf32, #tpu.memory_space<vmem>>, vector<1x1536xf32>
    %5 = vector.broadcast %4 : vector<1x1536xf32> to vector<16x1536xf32>
    %6 = arith.addf %3, %5 : vector<16x1536xf32>
    %cst_5 = arith.constant 0.00999999977 : f32
    %7 = vector.broadcast %cst_5 : f32 to vector<16x1536xf32>
    %8 = arith.mulf %7, %6 : vector<16x1536xf32>
    %9 = arith.maximumf %6, %8 : vector<16x1536xf32>
    %10 = arith.truncf %9 : vector<16x1536xf32> to vector<16x1536xbf16>
    %c0_6 = arith.constant 0 : index
    %c0_7 = arith.constant 0 : index
    %11 = vector.load %arg4[%c0_6, %c0_7] : memref<1536x768xbf16, #tpu.memory_space<vmem>>, vector<1536x768xbf16>
    %cst_8 = arith.constant dense<0.000000e+00> : vector<16x768xf32>
    %12 = tpu.matmul %10, %11, %cst_8 {dimension_numbers = #tpu.dot_dimension_numbers<[1], [0], [0], [1], [0, 0, 1, 1], [], []>} : vector<16x1536xbf16>, vector<1536x768xbf16>, vector<16x768xf32> -> vector<16x768xf32>
    %c0_9 = arith.constant 0 : index
    %c0_10 = arith.constant 0 : index
    %13 = vector.load %arg5[%c0_9, %c0_10] : memref<1x768xf32, #tpu.memory_space<vmem>>, vector<1x768xf32>
    %14 = vector.broadcast %13 : vector<1x768xf32> to vector<16x768xf32>
    %15 = arith.addf %12, %14 : vector<16x768xf32>
    %16 = arith.negf %15 : vector<16x768xf32>
    %17 = math.exp %16 : vector<16x768xf32>
    %cst_11 = arith.constant 1.000000e+00 : f32
    %18 = vector.broadcast %cst_11 : f32 to vector<16x768xf32>
    %19 = arith.addf %18, %17 : vector<16x768xf32>
    %20 = arith.divf %18, %19 : vector<16x768xf32>
    %c0_12 = arith.constant 0 : index
    %c0_13 = arith.constant 0 : index
    %21 = vector.load %arg6[%c0_12, %c0_13] : memref<16x768xf32, #tpu.memory_space<vmem>>, vector<16x768xf32>
    tpu.vector_store %arg6[%c0_12, %c0_13], %20 {strides = array<i32>} : memref<16x768xf32, #tpu.memory_space<vmem>>, vector<16x768xf32>,
    return
  }
  func.func @transform_0(%arg0: i32) -> (i32, i32) {
    %c0_i32 = arith.constant 0 : i32
    %c0_i32_0 = arith.constant 0 : i32
    return %arg0, %c0_i32 : i32, i32
  }
  func.func @transform_1(%arg0: i32) -> (i32, i32) {
    %c0_i32 = arith.constant 0 : i32
    %c0_i32_0 = arith.constant 0 : i32
    %c0_i32_1 = arith.constant 0 : i32
    return %c0_i32, %c0_i32_0 : i32, i32
  }
  func.func @transform_2(%arg0: i32) -> (i32, i32) {
    %c0_i32 = arith.constant 0 : i32
    %c0_i32_0 = arith.constant 0 : i32
    %c0_i32_1 = arith.constant 0 : i32
    return %c0_i32, %c0_i32_0 : i32, i32
  }
  func.func @transform_3(%arg0: i32) -> (i32, i32) {
    %c0_i32 = arith.constant 0 : i32
    %c0_i32_0 = arith.constant 0 : i32
    %c0_i32_1 = arith.constant 0 : i32
    return %c0_i32, %c0_i32_0 : i32, i32
  }
  func.func @transform_4(%arg0: i32) -> (i32, i32) {
    %c0_i32 = arith.constant 0 : i32
    %c0_i32_0 = arith.constant 0 : i32
    %c0_i32_1 = arith.constant 0 : i32
    return %c0_i32, %c0_i32_0 : i32, i32
  }
  func.func @transform_5(%arg0: i32) -> (i32, i32) {
    %c0_i32 = arith.constant 0 : i32
    %c0_i32_0 = arith.constant 0 : i32
    return %arg0, %c0_i32 : i32, i32
  }
}

</mosaic_0001>

<bundles_post_ra>
// kernel: phrase_gating.1
= control target key start
LH: loop header
LB: loop body
LE: loop exit
PB: predicated region body
PF: predicated region fallthrough
CT: control target
= control target key end

     0   :  { %s15546_s0 = inlined_call_operand.vmem [shape: f32[16,768], index: 0, kind: input, shape index: {}]   ;;  %s15547_s1 = inlined_call_operand.vmem [shape: bf16[768,1536], index: 1, kind: input, shape index: {}]   ;;  %s15548_s2 = inlined_call_operand.vmem [shape: f32[1,1536], index: 2, kind: input, shape index: {}]   ;;  %s15549_s3 = inlined_call_operand.vmem [shape: bf16[1536,768], index: 3, kind: input, shape index: {}]   ;;  %s15550_s4 = inlined_call_operand.vmem [shape: f32[1,768], index: 4, kind: input, shape index: {}]   ;;  %s15551_s5 = inlined_call_operand.hbm [shape: f32[16,768], index: 5, kind: output, shape index: {}]  }
   0x1   :  { %v9922_v0 = vld [vmem:[%s15547_s1 + $0x2a4] ss:$48 sps:$4 sm:$0xff]   ;;  %v9926_v2 = vld [vmem:[%s15547_s1 + $0x2a0] ss:$48 sps:$4 sm:$0xff]   ;;  %v22_v46 = vld [vmem:[%s15546_s0 + $0x8] sm:$0xff] }
   0x2   :  { %v9924_v1 = vld [vmem:[%s15547_s1 + $0x8a4] ss:$48 sps:$4 sm:$0xff]   ;;  %3559 = vmatprep.subr.bf16.mxu0 %v9922_v0  ;;  %v9927_v3 = vld [vmem:[%s15547_s1 + $0x8a0] ss:$48 sps:$4 sm:$0xff]   ;;  %v28_v47 = vld [vmem:[%s15546_s0 + $0x38] sm:$0xff] }
   0x3   :  { %3602 = vmatprep.subr.bf16.mxu1 %v9924_v1  ;;  %v9928_v4 = vld [vmem:[%s15547_s1 + $0x244] ss:$48 sps:$4 sm:$0xff]   ;;  %3560 = vmatpush1.bf16.msra.mxu0 %v9926_v2  ;;  %v9932_v6 = vld [vmem:[%s15547_s1 + $0x240] ss:$48 sps:$4 sm:$0xff]   ;;  %v24_v48 = vld [vmem:[%s15546_s0 + $0x18] sm:$0xff]  ;;  %v11915_v53 = vpack.c.bf16 %v28_v47, %v22_v46 }
   0x4   :  { %3603 = vmatpush1.bf16.msra.mxu1 %v9927_v3  ;;  %v9930_v5 = vld [vmem:[%s15547_s1 + $0x844] ss:$48 sps:$4 sm:$0xff]   ;;  %3561 = vmatprep.subr.bf16.mxu0 %v9928_v4  ;;  %v9933_v7 = vld [vmem:[%s15547_s1 + $0x840] ss:$48 sps:$4 sm:$0xff]   ;;  %v30_v49 = vld [vmem:[%s15546_s0 + $0x48] sm:$0xff] }
   0x5   :  { %3604 = vmatprep.subr.bf16.mxu1 %v9930_v5  ;;  %v9934_v8 = vld [vmem:[%s15547_s1 + $0x1e4] ss:$48 sps:$4 sm:$0xff]   ;;  %v9938_v10 = vld [vmem:[%s15547_s1 + $0x1e0] ss:$48 sps:$4 sm:$0xff]   ;;  %v11917_v54 = vpack.c.bf16 %v30_v49, %v24_v48  ;;  %3591 = vmatprep.mubr.bf16.mxu0 %v11915_v53  ;;  %v10063_v46 = vld [vmem:[%s15547_s1 + $0x8] ss:$48 sps:$4 sm:$0xff]  }
   0x6   :  { %v9936_v9 = vld [vmem:[%s15547_s1 + $0x7e4] ss:$48 sps:$4 sm:$0xff]   ;;  %v9939_v11 = vld [vmem:[%s15547_s1 + $0x7e0] ss:$48 sps:$4 sm:$0xff]   ;;  %v10071_v48 = vld [vmem:[%s15547_s1 + $0x5ac] ss:$48 sps:$4 sm:$0xff]  }
   0x7   :  { %3562 = vmatpush1.bf16.msra.mxu0 %v9932_v6  ;;  %v9940_v12 = vld [vmem:[%s15547_s1 + $0x184] ss:$48 sps:$4 sm:$0xff]   ;;  %v9944_v14 = vld [vmem:[%s15547_s1 + $0x180] ss:$48 sps:$4 sm:$0xff]   ;;  %3634 = vmatprep.mubr.bf16.mxu1 %v11917_v54 }
   0x8   :  { %3605 = vmatpush1.bf16.msra.mxu1 %v9933_v7  ;;  %3563 = vmatprep.subr.bf16.mxu0 %v9934_v8  ;;  %v9942_v13 = vld [vmem:[%s15547_s1 + $0x784] ss:$48 sps:$4 sm:$0xff]   ;;  %v9945_v15 = vld [vmem:[%s15547_s1 + $0x780] ss:$48 sps:$4 sm:$0xff]  }
   0x9   :  { %3606 = vmatprep.subr.bf16.mxu1 %v9936_v9  ;;  %v9946_v16 = vld [vmem:[%s15547_s1 + $0x124] ss:$48 sps:$4 sm:$0xff]   ;;  %v9950_v18 = vld [vmem:[%s15547_s1 + $0x120] ss:$48 sps:$4 sm:$0xff]  }
   0xa   :  { %v9948_v17 = vld [vmem:[%s15547_s1 + $0x724] ss:$48 sps:$4 sm:$0xff]   ;;  %v9951_v19 = vld [vmem:[%s15547_s1 + $0x720] ss:$48 sps:$4 sm:$0xff]  }
   0xb   :  { %3564 = vmatpush1.bf16.msra.mxu0 %v9938_v10  ;;  %v9952_v20 = vld [vmem:[%s15547_s1 + $0xc4] ss:$48 sps:$4 sm:$0xff]   ;;  %v9956_v22 = vld [vmem:[%s15547_s1 + $0xc0] ss:$48 sps:$4 sm:$0xff]  }
   0xc   :  { %3607 = vmatpush1.bf16.msra.mxu1 %v9939_v11  ;;  %3565 = vmatprep.subr.bf16.mxu0 %v9940_v12  ;;  %v9954_v21 = vld [vmem:[%s15547_s1 + $0x6c4] ss:$48 sps:$4 sm:$0xff]   ;;  %v9957_v23 = vld [vmem:[%s15547_s1 + $0x6c0] ss:$48 sps:$4 sm:$0xff]   ;;  %v10023_v11 = vld [vmem:[%s15547_s1 + $0x2ac] ss:$48 sps:$4 sm:$0xff]  }
   0xd   :  { %3608 = vmatprep.subr.bf16.mxu1 %v9942_v13  ;;  %v9958_v24 = vld [vmem:[%s15547_s1 + $0x64] ss:$48 sps:$4 sm:$0xff]   ;;  %v9962_v26 = vld [vmem:[%s15547_s1 + $0x60] ss:$48 sps:$4 sm:$0xff]  }
   0xe   :  { %v9960_v25 = vld [vmem:[%s15547_s1 + $0x664] ss:$48 sps:$4 sm:$0xff]   ;;  %v9963_v27 = vld [vmem:[%s15547_s1 + $0x660] ss:$48 sps:$4 sm:$0xff]  }
   0xf   :  { %3566 = vmatpush1.bf16.msra.mxu0 %v9944_v14  ;;  %v9964_v28 = vld [vmem:[%s15547_s1 + $0x4] ss:$48 sps:$4 sm:$0xff]   ;;  %v9968_v30 = vld [vmem:[%s15547_s1] ss:$48 sps:$4 sm:$0xff]  }
  0x10   :  { %3609 = vmatpush1.bf16.msra.mxu1 %v9945_v15  ;;  %3567 = vmatprep.subr.bf16.mxu0 %v9946_v16  ;;  %v9966_v29 = vld [vmem:[%s15547_s1 + $0x604] ss:$48 sps:$4 sm:$0xff]   ;;  %v9969_v31 = vld [vmem:[%s15547_s1 + $0x600] ss:$48 sps:$4 sm:$0xff]   ;;  %v10021_v15 = vld [vmem:[%s15547_s1 + $0x2a8] ss:$48 sps:$4 sm:$0xff]  }
  0x11   :  { %3610 = vmatprep.subr.bf16.mxu1 %v9948_v17  ;;  %v9970_v32 = vld [vmem:[%s15547_s1 + $0x5a4] ss:$48 sps:$4 sm:$0xff]   ;;  %v9974_v34 = vld [vmem:[%s15547_s1 + $0x5a0] ss:$48 sps:$4 sm:$0xff]   ;;  %v10029_v17 = vld [vmem:[%s15547_s1 + $0x24c] ss:$48 sps:$4 sm:$0xff]  }
  0x12   :  { %v9972_v33 = vld [vmem:[%s15547_s1 + $0xba4] ss:$48 sps:$4 sm:$0xff]   ;;  %v9975_v35 = vld [vmem:[%s15547_s1 + $0xba0] ss:$48 sps:$4 sm:$0xff]  }
  0x13   :  { %3568 = vmatpush1.bf16.msra.mxu0 %v9950_v18  ;;  %v9976_v36 = vld [vmem:[%s15547_s1 + $0x544] ss:$48 sps:$4 sm:$0xff]   ;;  %v9980_v38 = vld [vmem:[%s15547_s1 + $0x540] ss:$48 sps:$4 sm:$0xff]  }
  0x14   :  { %3611 = vmatpush1.bf16.msra.mxu1 %v9951_v19  ;;  %3569 = vmatprep.subr.bf16.mxu0 %v9952_v20  ;;  %v9978_v37 = vld [vmem:[%s15547_s1 + $0xb44] ss:$48 sps:$4 sm:$0xff]   ;;  %v9981_v39 = vld [vmem:[%s15547_s1 + $0xb40] ss:$48 sps:$4 sm:$0xff]   ;;  %v10027_v19 = vld [vmem:[%s15547_s1 + $0x248] ss:$48 sps:$4 sm:$0xff]  }
  0x15   :  { %3612 = vmatprep.subr.bf16.mxu1 %v9954_v21  ;;  %v9982_v40 = vld [vmem:[%s15547_s1 + $0x4e4] ss:$48 sps:$4 sm:$0xff]   ;;  %v9986_v42 = vld [vmem:[%s15547_s1 + $0x4e0] ss:$48 sps:$4 sm:$0xff]   ;;  %v10035_v21 = vld [vmem:[%s15547_s1 + $0x1ec] ss:$48 sps:$4 sm:$0xff]  }
  0x16   :  { %v9984_v41 = vld [vmem:[%s15547_s1 + $0xae4] ss:$48 sps:$4 sm:$0xff]   ;;  %v9987_v43 = vld [vmem:[%s15547_s1 + $0xae0] ss:$48 sps:$4 sm:$0xff]  }
  0x17   :  { %3570 = vmatpush1.bf16.msra.mxu0 %v9956_v22  ;;  %v9988_v44 = vld [vmem:[%s15547_s1 + $0x484] ss:$48 sps:$4 sm:$0xff]   ;;  %v9992_v50 = vld [vmem:[%s15547_s1 + $0x480] ss:$48 sps:$4 sm:$0xff]  }
  0x18   :  { %3613 = vmatpush1.bf16.msra.mxu1 %v9957_v23  ;;  %3571 = vmatprep.subr.bf16.mxu0 %v9958_v24  ;;  %v9990_v45 = vld [vmem:[%s15547_s1 + $0xa84] ss:$48 sps:$4 sm:$0xff]   ;;  %v9993_v51 = vld [vmem:[%s15547_s1 + $0xa80] ss:$48 sps:$4 sm:$0xff]   ;;  %v10033_v23 = vld [vmem:[%s15547_s1 + $0x1e8] ss:$48 sps:$4 sm:$0xff]  }
  0x19   :  { %3614 = vmatprep.subr.bf16.mxu1 %v9960_v25  ;;  %v9994_v52 = vld [vmem:[%s15547_s1 + $0x424] ss:$48 sps:$4 sm:$0xff]   ;;  %v9998_v56 = vld [vmem:[%s15547_s1 + $0x420] ss:$48 sps:$4 sm:$0xff]   ;;  %v10041_v25 = vld [vmem:[%s15547_s1 + $0x18c] ss:$48 sps:$4 sm:$0xff]  }
  0x1a   :  { %v9996_v55 = vld [vmem:[%s15547_s1 + $0xa24] ss:$48 sps:$4 sm:$0xff]   ;;  %v9999_v57 = vld [vmem:[%s15547_s1 + $0xa20] ss:$48 sps:$4 sm:$0xff]  }
  0x1b   :  { %3572 = vmatpush1.bf16.msra.mxu0 %v9962_v26  ;;  %v10000_v58 = vld [vmem:[%s15547_s1 + $0x3c4] ss:$48 sps:$4 sm:$0xff]   ;;  %v10004_v60 = vld [vmem:[%s15547_s1 + $0x3c0] ss:$48 sps:$4 sm:$0xff]  }
  0x1c   :  { %3615 = vmatpush1.bf16.msra.mxu1 %v9963_v27  ;;  %3573 = vmatprep.subr.bf16.mxu0 %v9964_v28  ;;  %v10002_v59 = vld [vmem:[%s15547_s1 + $0x9c4] ss:$48 sps:$4 sm:$0xff]   ;;  %v10005_v61 = vld [vmem:[%s15547_s1 + $0x9c0] ss:$48 sps:$4 sm:$0xff]   ;;  %v10039_v27 = vld [vmem:[%s15547_s1 + $0x188] ss:$48 sps:$4 sm:$0xff]  }
  0x1d   :  { %3616 = vmatprep.subr.bf16.mxu1 %v9966_v29  ;;  %v10006_v62 = vld [vmem:[%s15547_s1 + $0x364] ss:$48 sps:$4 sm:$0xff]   ;;  %v10010_v0 = vld [vmem:[%s15547_s1 + $0x360] ss:$48 sps:$4 sm:$0xff]   ;;  %v10047_v29 = vld [vmem:[%s15547_s1 + $0x12c] ss:$48 sps:$4 sm:$0xff]  }
  0x1e   :  { %v10008_v63 = vld [vmem:[%s15547_s1 + $0x964] ss:$48 sps:$4 sm:$0xff]   ;;  %v10011_v1 = vld [vmem:[%s15547_s1 + $0x960] ss:$48 sps:$4 sm:$0xff]  }
  0x1f   :  { %3574 = vmatpush1.bf16.msra.mxu0 %v9968_v30  ;;  %v10012_v2 = vld [vmem:[%s15547_s1 + $0x304] ss:$48 sps:$4 sm:$0xff]   ;;  %v10016_v4 = vld [vmem:[%s15547_s1 + $0x300] ss:$48 sps:$4 sm:$0xff]  }
  0x20   :  { %3617 = vmatpush1.bf16.msra.mxu1 %v9969_v31  ;;  %3575 = vmatprep.subr.bf16.mxu0 %v9970_v32  ;;  %v10014_v3 = vld [vmem:[%s15547_s1 + $0x904] ss:$48 sps:$4 sm:$0xff]   ;;  %v10017_v5 = vld [vmem:[%s15547_s1 + $0x900] ss:$48 sps:$4 sm:$0xff]   ;;  %v10045_v31 = vld [vmem:[%s15547_s1 + $0x128] ss:$48 sps:$4 sm:$0xff]  }
  0x21   :  { %3618 = vmatprep.subr.bf16.mxu1 %v9972_v33  ;;  %v21_v6 = vld [vmem:[%s15546_s0] sm:$0xff]  ;;  %v27_v7 = vld [vmem:[%s15546_s0 + $0x30] sm:$0xff]  ;;  %v10053_v33 = vld [vmem:[%s15547_s1 + $0xcc] ss:$48 sps:$4 sm:$0xff]  }
  0x22   :  { %v23_v8 = vld [vmem:[%s15546_s0 + $0x10] sm:$0xff]  ;;  %v29_v9 = vld [vmem:[%s15546_s0 + $0x40] sm:$0xff]  ;;  %v11984_v12 = vpack.c.bf16 %v27_v7, %v21_v6  ;;  %v10101_v6 = vld [vmem:[%s15547_s1 + $0x3cc] ss:$48 sps:$4 sm:$0xff]  }
  0x23   :  { %3576 = vmatpush2.bf16.msra.mxu0 %v9974_v34  ;;  %v10020_v10 = vld [vmem:[%s15547_s1 + $0xea4] ss:$48 sps:$4 sm:$0xff]   ;;  %v11986_v13 = vpack.c.bf16 %v29_v9, %v23_v8  ;;  %v10018_v14 = vld [vmem:[%s15547_s1 + $0xea0] ss:$48 sps:$4 sm:$0xff]   ;;  %v10099_v8 = vld [vmem:[%s15547_s1 + $0x3c8] ss:$48 sps:$4 sm:$0xff]  }
  0x24   :  { %3619 = vmatpush2.bf16.msra.mxu1 %v9975_v35  ;;  %3577 = vmatprep.subr.bf16.mxu0 %v9976_v36  ;;  %v10026_v16 = vld [vmem:[%s15547_s1 + $0xe44] ss:$48 sps:$4 sm:$0xff]   ;;  %v10024_v18 = vld [vmem:[%s15547_s1 + $0xe40] ss:$48 sps:$4 sm:$0xff]   ;;  %v10051_v35 = vld [vmem:[%s15547_s1 + $0xc8] ss:$48 sps:$4 sm:$0xff]  }
  0x25   :  { %3620 = vmatprep.subr.bf16.mxu1 %v9978_v37  ;;  %v10032_v20 = vld [vmem:[%s15547_s1 + $0xde4] ss:$48 sps:$4 sm:$0xff]   ;;  %v10030_v22 = vld [vmem:[%s15547_s1 + $0xde0] ss:$48 sps:$4 sm:$0xff]   ;;  %v10059_v37 = vld [vmem:[%s15547_s1 + $0x6c] ss:$48 sps:$4 sm:$0xff]  }
  0x26   :  { %v10038_v24 = vld [vmem:[%s15547_s1 + $0xd84] ss:$48 sps:$4 sm:$0xff]   ;;  %v10036_v26 = vld [vmem:[%s15547_s1 + $0xd80] ss:$48 sps:$4 sm:$0xff]  }
  0x27   :  { %3578 = vmatpush2.bf16.msra.mxu0 %v9980_v38  ;;  %v10044_v28 = vld [vmem:[%s15547_s1 + $0xd24] ss:$48 sps:$4 sm:$0xff]   ;;  %v10042_v30 = vld [vmem:[%s15547_s1 + $0xd20] ss:$48 sps:$4 sm:$0xff]  }
  0x28   :  { %3621 = vmatpush2.bf16.msra.mxu1 %v9981_v39  ;;  %3579 = vmatprep.subr.bf16.mxu0 %v9982_v40  ;;  %v10050_v32 = vld [vmem:[%s15547_s1 + $0xcc4] ss:$48 sps:$4 sm:$0xff]   ;;  %v10048_v34 = vld [vmem:[%s15547_s1 + $0xcc0] ss:$48 sps:$4 sm:$0xff]   ;;  %v10057_v39 = vld [vmem:[%s15547_s1 + $0x68] ss:$48 sps:$4 sm:$0xff]  }
  0x29   :  { %3622 = vmatprep.subr.bf16.mxu1 %v9984_v41  ;;  %v10056_v36 = vld [vmem:[%s15547_s1 + $0xc64] ss:$48 sps:$4 sm:$0xff]   ;;  %v10054_v38 = vld [vmem:[%s15547_s1 + $0xc60] ss:$48 sps:$4 sm:$0xff]   ;;  %v26_v41 = vld [vmem:[%s15546_s0 + $0x28] sm:$0xff] }
  0x2a   :  { %v10062_v40 = vld [vmem:[%s15547_s1 + $0xc04] ss:$48 sps:$4 sm:$0xff]   ;;  %v10066_v49 = vld [vmem:[%s15547_s1 + $0x11a0] ss:$48 sps:$4 sm:$0xff]  }
  0x2b   :  { %3580 = vmatpush2.bf16.msra.mxu0 %v9986_v42  ;;  %v32_v42 = vld [vmem:[%s15546_s0 + $0x58] sm:$0xff]  ;;  %v10068_v47 = vld [vmem:[%s15547_s1 + $0x11a4] ss:$48 sps:$4 sm:$0xff]   ;;  %v10096_v7 = vld [vmem:[%s15547_s1 + $0xfc0] ss:$48 sps:$4 sm:$0xff]  }
  0x2c   :  { %3623 = vmatpush2.bf16.msra.mxu1 %v9987_v43  ;;  %3581 = vmatprep.subr.bf16.mxu0 %v9988_v44  ;;  %v10065_v43 = vld [vmem:[%s15547_s1 + $0xc] ss:$48 sps:$4 sm:$0xff]   ;;  %v12081_v44 = vpack.c.bf16 %v32_v42, %v26_v41  ;;  %v10104_v9 = vld [vmem:[%s15547_s1 + $0xf64] ss:$48 sps:$4 sm:$0xff]   ;;  %v10141_v41 = vld [vmem:[%s15547_s1 + $0xd28] ss:$48 sps:$4 sm:$0xff]  }
  0x2d   :  { %3624 = vmatprep.subr.bf16.mxu1 %v9990_v45  ;;  %v10060_v45 = vld [vmem:[%s15547_s1 + $0xc00] ss:$48 sps:$4 sm:$0xff]   ;;  %v10146_v42 = vld [vmem:[%s15547_s1 + $0x6cc] ss:$48 sps:$4 sm:$0xff]  }
  0x2f   :  { %3582 = vmatpush2.bf16.msra.mxu0 %v9992_v50  ;;  %v10069_v50 = vld [vmem:[%s15547_s1 + $0x5a8] ss:$48 sps:$4 sm:$0xff]  }
  0x30   :  { %3625 = vmatpush2.bf16.msra.mxu1 %v9993_v51  ;;  %3583 = vmatprep.subr.bf16.mxu0 %v9994_v52  ;;  %v10074_v51 = vld [vmem:[%s15547_s1 + $0x1144] ss:$48 sps:$4 sm:$0xff]   ;;  %v10077_v52 = vld [vmem:[%s15547_s1 + $0x54c] ss:$48 sps:$4 sm:$0xff]  }
  0x31   :  { %3626 = vmatprep.subr.bf16.mxu1 %v9996_v55  ;;  %v10072_v55 = vld [vmem:[%s15547_s1 + $0x1140] ss:$48 sps:$4 sm:$0xff]  }
  0x33   :  { %3584 = vmatpush2.bf16.msra.mxu0 %v9998_v56  ;;  %v10075_v56 = vld [vmem:[%s15547_s1 + $0x548] ss:$48 sps:$4 sm:$0xff]  }
  0x34   :  { %3627 = vmatpush2.bf16.msra.mxu1 %v9999_v57  ;;  %3585 = vmatprep.subr.bf16.mxu0 %v10000_v58  ;;  %v10080_v57 = vld [vmem:[%s15547_s1 + $0x10e4] ss:$48 sps:$4 sm:$0xff]   ;;  %v10083_v58 = vld [vmem:[%s15547_s1 + $0x4ec] ss:$48 sps:$4 sm:$0xff]  }
  0x35   :  { %3628 = vmatprep.subr.bf16.mxu1 %v10002_v59  ;;  %v10078_v59 = vld [vmem:[%s15547_s1 + $0x10e0] ss:$48 sps:$4 sm:$0xff]  }
  0x37   :  { %3586 = vmatpush2.bf16.msra.mxu0 %v10004_v60  ;;  %v10081_v60 = vld [vmem:[%s15547_s1 + $0x4e8] ss:$48 sps:$4 sm:$0xff]  }
  0x38   :  { %3629 = vmatpush2.bf16.msra.mxu1 %v10005_v61  ;;  %3587 = vmatprep.subr.bf16.mxu0 %v10006_v62  ;;  %v10086_v61 = vld [vmem:[%s15547_s1 + $0x1084] ss:$48 sps:$4 sm:$0xff]   ;;  %v10089_v62 = vld [vmem:[%s15547_s1 + $0x48c] ss:$48 sps:$4 sm:$0xff]  }
  0x39   :  { %3630 = vmatprep.subr.bf16.mxu1 %v10008_v63  ;;  %v10084_v63 = vld [vmem:[%s15547_s1 + $0x1080] ss:$48 sps:$4 sm:$0xff]  }
  0x3b   :  { %3588 = vmatpush2.bf16.msra.mxu0 %v10010_v0  ;;  %v10087_v0 = vld [vmem:[%s15547_s1 + $0x488] ss:$48 sps:$4 sm:$0xff]  }
  0x3c   :  { %3631 = vmatpush2.bf16.msra.mxu1 %v10011_v1  ;;  %3589 = vmatprep.subr.bf16.mxu0 %v10012_v2  ;;  %v10092_v1 = vld [vmem:[%s15547_s1 + $0x1024] ss:$48 sps:$4 sm:$0xff]   ;;  %v10095_v2 = vld [vmem:[%s15547_s1 + $0x42c] ss:$48 sps:$4 sm:$0xff]  }
  0x3d   :  { %3632 = vmatprep.subr.bf16.mxu1 %v10014_v3  ;;  %v10090_v3 = vld [vmem:[%s15547_s1 + $0x1020] ss:$48 sps:$4 sm:$0xff]  }
  0x3f   :  { %3590 = vmatpush2.bf16.msra.mxu0 %v10016_v4  ;;  %v10093_v4 = vld [vmem:[%s15547_s1 + $0x428] ss:$48 sps:$4 sm:$0xff]  }
  0x40   :  { %3633 = vmatpush2.bf16.msra.mxu1 %v10017_v5  ;;  %3645 = vmatprep.subr.bf16.mxu0 %v10020_v10  ;;  %v10098_v5 = vld [vmem:[%s15547_s1 + $0xfc4] ss:$48 sps:$4 sm:$0xff]   ;;  %v10107_v10 = vld [vmem:[%s15547_s1 + $0x36c] ss:$48 sps:$4 sm:$0xff]  }
  0x41   :  { %3688 = vmatprep.subr.bf16.mxu1 %v10023_v11  ;;  %v10102_v11 = vld [vmem:[%s15547_s1 + $0xf60] ss:$48 sps:$4 sm:$0xff]  }
  0x42   :  { %3592 = vmatmul.mubr.bf16.vlgmr.msra.gmra.mxu0 %v11984_v12 }
  0x43   :  { %3635 = vmatmul.mubr.bf16.vlgmr.msra.gmra.mxu1 %v11986_v13  ;;  %3646 = vmatpush1.bf16.msra.mxu0 %v10018_v14  ;;  %v10105_v14 = vld [vmem:[%s15547_s1 + $0x368] ss:$48 sps:$4 sm:$0xff]  }
  0x44   :  { %3689 = vmatpush1.bf16.msra.mxu1 %v10021_v15  ;;  %3647 = vmatprep.subr.bf16.mxu0 %v10026_v16  ;;  %v10110_v15 = vld [vmem:[%s15547_s1 + $0xf04] ss:$48 sps:$4 sm:$0xff]   ;;  %v10113_v16 = vld [vmem:[%s15547_s1 + $0x30c] ss:$48 sps:$4 sm:$0xff]  }
  0x45   :  { %3690 = vmatprep.subr.bf16.mxu1 %v10029_v17  ;;  %3720 = vmatprep.mubr.bf16.mxu1 %v11915_v53  ;;  %v10108_v17 = vld [vmem:[%s15547_s1 + $0xf00] ss:$48 sps:$4 sm:$0xff]  }
  0x46   :  { %3677 = vmatprep.mubr.bf16.mxu0 %v12081_v44 }
  0x47   :  { %3648 = vmatpush1.bf16.msra.mxu0 %v10024_v18  ;;  %v10111_v18 = vld [vmem:[%s15547_s1 + $0x308] ss:$48 sps:$4 sm:$0xff]  }
  0x48   :  { %3691 = vmatpush1.bf16.msra.mxu1 %v10027_v19  ;;  %3649 = vmatprep.subr.bf16.mxu0 %v10032_v20  ;;  %v25_v19 = vld [vmem:[%s15546_s0 + $0x20] sm:$0xff]  ;;  %v31_v20 = vld [vmem:[%s15546_s0 + $0x50] sm:$0xff] }
  0x49   :  { %3692 = vmatprep.subr.bf16.mxu1 %v10035_v21  ;;  %v10116_v21 = vld [vmem:[%s15547_s1 + $0x8ac] ss:$48 sps:$4 sm:$0xff]  }
  0x4b   :  { %3650 = vmatpush1.bf16.msra.mxu0 %v10030_v22  ;;  %v10119_v22 = vld [vmem:[%s15547_s1 + $0xeac] ss:$48 sps:$4 sm:$0xff]  }
  0x4c   :  { %3693 = vmatpush1.bf16.msra.mxu1 %v10033_v23  ;;  %3651 = vmatprep.subr.bf16.mxu0 %v10038_v24  ;;  %v12198_v23 = vpack.c.bf16 %v31_v20, %v25_v19  ;;  %v10114_v24 = vld [vmem:[%s15547_s1 + $0x8a8] ss:$48 sps:$4 sm:$0xff]   ;;  %v10200_v19 = vld [vmem:[%s15547_s1 + $0x96c] ss:$48 sps:$4 sm:$0xff]  }
  0x4d   :  { %3694 = vmatprep.subr.bf16.mxu1 %v10041_v25  ;;  %v10117_v25 = vld [vmem:[%s15547_s1 + $0xea8] ss:$48 sps:$4 sm:$0xff]   ;;  %v10203_v20 = vld [vmem:[%s15547_s1 + $0xf6c] ss:$48 sps:$4 sm:$0xff]  }
  0x4f   :  { %3652 = vmatpush1.bf16.msra.mxu0 %v10036_v26  ;;  %v10122_v26 = vld [vmem:[%s15547_s1 + $0x84c] ss:$48 sps:$4 sm:$0xff]  }
  0x50   :  { %3695 = vmatpush1.bf16.msra.mxu1 %v10039_v27  ;;  %3653 = vmatprep.subr.bf16.mxu0 %v10044_v28  ;;  %v10125_v27 = vld [vmem:[%s15547_s1 + $0xe4c] ss:$48 sps:$4 sm:$0xff]   ;;  %v10120_v28 = vld [vmem:[%s15547_s1 + $0x848] ss:$48 sps:$4 sm:$0xff]  }
  0x51   :  { %3696 = vmatprep.subr.bf16.mxu1 %v10047_v29  ;;  %v10123_v29 = vld [vmem:[%s15547_s1 + $0xe48] ss:$48 sps:$4 sm:$0xff]  }
  0x53   :  { %3654 = vmatpush1.bf16.msra.mxu0 %v10042_v30  ;;  %v10128_v30 = vld [vmem:[%s15547_s1 + $0x7ec] ss:$48 sps:$4 sm:$0xff]  }
  0x54   :  { %3697 = vmatpush1.bf16.msra.mxu1 %v10045_v31  ;;  %3655 = vmatprep.subr.bf16.mxu0 %v10050_v32  ;;  %v10131_v31 = vld [vmem:[%s15547_s1 + $0xdec] ss:$48 sps:$4 sm:$0xff]   ;;  %v10126_v32 = vld [vmem:[%s15547_s1 + $0x7e8] ss:$48 sps:$4 sm:$0xff]  }
  0x55   :  { %3698 = vmatprep.subr.bf16.mxu1 %v10053_v33  ;;  %v10129_v33 = vld [vmem:[%s15547_s1 + $0xde8] ss:$48 sps:$4 sm:$0xff]  }
  0x57   :  { %3656 = vmatpush1.bf16.msra.mxu0 %v10048_v34  ;;  %v10134_v34 = vld [vmem:[%s15547_s1 + $0x78c] ss:$48 sps:$4 sm:$0xff]  }
  0x58   :  { %3699 = vmatpush1.bf16.msra.mxu1 %v10051_v35  ;;  %3657 = vmatprep.subr.bf16.mxu0 %v10056_v36  ;;  %v10137_v35 = vld [vmem:[%s15547_s1 + $0xd8c] ss:$48 sps:$4 sm:$0xff]   ;;  %v10132_v36 = vld [vmem:[%s15547_s1 + $0x788] ss:$48 sps:$4 sm:$0xff]  }
  0x59   :  { %3700 = vmatprep.subr.bf16.mxu1 %v10059_v37  ;;  %v10135_v37 = vld [vmem:[%s15547_s1 + $0xd88] ss:$48 sps:$4 sm:$0xff]  }
  0x5b   :  { %3658 = vmatpush1.bf16.msra.mxu0 %v10054_v38  ;;  %v10140_v38 = vld [vmem:[%s15547_s1 + $0x72c] ss:$48 sps:$4 sm:$0xff]  }
  0x5c   :  { %3701 = vmatpush1.bf16.msra.mxu1 %v10057_v39  ;;  %3659 = vmatprep.subr.bf16.mxu0 %v10062_v40  ;;  %v10143_v39 = vld [vmem:[%s15547_s1 + $0xd2c] ss:$48 sps:$4 sm:$0xff]   ;;  %v10138_v40 = vld [vmem:[%s15547_s1 + $0x728] ss:$48 sps:$4 sm:$0xff]  }
  0x5d   :  { %3702 = vmatprep.subr.bf16.mxu1 %v10065_v43  ;;  %v10149_v43 = vld [vmem:[%s15547_s1 + $0xccc] ss:$48 sps:$4 sm:$0xff]  }
  0x5f   :  { %3660 = vmatpush1.bf16.msra.mxu0 %v10060_v45  ;;  %v10144_v45 = vld [vmem:[%s15547_s1 + $0x6c8] ss:$48 sps:$4 sm:$0xff]  }
  0x60   :  { %3703 = vmatpush1.bf16.msra.mxu1 %v10063_v46  ;;  %3661 = vmatprep.subr.bf16.mxu0 %v10068_v47  ;;  %v10147_v46 = vld [vmem:[%s15547_s1 + $0xcc8] ss:$48 sps:$4 sm:$0xff]   ;;  %v10152_v47 = vld [vmem:[%s15547_s1 + $0x66c] ss:$48 sps:$4 sm:$0xff]  }
  0x61   :  { %3704 = vmatprep.subr.bf16.mxu1 %v10071_v48  ;;  %v10155_v48 = vld [vmem:[%s15547_s1 + $0xc6c] ss:$48 sps:$4 sm:$0xff]  }
  0x63   :  { %3662 = vmatpush2.bf16.msra.mxu0 %v10066_v49  ;;  %v10150_v49 = vld [vmem:[%s15547_s1 + $0x668] ss:$48 sps:$4 sm:$0xff]  }
  0x64   :  { %3705 = vmatpush2.bf16.msra.mxu1 %v10069_v50  ;;  %3663 = vmatprep.subr.bf16.mxu0 %v10074_v51  ;;  %v10153_v50 = vld [vmem:[%s15547_s1 + $0xc68] ss:$48 sps:$4 sm:$0xff]   ;;  %v10158_v51 = vld [vmem:[%s15547_s1 + $0x60c] ss:$48 sps:$4 sm:$0xff]  }
  0x65   :  { %3706 = vmatprep.subr.bf16.mxu1 %v10077_v52  ;;  %v10161_v52 = vld [vmem:[%s15547_s1 + $0xc0c] ss:$48 sps:$4 sm:$0xff]  }
  0x67   :  { %3664 = vmatpush2.bf16.msra.mxu0 %v10072_v55  ;;  %v10156_v55 = vld [vmem:[%s15547_s1 + $0x608] ss:$48 sps:$4 sm:$0xff]  }
  0x68   :  { %3707 = vmatpush2.bf16.msra.mxu1 %v10075_v56  ;;  %3665 = vmatprep.subr.bf16.mxu0 %v10080_v57  ;;  %v10159_v56 = vld [vmem:[%s15547_s1 + $0xc08] ss:$48 sps:$4 sm:$0xff]   ;;  %v10164_v57 = vld [vmem:[%s15547_s1 + $0xbac] ss:$48 sps:$4 sm:$0xff]  }
  0x69   :  { %3708 = vmatprep.subr.bf16.mxu1 %v10083_v58  ;;  %v10167_v58 = vld [vmem:[%s15547_s1 + $0x11ac] ss:$48 sps:$4 sm:$0xff]  }
  0x6b   :  { %3666 = vmatpush2.bf16.msra.mxu0 %v10078_v59  ;;  %v10162_v59 = vld [vmem:[%s15547_s1 + $0xba8] ss:$48 sps:$4 sm:$0xff]  }
  0x6c   :  { %3709 = vmatpush2.bf16.msra.mxu1 %v10081_v60  ;;  %3667 = vmatprep.subr.bf16.mxu0 %v10086_v61  ;;  %v10165_v60 = vld [vmem:[%s15547_s1 + $0x11a8] ss:$48 sps:$4 sm:$0xff]   ;;  %v10170_v61 = vld [vmem:[%s15547_s1 + $0xb4c] ss:$48 sps:$4 sm:$0xff]  }
  0x6d   :  { %3710 = vmatprep.subr.bf16.mxu1 %v10089_v62  ;;  %v10173_v62 = vld [vmem:[%s15547_s1 + $0x114c] ss:$48 sps:$4 sm:$0xff]  }
  0x6f   :  { %3668 = vmatpush2.bf16.msra.mxu0 %v10084_v63  ;;  %v10168_v63 = vld [vmem:[%s15547_s1 + $0xb48] ss:$48 sps:$4 sm:$0xff]  }
  0x70   :  { %3711 = vmatpush2.bf16.msra.mxu1 %v10087_v0  ;;  %3669 = vmatprep.subr.bf16.mxu0 %v10092_v1  ;;  %v10171_v0 = vld [vmem:[%s15547_s1 + $0x1148] ss:$48 sps:$4 sm:$0xff]   ;;  %v10176_v1 = vld [vmem:[%s15547_s1 + $0xaec] ss:$48 sps:$4 sm:$0xff]  }
  0x71   :  { %3712 = vmatprep.subr.bf16.mxu1 %v10095_v2  ;;  %v10179_v2 = vld [vmem:[%s15547_s1 + $0x10ec] ss:$48 sps:$4 sm:$0xff]  }
  0x73   :  { %3670 = vmatpush2.bf16.msra.mxu0 %v10090_v3  ;;  %v10174_v3 = vld [vmem:[%s15547_s1 + $0xae8] ss:$48 sps:$4 sm:$0xff]  }
  0x74   :  { %3713 = vmatpush2.bf16.msra.mxu1 %v10093_v4  ;;  %3671 = vmatprep.subr.bf16.mxu0 %v10098_v5  ;;  %v10177_v4 = vld [vmem:[%s15547_s1 + $0x10e8] ss:$48 sps:$4 sm:$0xff]   ;;  %v10182_v5 = vld [vmem:[%s15547_s1 + $0xa8c] ss:$48 sps:$4 sm:$0xff]  }
  0x75   :  { %3714 = vmatprep.subr.bf16.mxu1 %v10101_v6  ;;  %v10185_v6 = vld [vmem:[%s15547_s1 + $0x108c] ss:$48 sps:$4 sm:$0xff]  }
  0x77   :  { %3672 = vmatpush2.bf16.msra.mxu0 %v10096_v7  ;;  %v10180_v7 = vld [vmem:[%s15547_s1 + $0xa88] ss:$48 sps:$4 sm:$0xff]  }
  0x78   :  { %3715 = vmatpush2.bf16.msra.mxu1 %v10099_v8  ;;  %3673 = vmatprep.subr.bf16.mxu0 %v10104_v9  ;;  %v10183_v8 = vld [vmem:[%s15547_s1 + $0x1088] ss:$48 sps:$4 sm:$0xff]   ;;  %v10188_v9 = vld [vmem:[%s15547_s1 + $0xa2c] ss:$48 sps:$4 sm:$0xff]  }
  0x79   :  { %3716 = vmatprep.subr.bf16.mxu1 %v10107_v10  ;;  %v10191_v10 = vld [vmem:[%s15547_s1 + $0x102c] ss:$48 sps:$4 sm:$0xff]  }
  0x7b   :  { %3674 = vmatpush2.bf16.msra.mxu0 %v10102_v11  ;;  %v10186_v11 = vld [vmem:[%s15547_s1 + $0xa28] ss:$48 sps:$4 sm:$0xff]  }
  0x7c   :  { %3717 = vmatpush2.bf16.msra.mxu1 %v10105_v14  ;;  %3675 = vmatprep.subr.bf16.mxu0 %v10110_v15  ;;  %v10189_v14 = vld [vmem:[%s15547_s1 + $0x1028] ss:$48 sps:$4 sm:$0xff]   ;;  %v10194_v15 = vld [vmem:[%s15547_s1 + $0x9cc] ss:$48 sps:$4 sm:$0xff]  }
  0x7d   :  { %3718 = vmatprep.subr.bf16.mxu1 %v10113_v16  ;;  %v10197_v16 = vld [vmem:[%s15547_s1 + $0xfcc] ss:$48 sps:$4 sm:$0xff]  }
  0x7f   :  { %3676 = vmatpush2.bf16.msra.mxu0 %v10108_v17  ;;  %v10192_v17 = vld [vmem:[%s15547_s1 + $0x9c8] ss:$48 sps:$4 sm:$0xff]  }
  0x80   :  { %3719 = vmatpush2.bf16.msra.mxu1 %v10111_v18  ;;  %3731 = vmatprep.subr.bf16.mxu0 %v10116_v21  ;;  %v10195_v18 = vld [vmem:[%s15547_s1 + $0xfc8] ss:$48 sps:$4 sm:$0xff]  }
  0x81   :  { %3774 = vmatprep.subr.bf16.mxu1 %v10119_v22  ;;  %v10198_v21 = vld [vmem:[%s15547_s1 + $0x968] ss:$48 sps:$4 sm:$0xff]  }
  0x82   :  { %3678 = vmatmul.mubr.bf16.vlgmr.msra.gmra.mxu0 %v12198_v23  ;;  %v10201_v22 = vld [vmem:[%s15547_s1 + $0xf68] ss:$48 sps:$4 sm:$0xff]  }
  0x83   :  { %3721 = vmatmul.mubr.bf16.vlgmr.msra.gmra.mxu1 %v11984_v12  ;;  %3732 = vmatpush1.bf16.msra.mxu0 %v10114_v24  ;;  %v10206_v24 = vld [vmem:[%s15547_s1 + $0x90c] ss:$48 sps:$4 sm:$0xff]  }
  0x84   :  { %3775 = vmatpush1.bf16.msra.mxu1 %v10117_v25  ;;  %3733 = vmatprep.subr.bf16.mxu0 %v10122_v26  ;;  %v10209_v25 = vld [vmem:[%s15547_s1 + $0xf0c] ss:$48 sps:$4 sm:$0xff]   ;;  %v10204_v26 = vld [vmem:[%s15547_s1 + $0x908] ss:$48 sps:$4 sm:$0xff]  }
  0x85   :  { %3776 = vmatprep.subr.bf16.mxu1 %v10125_v27  ;;  %3763 = vmatprep.mubr.bf16.mxu0 %v11917_v54  ;;  %v10207_v27 = vld [vmem:[%s15547_s1 + $0xf08] ss:$48 sps:$4 sm:$0xff]  }
  0x86   :  { %3806 = vmatprep.mubr.bf16.mxu1 %v12081_v44 }
  0x87   :  { %3734 = vmatpush1.bf16.msra.mxu0 %v10120_v28  ;;  %v10212_v28 = vld [vmem:[%s15547_s1 + $0x2b4] ss:$48 sps:$4 sm:$0xff]  }
  0x88   :  { %3777 = vmatpush1.bf16.msra.mxu1 %v10123_v29  ;;  %3735 = vmatprep.subr.bf16.mxu0 %v10128_v30  ;;  %v10215_v29 = vld [vmem:[%s15547_s1 + $0x8b4] ss:$48 sps:$4 sm:$0xff]   ;;  %v10210_v30 = vld [vmem:[%s15547_s1 + $0x2b0] ss:$48 sps:$4 sm:$0xff]  }
  0x89   :  { %3778 = vmatprep.subr.bf16.mxu1 %v10131_v31  ;;  %v10213_v31 = vld [vmem:[%s15547_s1 + $0x8b0] ss:$48 sps:$4 sm:$0xff]  }
  0x8b   :  { %3736 = vmatpush1.bf16.msra.mxu0 %v10126_v32  ;;  %v10218_v32 = vld [vmem:[%s15547_s1 + $0x254] ss:$48 sps:$4 sm:$0xff]  }
  0x8c   :  { %3779 = vmatpush1.bf16.msra.mxu1 %v10129_v33  ;;  %3737 = vmatprep.subr.bf16.mxu0 %v10134_v34  ;;  %v10221_v33 = vld [vmem:[%s15547_s1 + $0x854] ss:$48 sps:$4 sm:$0xff]   ;;  %v10216_v34 = vld [vmem:[%s15547_s1 + $0x250] ss:$48 sps:$4 sm:$0xff]  }
  0x8d   :  { %3780 = vmatprep.subr.bf16.mxu1 %v10137_v35  ;;  %v10219_v35 = vld [vmem:[%s15547_s1 + $0x850] ss:$48 sps:$4 sm:$0xff]  }
  0x8f   :  { %3738 = vmatpush1.bf16.msra.mxu0 %v10132_v36  ;;  %v10224_v36 = vld [vmem:[%s15547_s1 + $0x1f4] ss:$48 sps:$4 sm:$0xff]  }
  0x90   :  { %3781 = vmatpush1.bf16.msra.mxu1 %v10135_v37  ;;  %3739 = vmatprep.subr.bf16.mxu0 %v10140_v38  ;;  %v10227_v37 = vld [vmem:[%s15547_s1 + $0x7f4] ss:$48 sps:$4 sm:$0xff]   ;;  %v10222_v38 = vld [vmem:[%s15547_s1 + $0x1f0] ss:$48 sps:$4 sm:$0xff]  }
  0x91   :  { %3782 = vmatprep.subr.bf16.mxu1 %v10143_v39  ;;  %v10225_v39 = vld [vmem:[%s15547_s1 + $0x7f0] ss:$48 sps:$4 sm:$0xff]  }
  0x93   :  { %3740 = vmatpush1.bf16.msra.mxu0 %v10138_v40  ;;  %v10230_v40 = vld [vmem:[%s15547_s1 + $0x194] ss:$48 sps:$4 sm:$0xff]  }
  0x94   :  { %3783 = vmatpush1.bf16.msra.mxu1 %v10141_v41  ;;  %3741 = vmatprep.subr.bf16.mxu0 %v10146_v42  ;;  %v10233_v41 = vld [vmem:[%s15547_s1 + $0x794] ss:$48 sps:$4 sm:$0xff]   ;;  %v10228_v42 = vld [vmem:[%s15547_s1 + $0x190] ss:$48 sps:$4 sm:$0xff]  }
  0x95   :  { %3784 = vmatprep.subr.bf16.mxu1 %v10149_v43  ;;  %v10231_v43 = vld [vmem:[%s15547_s1 + $0x790] ss:$48 sps:$4 sm:$0xff]  }
  0x97   :  { %3742 = vmatpush1.bf16.msra.mxu0 %v10144_v45  ;;  %v10236_v45 = vld [vmem:[%s15547_s1 + $0x134] ss:$48 sps:$4 sm:$0xff]  }
  0x98   :  { %3785 = vmatpush1.bf16.msra.mxu1 %v10147_v46  ;;  %3743 = vmatprep.subr.bf16.mxu0 %v10152_v47  ;;  %v10239_v46 = vld [vmem:[%s15547_s1 + $0x734] ss:$48 sps:$4 sm:$0xff]   ;;  %v10234_v47 = vld [vmem:[%s15547_s1 + $0x130] ss:$48 sps:$4 sm:$0xff]  }
  0x99   :  { %3786 = vmatprep.subr.bf16.mxu1 %v10155_v48  ;;  %v10237_v48 = vld [vmem:[%s15547_s1 + $0x730] ss:$48 sps:$4 sm:$0xff]  }
  0x9b   :  { %3744 = vmatpush1.bf16.msra.mxu0 %v10150_v49  ;;  %v10242_v49 = vld [vmem:[%s15547_s1 + $0xd4] ss:$48 sps:$4 sm:$0xff]  }
  0x9c   :  { %3787 = vmatpush1.bf16.msra.mxu1 %v10153_v50  ;;  %3745 = vmatprep.subr.bf16.mxu0 %v10158_v51  ;;  %v10245_v50 = vld [vmem:[%s15547_s1 + $0x6d4] ss:$48 sps:$4 sm:$0xff]   ;;  %v10240_v51 = vld [vmem:[%s15547_s1 + $0xd0] ss:$48 sps:$4 sm:$0xff]  }
  0x9d   :  { %3788 = vmatprep.subr.bf16.mxu1 %v10161_v52  ;;  %v10243_v52 = vld [vmem:[%s15547_s1 + $0x6d0] ss:$48 sps:$4 sm:$0xff]  }
  0x9f   :  { %3746 = vmatpush1.bf16.msra.mxu0 %v10156_v55  ;;  %v10248_v55 = vld [vmem:[%s15547_s1 + $0x74] ss:$48 sps:$4 sm:$0xff]  }
  0xa0   :  { %3789 = vmatpush1.bf16.msra.mxu1 %v10159_v56  ;;  %3747 = vmatprep.subr.bf16.mxu0 %v10164_v57  ;;  %v10251_v56 = vld [vmem:[%s15547_s1 + $0x674] ss:$48 sps:$4 sm:$0xff]   ;;  %v10246_v57 = vld [vmem:[%s15547_s1 + $0x70] ss:$48 sps:$4 sm:$0xff]  }
  0xa1   :  { %3790 = vmatprep.subr.bf16.mxu1 %v10167_v58  ;;  %v10249_v58 = vld [vmem:[%s15547_s1 + $0x670] ss:$48 sps:$4 sm:$0xff]  }
  0xa3   :  { %3748 = vmatpush2.bf16.msra.mxu0 %v10162_v59  ;;  %v10254_v59 = vld [vmem:[%s15547_s1 + $0x14] ss:$48 sps:$4 sm:$0xff]  }
  0xa4   :  { %3791 = vmatpush2.bf16.msra.mxu1 %v10165_v60  ;;  %3749 = vmatprep.subr.bf16.mxu0 %v10170_v61  ;;  %v10257_v60 = vld [vmem:[%s15547_s1 + $0x614] ss:$48 sps:$4 sm:$0xff]   ;;  %v10252_v61 = vld [vmem:[%s15547_s1 + $0x10] ss:$48 sps:$4 sm:$0xff]  }
  0xa5   :  { %3792 = vmatprep.subr.bf16.mxu1 %v10173_v62  ;;  %v10255_v62 = vld [vmem:[%s15547_s1 + $0x610] ss:$48 sps:$4 sm:$0xff]  }
  0xa7   :  { %3750 = vmatpush2.bf16.msra.mxu0 %v10168_v63  ;;  %v10260_v63 = vld [vmem:[%s15547_s1 + $0x5b4] ss:$48 sps:$4 sm:$0xff]  }
  0xa8   :  { %3793 = vmatpush2.bf16.msra.mxu1 %v10171_v0  ;;  %3751 = vmatprep.subr.bf16.mxu0 %v10176_v1  ;;  %v10263_v0 = vld [vmem:[%s15547_s1 + $0xbb4] ss:$48 sps:$4 sm:$0xff]   ;;  %v10258_v1 = vld [vmem:[%s15547_s1 + $0x5b0] ss:$48 sps:$4 sm:$0xff]  }
  0xa9   :  { %3794 = vmatprep.subr.bf16.mxu1 %v10179_v2  ;;  %v10261_v2 = vld [vmem:[%s15547_s1 + $0xbb0] ss:$48 sps:$4 sm:$0xff]  }
  0xab   :  { %3752 = vmatpush2.bf16.msra.mxu0 %v10174_v3  ;;  %v10266_v3 = vld [vmem:[%s15547_s1 + $0x554] ss:$48 sps:$4 sm:$0xff]  }
  0xac   :  { %3795 = vmatpush2.bf16.msra.mxu1 %v10177_v4  ;;  %3753 = vmatprep.subr.bf16.mxu0 %v10182_v5  ;;  %v10269_v4 = vld [vmem:[%s15547_s1 + $0xb54] ss:$48 sps:$4 sm:$0xff]   ;;  %v10264_v5 = vld [vmem:[%s15547_s1 + $0x550] ss:$48 sps:$4 sm:$0xff]  }
  0xad   :  { %3796 = vmatprep.subr.bf16.mxu1 %v10185_v6  ;;  %v10267_v6 = vld [vmem:[%s15547_s1 + $0xb50] ss:$48 sps:$4 sm:$0xff]  }
  0xaf   :  { %3754 = vmatpush2.bf16.msra.mxu0 %v10180_v7  ;;  %v10272_v7 = vld [vmem:[%s15547_s1 + $0x4f4] ss:$48 sps:$4 sm:$0xff]  }
  0xb0   :  { %3797 = vmatpush2.bf16.msra.mxu1 %v10183_v8  ;;  %3755 = vmatprep.subr.bf16.mxu0 %v10188_v9  ;;  %v10275_v8 = vld [vmem:[%s15547_s1 + $0xaf4] ss:$48 sps:$4 sm:$0xff]   ;;  %v10270_v9 = vld [vmem:[%s15547_s1 + $0x4f0] ss:$48 sps:$4 sm:$0xff]  }
  0xb1   :  { %3798 = vmatprep.subr.bf16.mxu1 %v10191_v10  ;;  %v10273_v10 = vld [vmem:[%s15547_s1 + $0xaf0] ss:$48 sps:$4 sm:$0xff]  }
  0xb3   :  { %3756 = vmatpush2.bf16.msra.mxu0 %v10186_v11  ;;  %v10278_v11 = vld [vmem:[%s15547_s1 + $0x494] ss:$48 sps:$4 sm:$0xff]  }
  0xb4   :  { %3799 = vmatpush2.bf16.msra.mxu1 %v10189_v14  ;;  %3757 = vmatprep.subr.bf16.mxu0 %v10194_v15  ;;  %v10281_v14 = vld [vmem:[%s15547_s1 + $0xa94] ss:$48 sps:$4 sm:$0xff]   ;;  %v10276_v15 = vld [vmem:[%s15547_s1 + $0x490] ss:$48 sps:$4 sm:$0xff]  }
  0xb5   :  { %3800 = vmatprep.subr.bf16.mxu1 %v10197_v16  ;;  %v10279_v16 = vld [vmem:[%s15547_s1 + $0xa90] ss:$48 sps:$4 sm:$0xff]  }
  0xb7   :  { %3758 = vmatpush2.bf16.msra.mxu0 %v10192_v17  ;;  %v10284_v17 = vld [vmem:[%s15547_s1 + $0x434] ss:$48 sps:$4 sm:$0xff]  }
  0xb8   :  { %3801 = vmatpush2.bf16.msra.mxu1 %v10195_v18  ;;  %3759 = vmatprep.subr.bf16.mxu0 %v10200_v19  ;;  %v10287_v18 = vld [vmem:[%s15547_s1 + $0xa34] ss:$48 sps:$4 sm:$0xff]   ;;  %v10282_v19 = vld [vmem:[%s15547_s1 + $0x430] ss:$48 sps:$4 sm:$0xff]  }
  0xb9   :  { %3802 = vmatprep.subr.bf16.mxu1 %v10203_v20  ;;  %v10285_v20 = vld [vmem:[%s15547_s1 + $0xa30] ss:$48 sps:$4 sm:$0xff]  }
  0xbb   :  { %3760 = vmatpush2.bf16.msra.mxu0 %v10198_v21  ;;  %v10290_v21 = vld [vmem:[%s15547_s1 + $0x3d4] ss:$48 sps:$4 sm:$0xff]  }
  0xbc   :  { %3803 = vmatpush2.bf16.msra.mxu1 %v10201_v22  ;;  %3761 = vmatprep.subr.bf16.mxu0 %v10206_v24  ;;  %v10293_v22 = vld [vmem:[%s15547_s1 + $0x9d4] ss:$48 sps:$4 sm:$0xff]   ;;  %v10288_v24 = vld [vmem:[%s15547_s1 + $0x3d0] ss:$48 sps:$4 sm:$0xff]  }
  0xbd   :  { %3804 = vmatprep.subr.bf16.mxu1 %v10209_v25  ;;  %v10291_v25 = vld [vmem:[%s15547_s1 + $0x9d0] ss:$48 sps:$4 sm:$0xff]  }
  0xbf   :  { %3762 = vmatpush2.bf16.msra.mxu0 %v10204_v26  ;;  %v619_v26 = vlaneseq }
  0xc0   :  { %3805 = vmatpush2.bf16.msra.mxu1 %v10207_v27  ;;  %3817 = vmatprep.subr.bf16.mxu0 %v10212_v28  ;;  %v10296_v27 = vld [vmem:[%s15547_s1 + $0x374] ss:$48 sps:$4 sm:$0xff]  }
  0xc1   :  { %3860 = vmatprep.subr.bf16.mxu1 %v10215_v29  ;;  %v10299_v28 = vld [vmem:[%s15547_s1 + $0x974] ss:$48 sps:$4 sm:$0xff]   ;;  %v10294_v29 = vld [vmem:[%s15547_s1 + $0x370] ss:$48 sps:$4 sm:$0xff]  }
  0xc2   :  { %3764 = vmatmul.mubr.bf16.vlgmr.msra.gmra.mxu0 %v11986_v13 }
  0xc3   :  { %3807 = vmatmul.mubr.bf16.vlgmr.msra.gmra.mxu1 %v12198_v23  ;;  %3818 = vmatpush1.bf16.msra.mxu0 %v10210_v30  ;;  %v10297_v30 = vld [vmem:[%s15547_s1 + $0x970] ss:$48 sps:$4 sm:$0xff]  }
  0xc4   :  { %3861 = vmatpush1.bf16.msra.mxu1 %v10213_v31  ;;  %3819 = vmatprep.subr.bf16.mxu0 %v10218_v32  ;;  %v12574_v31 = vshrl.u32 %v619_v26, 7  ;;  %v10302_v32 = vld [vmem:[%s15547_s1 + $0x314] ss:$48 sps:$4 sm:$0xff]   ;;  %v10357_v26 = vld [vmem:[%s15547_s1 + $0x5b8] ss:$48 sps:$4 sm:$0xff]  }
  0xc5   :  { %3862 = vmatprep.subr.bf16.mxu1 %v10221_v33  ;;  %3849 = vmatprep.mubr.bf16.mxu0 %v11915_v53  ;;  %v10305_v33 = vld [vmem:[%s15547_s1 + $0x914] ss:$48 sps:$4 sm:$0xff]  }
  0xc6   :  { %3892 = vmatprep.mubr.bf16.mxu1 %v11917_v54 }
  0xc7   :  { %3820 = vmatpush1.bf16.msra.mxu0 %v10216_v34  ;;  %v10300_v34 = vld [vmem:[%s15547_s1 + $0x310] ss:$48 sps:$4 sm:$0xff]  }
  0xc8   :  { %3863 = vmatpush1.bf16.msra.mxu1 %v10219_v35  ;;  %3821 = vmatprep.subr.bf16.mxu0 %v10224_v36  ;;  %v10303_v35 = vld [vmem:[%s15547_s1 + $0x910] ss:$48 sps:$4 sm:$0xff]  }
  0xc9   :  { %3864 = vmatprep.subr.bf16.mxu1 %v10227_v37  ;;  %v615_v36 = vld [vmem:[%s15548_s2] sm:$0xff]  ;;  %v12592_v37 = vsub.s32 0, %v12574_v31 }
  0xcb   :  { %3822 = vmatpush1.bf16.msra.mxu0 %v10222_v38  ;;  %v10308_v38 = vld [vmem:[%s15547_s1 + $0xeb4] ss:$48 sps:$4 sm:$0xff]  }
  0xcc   :  { %3865 = vmatpush1.bf16.msra.mxu1 %v10225_v39  ;;  %3823 = vmatprep.subr.bf16.mxu0 %v10230_v40  ;;  %v10311_v39 = vld [vmem:[%s15547_s1 + $0x2bc] ss:$48 sps:$4 sm:$0xff]   ;;  %v10306_v40 = vld [vmem:[%s15547_s1 + $0xeb0] ss:$48 sps:$4 sm:$0xff]  }
  0xcd   :  { %3866 = vmatprep.subr.bf16.mxu1 %v10233_v41  ;;  %v622_v41 = vrot.slane %v615_v36, %v12592_v37  ;;  %v10374_v36 = vld [vmem:[%s15547_s1 + $0x1094] ss:$48 sps:$4 sm:$0xff]  }
  0xcf   :  { %3824 = vmatpush1.bf16.msra.mxu0 %v10228_v42  ;;  %v10309_v42 = vld [vmem:[%s15547_s1 + $0x2b8] ss:$48 sps:$4 sm:$0xff]  }
  0xd0   :  { %3867 = vmatpush1.bf16.msra.mxu1 %v10231_v43  ;;  %3825 = vmatprep.subr.bf16.mxu0 %v10236_v45  ;;  %v10314_v43 = vld [vmem:[%s15547_s1 + $0xe54] ss:$48 sps:$4 sm:$0xff]   ;;  %v10317_v45 = vld [vmem:[%s15547_s1 + $0x25c] ss:$48 sps:$4 sm:$0xff]  }
  0xd1   :  { %3868 = vmatprep.subr.bf16.mxu1 %v10239_v46 }
  0xd3   :  { %3826 = vmatpush1.bf16.msra.mxu0 %v10234_v47 }
  0xd4   :  { %3869 = vmatpush1.bf16.msra.mxu1 %v10237_v48  ;;  %3827 = vmatprep.subr.bf16.mxu0 %v10242_v49  ;;  %v10312_v48 = vld [vmem:[%s15547_s1 + $0xe50] ss:$48 sps:$4 sm:$0xff]  }
  0xd5   :  { %3870 = vmatprep.subr.bf16.mxu1 %v10245_v50  ;;  %v10315_v50 = vld [vmem:[%s15547_s1 + $0x258] ss:$48 sps:$4 sm:$0xff]  }
  0xd7   :  { %3828 = vmatpush1.bf16.msra.mxu0 %v10240_v51 }
  0xd8   :  { %3871 = vmatpush1.bf16.msra.mxu1 %v10243_v52  ;;  %3829 = vmatprep.subr.bf16.mxu0 %v10248_v55  ;;  %v10320_v55 = vld [vmem:[%s15547_s1 + $0xdf4] ss:$48 sps:$4 sm:$0xff]  }
  0xd9   :  { %3872 = vmatprep.subr.bf16.mxu1 %v10251_v56  ;;  %v10323_v56 = vld [vmem:[%s15547_s1 + $0x1fc] ss:$48 sps:$4 sm:$0xff]  }
  0xdb   :  { %3830 = vmatpush1.bf16.msra.mxu0 %v10246_v57 }
  0xdc   :  { %3873 = vmatpush1.bf16.msra.mxu1 %v10249_v58  ;;  %3831 = vmatprep.subr.bf16.mxu0 %v10254_v59  ;;  %v10318_v59 = vld [vmem:[%s15547_s1 + $0xdf0] ss:$48 sps:$4 sm:$0xff]  }
  0xdd   :  { %3874 = vmatprep.subr.bf16.mxu1 %v10257_v60 }
  0xdf   :  { %3832 = vmatpush1.bf16.msra.mxu0 %v10252_v61  ;;  %v10321_v61 = vld [vmem:[%s15547_s1 + $0x1f8] ss:$48 sps:$4 sm:$0xff]  }
  0xe0   :  { %3875 = vmatpush1.bf16.msra.mxu1 %v10255_v62  ;;  %3833 = vmatprep.subr.bf16.mxu0 %v10260_v63  ;;  %v10326_v63 = vld [vmem:[%s15547_s1 + $0xd94] ss:$48 sps:$4 sm:$0xff]  }
  0xe1   :  { %3876 = vmatprep.subr.bf16.mxu1 %v10263_v0  ;;  %v10329_v0 = vld [vmem:[%s15547_s1 + $0x19c] ss:$48 sps:$4 sm:$0xff]  }
  0xe3   :  { %3834 = vmatpush2.bf16.msra.mxu0 %v10258_v1 }
  0xe4   :  { %3877 = vmatpush2.bf16.msra.mxu1 %v10261_v2  ;;  %3835 = vmatprep.subr.bf16.mxu0 %v10266_v3  ;;  %v10324_v2 = vld [vmem:[%s15547_s1 + $0xd90] ss:$48 sps:$4 sm:$0xff]   ;;  %v10327_v3 = vld [vmem:[%s15547_s1 + $0x198] ss:$48 sps:$4 sm:$0xff]  }
  0xe5   :  { %3878 = vmatprep.subr.bf16.mxu1 %v10269_v4  ;;  %v10332_v4 = vld [vmem:[%s15547_s1 + $0xd34] ss:$48 sps:$4 sm:$0xff]  }
  0xe7   :  { %3836 = vmatpush2.bf16.msra.mxu0 %v10264_v5  ;;  %v10335_v5 = vld [vmem:[%s15547_s1 + $0x13c] ss:$48 sps:$4 sm:$0xff]  }
  0xe8   :  { %3879 = vmatpush2.bf16.msra.mxu1 %v10267_v6  ;;  %3837 = vmatprep.subr.bf16.mxu0 %v10272_v7  ;;  %v10330_v6 = vld [vmem:[%s15547_s1 + $0xd30] ss:$48 sps:$4 sm:$0xff]   ;;  %v10333_v7 = vld [vmem:[%s15547_s1 + $0x138] ss:$48 sps:$4 sm:$0xff]  }
  0xe9   :  { %3880 = vmatprep.subr.bf16.mxu1 %v10275_v8  ;;  %v10338_v8 = vld [vmem:[%s15547_s1 + $0xcd4] ss:$48 sps:$4 sm:$0xff]  }
  0xeb   :  { %3838 = vmatpush2.bf16.msra.mxu0 %v10270_v9  ;;  %v10341_v9 = vld [vmem:[%s15547_s1 + $0xdc] ss:$48 sps:$4 sm:$0xff]  }
  0xec   :  { %3881 = vmatpush2.bf16.msra.mxu1 %v10273_v10  ;;  %3839 = vmatprep.subr.bf16.mxu0 %v10278_v11  ;;  %v10336_v10 = vld [vmem:[%s15547_s1 + $0xcd0] ss:$48 sps:$4 sm:$0xff]   ;;  %v10339_v11 = vld [vmem:[%s15547_s1 + $0xd8] ss:$48 sps:$4 sm:$0xff]  }
  0xed   :  { %3882 = vmatprep.subr.bf16.mxu1 %v10281_v14  ;;  %v10344_v14 = vld [vmem:[%s15547_s1 + $0xc74] ss:$48 sps:$4 sm:$0xff]  }
  0xef   :  { %3840 = vmatpush2.bf16.msra.mxu0 %v10276_v15  ;;  %v10347_v15 = vld [vmem:[%s15547_s1 + $0x7c] ss:$48 sps:$4 sm:$0xff]  }
  0xf0   :  { %3883 = vmatpush2.bf16.msra.mxu1 %v10279_v16  ;;  %3841 = vmatprep.subr.bf16.mxu0 %v10284_v17  ;;  %v10342_v16 = vld [vmem:[%s15547_s1 + $0xc70] ss:$48 sps:$4 sm:$0xff]   ;;  %v10345_v17 = vld [vmem:[%s15547_s1 + $0x78] ss:$48 sps:$4 sm:$0xff]  }
  0xf1   :  { %3884 = vmatprep.subr.bf16.mxu1 %v10287_v18  ;;  %v10350_v18 = vld [vmem:[%s15547_s1 + $0xc14] ss:$48 sps:$4 sm:$0xff]  }
  0xf3   :  { %3842 = vmatpush2.bf16.msra.mxu0 %v10282_v19  ;;  %v10353_v19 = vld [vmem:[%s15547_s1 + $0x1c] ss:$48 sps:$4 sm:$0xff]  }
  0xf4   :  { %3885 = vmatpush2.bf16.msra.mxu1 %v10285_v20  ;;  %3843 = vmatprep.subr.bf16.mxu0 %v10290_v21  ;;  %v10348_v20 = vld [vmem:[%s15547_s1 + $0xc10] ss:$48 sps:$4 sm:$0xff]   ;;  %v10351_v21 = vld [vmem:[%s15547_s1 + $0x18] ss:$48 sps:$4 sm:$0xff]  }
  0xf5   :  { %3886 = vmatprep.subr.bf16.mxu1 %v10293_v22  ;;  %v10356_v22 = vld [vmem:[%s15547_s1 + $0x11b4] ss:$48 sps:$4 sm:$0xff]  }
  0xf7   :  { %3844 = vmatpush2.bf16.msra.mxu0 %v10288_v24  ;;  %v10359_v24 = vld [vmem:[%s15547_s1 + $0x5bc] ss:$48 sps:$4 sm:$0xff]  }
  0xf8   :  { %3887 = vmatpush2.bf16.msra.mxu1 %v10291_v25  ;;  %3845 = vmatprep.subr.bf16.mxu0 %v10296_v27  ;;  %v10354_v25 = vld [vmem:[%s15547_s1 + $0x11b0] ss:$48 sps:$4 sm:$0xff]   ;;  %v10362_v27 = vld [vmem:[%s15547_s1 + $0x1154] ss:$48 sps:$4 sm:$0xff]  }
  0xf9   :  { %3888 = vmatprep.subr.bf16.mxu1 %v10299_v28  ;;  %v10365_v28 = vld [vmem:[%s15547_s1 + $0x55c] ss:$48 sps:$4 sm:$0xff]  }
  0xfb   :  { %3846 = vmatpush2.bf16.msra.mxu0 %v10294_v29  ;;  %v10360_v29 = vld [vmem:[%s15547_s1 + $0x1150] ss:$48 sps:$4 sm:$0xff]  }
  0xfc   :  { %3889 = vmatpush2.bf16.msra.mxu1 %v10297_v30  ;;  %3847 = vmatprep.subr.bf16.mxu0 %v10302_v32  ;;  %v10363_v30 = vld [vmem:[%s15547_s1 + $0x558] ss:$48 sps:$4 sm:$0xff]   ;;  %v10368_v32 = vld [vmem:[%s15547_s1 + $0x10f4] ss:$48 sps:$4 sm:$0xff]  }
  0xfd   :  { %3890 = vmatprep.subr.bf16.mxu1 %v10305_v33  ;;  %v10371_v33 = vld [vmem:[%s15547_s1 + $0x4fc] ss:$48 sps:$4 sm:$0xff]  }
  0xff   :  { %3848 = vmatpush2.bf16.msra.mxu0 %v10300_v34  ;;  %v10366_v34 = vld [vmem:[%s15547_s1 + $0x10f0] ss:$48 sps:$4 sm:$0xff]  }
 0x100   :  { %3891 = vmatpush2.bf16.msra.mxu1 %v10303_v35  ;;  %3903 = vmatprep.subr.bf16.mxu0 %v10308_v38  ;;  %v10369_v35 = vld [vmem:[%s15547_s1 + $0x4f8] ss:$48 sps:$4 sm:$0xff]   ;;  %v10377_v38 = vld [vmem:[%s15547_s1 + $0x49c] ss:$48 sps:$4 sm:$0xff]  }
 0x101   :  { %3946 = vmatprep.subr.bf16.mxu1 %v10311_v39  ;;  %v10372_v39 = vld [vmem:[%s15547_s1 + $0x1090] ss:$48 sps:$4 sm:$0xff]  }
 0x102   :  { %v3593_v46 = vpop.f32.mrf.mxu0  ;;  %3850 = vmatmul.mubr.bf16.vlgmr.msra.gmra.mxu0 %v11984_v12 }
 0x103   :  { %v3636_v47 = vpop.f32.mrf.mxu1  ;;  %3893 = vmatmul.mubr.bf16.vlgmr.msra.gmra.mxu1 %v11986_v13  ;;  %v3594_v49 = vadd.f32 %v3593_v46, %v622_v41  ;;  %3904 = vmatpush1.bf16.msra.mxu0 %v10306_v40  ;;  %v10375_v40 = vld [vmem:[%s15547_s1 + $0x498] ss:$48 sps:$4 sm:$0xff]   ;;  %v10386_v46 = vld [vmem:[%s15547_s1 + $0xfd4] ss:$48 sps:$4 sm:$0xff]  }
 0x104   :  { %3947 = vmatpush1.bf16.msra.mxu1 %v10309_v42  ;;  %v12621_v51 = vpop.f32.mrf.mxu0  ;;  %3905 = vmatprep.subr.bf16.mxu0 %v10314_v43  ;;  %v10383_v42 = vld [vmem:[%s15547_s1 + $0x43c] ss:$48 sps:$4 sm:$0xff]   ;;  %v10378_v43 = vld [vmem:[%s15547_s1 + $0x1030] ss:$48 sps:$4 sm:$0xff]  }
 0x105   :  { %v12623_v52 = vpop.f32.mrf.mxu1  ;;  %3948 = vmatprep.subr.bf16.mxu1 %v10317_v45  ;;  %v12631_v57 = vadd.f32 %v3636_v47, %v3594_v49  ;;  %3935 = vmatprep.mubr.bf16.mxu0 %v12081_v44  ;;  %v10381_v45 = vld [vmem:[%s15547_s1 + $0x438] ss:$48 sps:$4 sm:$0xff]   ;;  %v10389_v47 = vld [vmem:[%s15547_s1 + $0x3dc] ss:$48 sps:$4 sm:$0xff]  }
 0x106   :  { %3978 = vmatprep.mubr.bf16.mxu1 %v11915_v53  ;;  %v3597_v58 = vpop.f32.mrf.mxu0  ;;  %v10387_v49 = vld [vmem:[%s15547_s1 + $0x3d8] ss:$48 sps:$4 sm:$0xff]  }
 0x107   :  { %v3598_v60 = vadd.f32 %v3597_v58, %v622_v41  ;;  %3906 = vmatpush1.bf16.msra.mxu0 %v10312_v48  ;;  %v3640_v62 = vpop.f32.mrf.mxu1  ;;  %v10380_v41 = vld [vmem:[%s15547_s1 + $0x1034] ss:$48 sps:$4 sm:$0xff]   ;;  %v10384_v48 = vld [vmem:[%s15547_s1 + $0xfd0] ss:$48 sps:$4 sm:$0xff]   ;;  %v10393_v58 = vld [vmem:[%s15547_s1 + $0x378] ss:$48 sps:$4 sm:$0xff]  }
 0x108   :  { %3949 = vmatpush1.bf16.msra.mxu1 %v10315_v50  ;;  %3907 = vmatprep.subr.bf16.mxu0 %v10320_v55  ;;  %v10392_v50 = vld [vmem:[%s15547_s1 + $0xf74] ss:$48 sps:$4 sm:$0xff]   ;;  %v10395_v55 = vld [vmem:[%s15547_s1 + $0x37c] ss:$48 sps:$4 sm:$0xff]  }
 0x109   :  { %3950 = vmatprep.subr.bf16.mxu1 %v10323_v56  ;;  %v12647_v1 = vadd.f32 %v3640_v62, %v3598_v60  ;;  %v10390_v56 = vld [vmem:[%s15547_s1 + $0xf70] ss:$48 sps:$4 sm:$0xff]   ;;  %v10401_v60 = vld [vmem:[%s15547_s1 + $0x31c] ss:$48 sps:$4 sm:$0xff]   ;;  %v10399_v62 = vld [vmem:[%s15547_s1 + $0x318] ss:$48 sps:$4 sm:$0xff]  }
 0x10b   :  { %3908 = vmatpush1.bf16.msra.mxu0 %v10318_v59  ;;  %v10398_v59 = vld [vmem:[%s15547_s1 + $0xf14] ss:$48 sps:$4 sm:$0xff]  }
 0x10c   :  { %3951 = vmatpush1.bf16.msra.mxu1 %v10321_v61  ;;  %3909 = vmatprep.subr.bf16.mxu0 %v10326_v63  ;;  %v10396_v61 = vld [vmem:[%s15547_s1 + $0xf10] ss:$48 sps:$4 sm:$0xff]   ;;  %v10404_v63 = vld [vmem:[%s15547_s1 + $0x8bc] ss:$48 sps:$4 sm:$0xff]  }
 0x10d   :  { %3952 = vmatprep.subr.bf16.mxu1 %v10329_v0  ;;  %v10407_v0 = vld [vmem:[%s15547_s1 + $0xebc] ss:$48 sps:$4 sm:$0xff]  }
 0x10f   :  { %3910 = vmatpush1.bf16.msra.mxu0 %v10324_v2  ;;  %v10402_v2 = vld [vmem:[%s15547_s1 + $0x8b8] ss:$48 sps:$4 sm:$0xff]  }
 0x110   :  { %3953 = vmatpush1.bf16.msra.mxu1 %v10327_v3  ;;  %3911 = vmatprep.subr.bf16.mxu0 %v10332_v4  ;;  %v10405_v3 = vld [vmem:[%s15547_s1 + $0xeb8] ss:$48 sps:$4 sm:$0xff]   ;;  %v12811_v4 = vpop.f32.mrf.mxu0 }
 0x111   :  { %3954 = vmatprep.subr.bf16.mxu1 %v10335_v5  ;;  %v10410_v5 = vld [vmem:[%s15547_s1 + $0x85c] ss:$48 sps:$4 sm:$0xff]  }
 0x113   :  { %3912 = vmatpush1.bf16.msra.mxu0 %v10330_v6  ;;  %v10413_v6 = vld [vmem:[%s15547_s1 + $0xe5c] ss:$48 sps:$4 sm:$0xff]  }
 0x114   :  { %3955 = vmatpush1.bf16.msra.mxu1 %v10333_v7  ;;  %3913 = vmatprep.subr.bf16.mxu0 %v10338_v8  ;;  %v10408_v7 = vld [vmem:[%s15547_s1 + $0x858] ss:$48 sps:$4 sm:$0xff]  }
 0x115   :  { %3956 = vmatprep.subr.bf16.mxu1 %v10341_v9  ;;  %v10411_v8 = vld [vmem:[%s15547_s1 + $0xe58] ss:$48 sps:$4 sm:$0xff]  }
 0x117   :  { %3914 = vmatpush1.bf16.msra.mxu0 %v10336_v10 }
 0x118   :  { %3957 = vmatpush1.bf16.msra.mxu1 %v10339_v11  ;;  %3915 = vmatprep.subr.bf16.mxu0 %v10344_v14  ;;  %v10416_v14 = vld [vmem:[%s15547_s1 + $0x7fc] ss:$48 sps:$4 sm:$0xff]  }
 0x119   :  { %3958 = vmatprep.subr.bf16.mxu1 %v10347_v15  ;;  %v10419_v15 = vld [vmem:[%s15547_s1 + $0xdfc] ss:$48 sps:$4 sm:$0xff]  }
 0x11b   :  { %3916 = vmatpush1.bf16.msra.mxu0 %v10342_v16  ;;  %v10414_v16 = vld [vmem:[%s15547_s1 + $0x7f8] ss:$48 sps:$4 sm:$0xff]  }
 0x11c   :  { %3959 = vmatpush1.bf16.msra.mxu1 %v10345_v17  ;;  %3917 = vmatprep.subr.bf16.mxu0 %v10350_v18 }
 0x11d   :  { %3960 = vmatprep.subr.bf16.mxu1 %v10353_v19 }
 0x11f   :  { %3918 = vmatpush1.bf16.msra.mxu0 %v10348_v20  ;;  %v10422_v20 = vld [vmem:[%s15547_s1 + $0x79c] ss:$48 sps:$4 sm:$0xff]  }
 0x120   :  { %3961 = vmatpush1.bf16.msra.mxu1 %v10351_v21  ;;  %3919 = vmatprep.subr.bf16.mxu0 %v10356_v22  ;;  %v10425_v21 = vld [vmem:[%s15547_s1 + $0xd9c] ss:$48 sps:$4 sm:$0xff]  }
 0x121   :  { %3962 = vmatprep.subr.bf16.mxu1 %v10359_v24 }
 0x123   :  { %3920 = vmatpush2.bf16.msra.mxu0 %v10354_v25 }
 0x124   :  { %3963 = vmatpush2.bf16.msra.mxu1 %v10357_v26  ;;  %3921 = vmatprep.subr.bf16.mxu0 %v10362_v27  ;;  %v10423_v26 = vld [vmem:[%s15547_s1 + $0xd98] ss:$48 sps:$4 sm:$0xff]   ;;  %v10428_v27 = vld [vmem:[%s15547_s1 + $0x73c] ss:$48 sps:$4 sm:$0xff]  }
 0x125   :  { %3964 = vmatprep.subr.bf16.mxu1 %v10365_v28  ;;  %v10431_v28 = vld [vmem:[%s15547_s1 + $0xd3c] ss:$48 sps:$4 sm:$0xff]  }
 0x127   :  { %3922 = vmatpush2.bf16.msra.mxu0 %v10360_v29 }
 0x128   :  { %3965 = vmatpush2.bf16.msra.mxu1 %v10363_v30  ;;  %3923 = vmatprep.subr.bf16.mxu0 %v10368_v32  ;;  %v10426_v30 = vld [vmem:[%s15547_s1 + $0x738] ss:$48 sps:$4 sm:$0xff]  }
 0x129   :  { %3966 = vmatprep.subr.bf16.mxu1 %v10371_v33  ;;  %v10429_v32 = vld [vmem:[%s15547_s1 + $0xd38] ss:$48 sps:$4 sm:$0xff]   ;;  %v10434_v33 = vld [vmem:[%s15547_s1 + $0x6dc] ss:$48 sps:$4 sm:$0xff]  }
 0x12b   :  { %3924 = vmatpush2.bf16.msra.mxu0 %v10366_v34  ;;  %v10437_v34 = vld [vmem:[%s15547_s1 + $0xcdc] ss:$48 sps:$4 sm:$0xff]  }
 0x12c   :  { %3967 = vmatpush2.bf16.msra.mxu1 %v10369_v35  ;;  %3925 = vmatprep.subr.bf16.mxu0 %v10374_v36  ;;  %v10432_v35 = vld [vmem:[%s15547_s1 + $0x6d8] ss:$48 sps:$4 sm:$0xff]  }
 0x12d   :  { %3968 = vmatprep.subr.bf16.mxu1 %v10377_v38  ;;  %v10435_v36 = vld [vmem:[%s15547_s1 + $0xcd8] ss:$48 sps:$4 sm:$0xff]   ;;  %v10440_v38 = vld [vmem:[%s15547_s1 + $0x67c] ss:$48 sps:$4 sm:$0xff]  }
 0x12f   :  { %3926 = vmatpush2.bf16.msra.mxu0 %v10372_v39  ;;  %v10443_v39 = vld [vmem:[%s15547_s1 + $0xc7c] ss:$48 sps:$4 sm:$0xff]  }
 0x130   :  { %3969 = vmatpush2.bf16.msra.mxu1 %v10375_v40  ;;  %3927 = vmatprep.subr.bf16.mxu0 %v10380_v41  ;;  %v10438_v40 = vld [vmem:[%s15547_s1 + $0x678] ss:$48 sps:$4 sm:$0xff]  }
 0x131   :  { %3970 = vmatprep.subr.bf16.mxu1 %v10383_v42  ;;  %v10441_v41 = vld [vmem:[%s15547_s1 + $0xc78] ss:$48 sps:$4 sm:$0xff]   ;;  %v10446_v42 = vld [vmem:[%s15547_s1 + $0x61c] ss:$48 sps:$4 sm:$0xff]  }
 0x133   :  { %3928 = vmatpush2.bf16.msra.mxu0 %v10378_v43  ;;  %v10449_v43 = vld [vmem:[%s15547_s1 + $0xc1c] ss:$48 sps:$4 sm:$0xff]  }
 0x134   :  { %3971 = vmatpush2.bf16.msra.mxu1 %v10381_v45  ;;  %3929 = vmatprep.subr.bf16.mxu0 %v10386_v46  ;;  %v10444_v45 = vld [vmem:[%s15547_s1 + $0x618] ss:$48 sps:$4 sm:$0xff]  }
 0x135   :  { %3972 = vmatprep.subr.bf16.mxu1 %v10389_v47  ;;  %v10447_v46 = vld [vmem:[%s15547_s1 + $0xc18] ss:$48 sps:$4 sm:$0xff]   ;;  %v10452_v47 = vld [vmem:[%s15547_s1 + $0xbbc] ss:$48 sps:$4 sm:$0xff]  }
 0x137   :  { %3930 = vmatpush2.bf16.msra.mxu0 %v10384_v48  ;;  %v10455_v48 = vld [vmem:[%s15547_s1 + $0x11bc] ss:$48 sps:$4 sm:$0xff]  }
 0x138   :  { %3973 = vmatpush2.bf16.msra.mxu1 %v10387_v49  ;;  %3931 = vmatprep.subr.bf16.mxu0 %v10392_v50  ;;  %v10450_v49 = vld [vmem:[%s15547_s1 + $0xbb8] ss:$48 sps:$4 sm:$0xff]  }
 0x139   :  { %3974 = vmatprep.subr.bf16.mxu1 %v10395_v55  ;;  %v10453_v50 = vld [vmem:[%s15547_s1 + $0x11b8] ss:$48 sps:$4 sm:$0xff]   ;;  %v10458_v55 = vld [vmem:[%s15547_s1 + $0xb5c] ss:$48 sps:$4 sm:$0xff]  }
 0x13b   :  { %3932 = vmatpush2.bf16.msra.mxu0 %v10390_v56  ;;  %v10461_v56 = vld [vmem:[%s15547_s1 + $0x115c] ss:$48 sps:$4 sm:$0xff]  }
 0x13c   :  { %3975 = vmatpush2.bf16.msra.mxu1 %v10393_v58  ;;  %3933 = vmatprep.subr.bf16.mxu0 %v10398_v59  ;;  %v10456_v58 = vld [vmem:[%s15547_s1 + $0xb58] ss:$48 sps:$4 sm:$0xff]  }
 0x13d   :  { %3976 = vmatprep.subr.bf16.mxu1 %v10401_v60  ;;  %v10459_v59 = vld [vmem:[%s15547_s1 + $0x1158] ss:$48 sps:$4 sm:$0xff]   ;;  %v10464_v60 = vld [vmem:[%s15547_s1 + $0xafc] ss:$48 sps:$4 sm:$0xff]  }
 0x13f   :  { %3934 = vmatpush2.bf16.msra.mxu0 %v10396_v61  ;;  %v10467_v61 = vld [vmem:[%s15547_s1 + $0x10fc] ss:$48 sps:$4 sm:$0xff]  }
 0x140   :  { %3977 = vmatpush2.bf16.msra.mxu1 %v10399_v62  ;;  %3989 = vmatprep.subr.bf16.mxu0 %v10404_v63  ;;  %v10462_v62 = vld [vmem:[%s15547_s1 + $0xaf8] ss:$48 sps:$4 sm:$0xff]  }
 0x141   :  { %4032 = vmatprep.subr.bf16.mxu1 %v10407_v0  ;;  %v10465_v63 = vld [vmem:[%s15547_s1 + $0x10f8] ss:$48 sps:$4 sm:$0xff]   ;;  %v10470_v0 = vld [vmem:[%s15547_s1 + $0xa9c] ss:$48 sps:$4 sm:$0xff]  }
 0x142   :  { %v3679_v9 = vpop.f32.mrf.mxu0  ;;  %3936 = vmatmul.mubr.bf16.vlgmr.msra.gmra.mxu0 %v12198_v23 }
 0x143   :  { %3979 = vmatmul.mubr.bf16.vlgmr.msra.gmra.mxu1 %v11984_v12  ;;  %v3680_v10 = vadd.f32 %v3679_v9, %v12631_v57  ;;  %3990 = vmatpush1.bf16.msra.mxu0 %v10402_v2  ;;  %v10417_v57 = vld [vmem:[%s15547_s1 + $0xdf8] ss:$48 sps:$4 sm:$0xff]   ;;  %v10473_v2 = vld [vmem:[%s15547_s1 + $0x109c] ss:$48 sps:$4 sm:$0xff]  }
 0x144   :  { %4033 = vmatpush1.bf16.msra.mxu1 %v10405_v3  ;;  %v12828_v11 = vpop.f32.mrf.mxu0  ;;  %3991 = vmatprep.subr.bf16.mxu0 %v10410_v5  ;;  %v10468_v3 = vld [vmem:[%s15547_s1 + $0xa98] ss:$48 sps:$4 sm:$0xff]  }
 0x145   :  { %4034 = vmatprep.subr.bf16.mxu1 %v10413_v6  ;;  %4021 = vmatprep.mubr.bf16.mxu0 %v11917_v54  ;;  %v4333_v18 = vmul.f32 0.01, %v3680_v10  ;;  %v10471_v5 = vld [vmem:[%s15547_s1 + $0x1098] ss:$48 sps:$4 sm:$0xff]   ;;  %v10476_v6 = vld [vmem:[%s15547_s1 + $0xa3c] ss:$48 sps:$4 sm:$0xff]  }
 0x146   :  { %4064 = vmatprep.mubr.bf16.mxu1 %v12081_v44  ;;  %v3683_v17 = vpop.f32.mrf.mxu0  ;;  %v10477_v9 = vld [vmem:[%s15547_s1 + $0x1038] ss:$48 sps:$4 sm:$0xff]  }
 0x147   :  { %v3684_v19 = vadd.f32 %v3683_v17, %v12647_v1  ;;  %3992 = vmatpush1.bf16.msra.mxu0 %v10408_v7  ;;  %v4357_v24 = vmax.f32 %v3680_v10, %v4333_v18  ;;  %v10420_v1 = vld [vmem:[%s15547_s1 + $0x798] ss:$48 sps:$4 sm:$0xff]   ;;  %v10479_v7 = vld [vmem:[%s15547_s1 + $0x103c] ss:$48 sps:$4 sm:$0xff]  }
 0x148   :  { %4035 = vmatpush1.bf16.msra.mxu1 %v10411_v8  ;;  %3993 = vmatprep.subr.bf16.mxu0 %v10416_v14  ;;  %v10474_v8 = vld [vmem:[%s15547_s1 + $0xa38] ss:$48 sps:$4 sm:$0xff]   ;;  %v10482_v10 = vld [vmem:[%s15547_s1 + $0x9dc] ss:$48 sps:$4 sm:$0xff]  }
 0x149   :  { %4036 = vmatprep.subr.bf16.mxu1 %v10419_v15  ;;  %v4345_v22 = vmul.f32 0.01, %v3684_v19  ;;  %v10485_v14 = vld [vmem:[%s15547_s1 + $0xfdc] ss:$48 sps:$4 sm:$0xff]   ;;  %v12973_v15 = vpop.f32.mrf.mxu1 }
 0x14a   :  { %v10488_v18 = vld [vmem:[%s15547_s1 + $0x97c] ss:$48 sps:$4 sm:$0xff]  }
 0x14b   :  { %v4369_v25 = vmax.f32 %v3684_v19, %v4345_v22  ;;  %3994 = vmatpush1.bf16.msra.mxu0 %v10414_v16  ;;  %v10480_v16 = vld [vmem:[%s15547_s1 + $0x9d8] ss:$48 sps:$4 sm:$0xff]   ;;  %v3722_v17 = vpop.f32.mrf.mxu1  ;;  %v10491_v19 = vld [vmem:[%s15547_s1 + $0xf7c] ss:$48 sps:$4 sm:$0xff]  }
 0x14c   :  { %4037 = vmatpush1.bf16.msra.mxu1 %v10417_v57  ;;  %3995 = vmatprep.subr.bf16.mxu0 %v10422_v20  ;;  %v10483_v57 = vld [vmem:[%s15547_s1 + $0xfd8] ss:$48 sps:$4 sm:$0xff]  }
 0x14d   :  { %4038 = vmatprep.subr.bf16.mxu1 %v10425_v21  ;;  %v12863_v29 = vpack.c.bf16 %v4369_v25, %v4357_v24  ;;  %v10486_v20 = vld [vmem:[%s15547_s1 + $0x978] ss:$48 sps:$4 sm:$0xff]   ;;  %v12993_v22 = vpop.f32.mrf.mxu1  ;;  %v10494_v24 = vld [vmem:[%s15547_s1 + $0x91c] ss:$48 sps:$4 sm:$0xff]  }
 0x14e   :  { %v10489_v21 = vld [vmem:[%s15547_s1 + $0xf78] ss:$48 sps:$4 sm:$0xff]   ;;  %v10497_v25 = vld [vmem:[%s15547_s1 + $0xf1c] ss:$48 sps:$4 sm:$0xff]  }
 0x14f   :  { %3996 = vmatpush1.bf16.msra.mxu0 %v10420_v1  ;;  %v13002_v1 = vsub.s32 2, %v12574_v31 }
 0x150   :  { %4039 = vmatpush1.bf16.msra.mxu1 %v10423_v26  ;;  %3997 = vmatprep.subr.bf16.mxu0 %v10428_v27  ;;  %v10492_v26 = vld [vmem:[%s15547_s1 + $0x918] ss:$48 sps:$4 sm:$0xff]  }
 0x151   :  { %4040 = vmatprep.subr.bf16.mxu1 %v10431_v28  ;;  %v10495_v27 = vld [vmem:[%s15547_s1 + $0xf18] ss:$48 sps:$4 sm:$0xff]   ;;  %v3726_v28 = vpop.f32.mrf.mxu1 }
 0x153   :  { %3998 = vmatpush1.bf16.msra.mxu0 %v10426_v30  ;;  %v10500_v30 = vld [vmem:[%s15547_s1 + $0x2c4] ss:$48 sps:$4 sm:$0xff]  }
 0x154   :  { %4041 = vmatpush1.bf16.msra.mxu1 %v10429_v32  ;;  %3999 = vmatprep.subr.bf16.mxu0 %v10434_v33  ;;  %v10503_v32 = vld [vmem:[%s15547_s1 + $0x8c4] ss:$48 sps:$4 sm:$0xff]  }
 0x155   :  { %4042 = vmatprep.subr.bf16.mxu1 %v10437_v34  ;;  %v13019_v33 = vld [vmem:[%s15548_s2] sm:$0xff] }
 0x156   :  { %v630_v34 = vrot.slane %v13019_v33, %v13002_v1 }
 0x157   :  { %4000 = vmatpush1.bf16.msra.mxu0 %v10432_v35  ;;  %v10498_v35 = vld [vmem:[%s15547_s1 + $0x2c0] ss:$48 sps:$4 sm:$0xff]  }
 0x158   :  { %4043 = vmatpush1.bf16.msra.mxu1 %v10435_v36  ;;  %4001 = vmatprep.subr.bf16.mxu0 %v10440_v38  ;;  %v10501_v36 = vld [vmem:[%s15547_s1 + $0x8c0] ss:$48 sps:$4 sm:$0xff]   ;;  %v13029_v38 = vpop.f32.mrf.mxu0 }
 0x159   :  { %4044 = vmatprep.subr.bf16.mxu1 %v10443_v39  ;;  %v13031_v39 = vpop.f32.mrf.mxu1 }
 0x15b   :  { %4002 = vmatpush1.bf16.msra.mxu0 %v10438_v40  ;;  %v10506_v40 = vld [vmem:[%s15547_s1 + $0x264] ss:$48 sps:$4 sm:$0xff]  }
 0x15c   :  { %4045 = vmatpush1.bf16.msra.mxu1 %v10441_v41  ;;  %4003 = vmatprep.subr.bf16.mxu0 %v10446_v42  ;;  %v10509_v41 = vld [vmem:[%s15547_s1 + $0x864] ss:$48 sps:$4 sm:$0xff]   ;;  %v3723_v42 = vadd.f32 %v3722_v17, %v630_v34 }
 0x15d   :  { %4046 = vmatprep.subr.bf16.mxu1 %v10449_v43  ;;  %v10504_v43 = vld [vmem:[%s15547_s1 + $0x260] ss:$48 sps:$4 sm:$0xff]  }
 0x15f   :  { %4004 = vmatpush1.bf16.msra.mxu0 %v10444_v45  ;;  %v10507_v45 = vld [vmem:[%s15547_s1 + $0x860] ss:$48 sps:$4 sm:$0xff]  }
 0x160   :  { %4047 = vmatpush1.bf16.msra.mxu1 %v10447_v46  ;;  %4005 = vmatprep.subr.bf16.mxu0 %v10452_v47 }
 0x161   :  { %4048 = vmatprep.subr.bf16.mxu1 %v10455_v48 }
 0x163   :  { %4006 = vmatpush2.bf16.msra.mxu0 %v10450_v49 }
 0x164   :  { %4049 = vmatpush2.bf16.msra.mxu1 %v10453_v50  ;;  %4007 = vmatprep.subr.bf16.mxu0 %v10458_v55  ;;  %v10512_v55 = vld [vmem:[%s15547_s1 + $0x204] ss:$48 sps:$4 sm:$0xff]  }
 0x165   :  { %4050 = vmatprep.subr.bf16.mxu1 %v10461_v56  ;;  %v10515_v56 = vld [vmem:[%s15547_s1 + $0x804] ss:$48 sps:$4 sm:$0xff]  }
 0x167   :  { %4008 = vmatpush2.bf16.msra.mxu0 %v10456_v58  ;;  %v3727_v58 = vadd.f32 %v3726_v28, %v630_v34  ;;  %v10534_v28 = vld [vmem:[%s15547_s1 + $0x80] ss:$48 sps:$4 sm:$0xff]   ;;  %v10545_v34 = vld [vmem:[%s15547_s1 + $0x624] ss:$48 sps:$4 sm:$0xff]  }
 0x168   :  { %4051 = vmatpush2.bf16.msra.mxu1 %v10459_v59  ;;  %4009 = vmatprep.subr.bf16.mxu0 %v10464_v60  ;;  %v10510_v60 = vld [vmem:[%s15547_s1 + $0x200] ss:$48 sps:$4 sm:$0xff]  }
 0x169   :  { %4052 = vmatprep.subr.bf16.mxu1 %v10467_v61  ;;  %v10513_v61 = vld [vmem:[%s15547_s1 + $0x800] ss:$48 sps:$4 sm:$0xff]  }
 0x16b   :  { %4010 = vmatpush2.bf16.msra.mxu0 %v10462_v62 }
 0x16c   :  { %4053 = vmatpush2.bf16.msra.mxu1 %v10465_v63  ;;  %4011 = vmatprep.subr.bf16.mxu0 %v10470_v0 }
 0x16d   :  { %4054 = vmatprep.subr.bf16.mxu1 %v10473_v2  ;;  %v10518_v2 = vld [vmem:[%s15547_s1 + $0x1a4] ss:$48 sps:$4 sm:$0xff]  }
 0x16f   :  { %4012 = vmatpush2.bf16.msra.mxu0 %v10468_v3  ;;  %v10521_v3 = vld [vmem:[%s15547_s1 + $0x7a4] ss:$48 sps:$4 sm:$0xff]  }
 0x170   :  { %4055 = vmatpush2.bf16.msra.mxu1 %v10471_v5  ;;  %4013 = vmatprep.subr.bf16.mxu0 %v10476_v6 }
 0x171   :  { %4056 = vmatprep.subr.bf16.mxu1 %v10479_v7  ;;  %v10516_v7 = vld [vmem:[%s15547_s1 + $0x1a0] ss:$48 sps:$4 sm:$0xff]  }
 0x173   :  { %4014 = vmatpush2.bf16.msra.mxu0 %v10474_v8  ;;  %v10519_v8 = vld [vmem:[%s15547_s1 + $0x7a0] ss:$48 sps:$4 sm:$0xff]  }
 0x174   :  { %4057 = vmatpush2.bf16.msra.mxu1 %v10477_v9  ;;  %4015 = vmatprep.subr.bf16.mxu0 %v10482_v10  ;;  %v10524_v10 = vld [vmem:[%s15547_s1 + $0x144] ss:$48 sps:$4 sm:$0xff]  }
 0x175   :  { %4058 = vmatprep.subr.bf16.mxu1 %v10485_v14  ;;  %v10527_v14 = vld [vmem:[%s15547_s1 + $0x744] ss:$48 sps:$4 sm:$0xff]  }
 0x177   :  { %4016 = vmatpush2.bf16.msra.mxu0 %v10480_v16 }
 0x178   :  { %4059 = vmatpush2.bf16.msra.mxu1 %v10483_v57  ;;  %4017 = vmatprep.subr.bf16.mxu0 %v10488_v18  ;;  %v10522_v18 = vld [vmem:[%s15547_s1 + $0x140] ss:$48 sps:$4 sm:$0xff]  }
 0x179   :  { %4060 = vmatprep.subr.bf16.mxu1 %v10491_v19  ;;  %v10525_v19 = vld [vmem:[%s15547_s1 + $0x740] ss:$48 sps:$4 sm:$0xff]  }
 0x17b   :  { %4018 = vmatpush2.bf16.msra.mxu0 %v10486_v20  ;;  %v10530_v20 = vld [vmem:[%s15547_s1 + $0xe4] ss:$48 sps:$4 sm:$0xff]  }
 0x17c   :  { %4061 = vmatpush2.bf16.msra.mxu1 %v10489_v21  ;;  %4019 = vmatprep.subr.bf16.mxu0 %v10494_v24  ;;  %v10533_v21 = vld [vmem:[%s15547_s1 + $0x6e4] ss:$48 sps:$4 sm:$0xff]   ;;  %v10528_v24 = vld [vmem:[%s15547_s1 + $0xe0] ss:$48 sps:$4 sm:$0xff]  }
 0x17d   :  { %4062 = vmatprep.subr.bf16.mxu1 %v10497_v25  ;;  %v10531_v25 = vld [vmem:[%s15547_s1 + $0x6e0] ss:$48 sps:$4 sm:$0xff]  }
 0x17f   :  { %4020 = vmatpush2.bf16.msra.mxu0 %v10492_v26  ;;  %v10536_v26 = vld [vmem:[%s15547_s1 + $0x84] ss:$48 sps:$4 sm:$0xff]  }
 0x180   :  { %4063 = vmatpush2.bf16.msra.mxu1 %v10495_v27  ;;  %4075 = vmatprep.subr.bf16.mxu0 %v10500_v30  ;;  %v10539_v27 = vld [vmem:[%s15547_s1 + $0x684] ss:$48 sps:$4 sm:$0xff]   ;;  %v10537_v30 = vld [vmem:[%s15547_s1 + $0x680] ss:$48 sps:$4 sm:$0xff]  }
 0x181   :  { %4118 = vmatprep.subr.bf16.mxu1 %v10503_v32  ;;  %v10542_v32 = vld [vmem:[%s15547_s1 + $0x24] ss:$48 sps:$4 sm:$0xff]  }
 0x182   :  { %v3765_v46 = vpop.f32.mrf.mxu0  ;;  %4022 = vmatmul.mubr.bf16.vlgmr.msra.gmra.mxu0 %v11986_v13 }
 0x183   :  { %v3808_v47 = vpop.f32.mrf.mxu1  ;;  %4065 = vmatmul.mubr.bf16.vlgmr.msra.gmra.mxu1 %v12198_v23  ;;  %v3766_v48 = vadd.f32 %v3765_v46, %v3723_v42  ;;  %4076 = vmatpush1.bf16.msra.mxu0 %v10498_v35  ;;  %v10540_v35 = vld [vmem:[%s15547_s1 + $0x20] ss:$48 sps:$4 sm:$0xff]   ;;  %v10557_v46 = vld [vmem:[%s15547_s1 + $0xb64] ss:$48 sps:$4 sm:$0xff]  }
 0x184   :  { %4119 = vmatpush1.bf16.msra.mxu1 %v10501_v36  ;;  %v13047_v49 = vpop.f32.mrf.mxu0  ;;  %4077 = vmatprep.subr.bf16.mxu0 %v10506_v40  ;;  %v10543_v36 = vld [vmem:[%s15547_s1 + $0x620] ss:$48 sps:$4 sm:$0xff]   ;;  %v10548_v40 = vld [vmem:[%s15547_s1 + $0x5c4] ss:$48 sps:$4 sm:$0xff]  }
 0x185   :  { %v13049_v50 = vpop.f32.mrf.mxu1  ;;  %4120 = vmatprep.subr.bf16.mxu1 %v10509_v41  ;;  %v3809_v59 = vadd.f32 %v3808_v47, %v3766_v48  ;;  %4107 = vmatprep.mubr.bf16.mxu0 %v11915_v53  ;;  %v10551_v41 = vld [vmem:[%s15547_s1 + $0xbc4] ss:$48 sps:$4 sm:$0xff]   ;;  %v10546_v42 = vld [vmem:[%s15547_s1 + $0x5c0] ss:$48 sps:$4 sm:$0xff]  }
 0x186   :  { %4150 = vmatprep.mubr.bf16.mxu1 %v11917_v54  ;;  %v3769_v62 = vpop.f32.mrf.mxu0  ;;  %v10552_v47 = vld [vmem:[%s15547_s1 + $0x560] ss:$48 sps:$4 sm:$0xff]  }
 0x187   :  { %v3770_v63 = vadd.f32 %v3769_v62, %v3727_v58  ;;  %4078 = vmatpush1.bf16.msra.mxu0 %v10504_v43  ;;  %v3812_v0 = vpop.f32.mrf.mxu1  ;;  %v4335_v5 = vmul.f32 0.01, %v3809_v59  ;;  %v10549_v43 = vld [vmem:[%s15547_s1 + $0xbc0] ss:$48 sps:$4 sm:$0xff]  }
 0x188   :  { %4121 = vmatpush1.bf16.msra.mxu1 %v10507_v45  ;;  %4079 = vmatprep.subr.bf16.mxu0 %v10512_v55  ;;  %v10554_v45 = vld [vmem:[%s15547_s1 + $0x564] ss:$48 sps:$4 sm:$0xff]   ;;  %v10555_v48 = vld [vmem:[%s15547_s1 + $0xb60] ss:$48 sps:$4 sm:$0xff]  }
 0x189   :  { %4122 = vmatprep.subr.bf16.mxu1 %v10515_v56  ;;  %v3813_v6 = vadd.f32 %v3812_v0, %v3770_v63  ;;  %v4359_v16 = vmax.f32 %v3809_v59, %v4335_v5  ;;  %v10560_v55 = vld [vmem:[%s15547_s1 + $0x504] ss:$48 sps:$4 sm:$0xff]   ;;  %v10558_v58 = vld [vmem:[%s15547_s1 + $0x500] ss:$48 sps:$4 sm:$0xff]  }
 0x18a   :  { %v10563_v56 = vld [vmem:[%s15547_s1 + $0xb04] ss:$48 sps:$4 sm:$0xff]   ;;  %v10561_v59 = vld [vmem:[%s15547_s1 + $0xb00] ss:$48 sps:$4 sm:$0xff]  }
 0x18b   :  { %v4347_v9 = vmul.f32 0.01, %v3813_v6  ;;  %4080 = vmatpush1.bf16.msra.mxu0 %v10510_v60  ;;  %v10566_v60 = vld [vmem:[%s15547_s1 + $0x4a4] ss:$48 sps:$4 sm:$0xff]   ;;  %v10564_v62 = vld [vmem:[%s15547_s1 + $0x4a0] ss:$48 sps:$4 sm:$0xff]  }
 0x18c   :  { %4123 = vmatpush1.bf16.msra.mxu1 %v10513_v61  ;;  %4081 = vmatprep.subr.bf16.mxu0 %v10518_v2  ;;  %v10569_v61 = vld [vmem:[%s15547_s1 + $0xaa4] ss:$48 sps:$4 sm:$0xff]   ;;  %v10567_v63 = vld [vmem:[%s15547_s1 + $0xaa0] ss:$48 sps:$4 sm:$0xff]  }
 0x18d   :  { %4124 = vmatprep.subr.bf16.mxu1 %v10521_v3  ;;  %v4371_v57 = vmax.f32 %v3813_v6, %v4347_v9  ;;  %v10572_v0 = vld [vmem:[%s15547_s1 + $0x444] ss:$48 sps:$4 sm:$0xff]   ;;  %v10570_v3 = vld [vmem:[%s15547_s1 + $0x440] ss:$48 sps:$4 sm:$0xff]  }
 0x18e   :  { %v10575_v2 = vld [vmem:[%s15547_s1 + $0xa44] ss:$48 sps:$4 sm:$0xff]   ;;  %v10573_v5 = vld [vmem:[%s15547_s1 + $0xa40] ss:$48 sps:$4 sm:$0xff]  }
 0x18f   :  { %v13083_v17 = vpack.c.bf16 %v4371_v57, %v4359_v16  ;;  %4082 = vmatpush1.bf16.msra.mxu0 %v10516_v7  ;;  %v10578_v6 = vld [vmem:[%s15547_s1 + $0x3e4] ss:$48 sps:$4 sm:$0xff]   ;;  %v10579_v9 = vld [vmem:[%s15547_s1 + $0x9e0] ss:$48 sps:$4 sm:$0xff]  }
 0x190   :  { %4125 = vmatpush1.bf16.msra.mxu1 %v10519_v8  ;;  %4083 = vmatprep.subr.bf16.mxu0 %v10524_v10  ;;  %v10581_v7 = vld [vmem:[%s15547_s1 + $0x9e4] ss:$48 sps:$4 sm:$0xff]   ;;  %v10576_v8 = vld [vmem:[%s15547_s1 + $0x3e0] ss:$48 sps:$4 sm:$0xff]  }
 0x191   :  { %4126 = vmatprep.subr.bf16.mxu1 %v10527_v14  ;;  %v10584_v10 = vld [vmem:[%s15547_s1 + $0x384] ss:$48 sps:$4 sm:$0xff]   ;;  %v10582_v16 = vld [vmem:[%s15547_s1 + $0x380] ss:$48 sps:$4 sm:$0xff]  }
 0x192   :  { %v10587_v14 = vld [vmem:[%s15547_s1 + $0x984] ss:$48 sps:$4 sm:$0xff]   ;;  %v10585_v57 = vld [vmem:[%s15547_s1 + $0x980] ss:$48 sps:$4 sm:$0xff]  }
 0x193   :  { %4084 = vmatpush1.bf16.msra.mxu0 %v10522_v18  ;;  %v10590_v18 = vld [vmem:[%s15547_s1 + $0x324] ss:$48 sps:$4 sm:$0xff]  }
 0x194   :  { %4127 = vmatpush1.bf16.msra.mxu1 %v10525_v19  ;;  %4085 = vmatprep.subr.bf16.mxu0 %v10530_v20  ;;  %v10593_v19 = vld [vmem:[%s15547_s1 + $0x924] ss:$48 sps:$4 sm:$0xff]   ;;  %v10588_v20 = vld [vmem:[%s15547_s1 + $0x320] ss:$48 sps:$4 sm:$0xff]  }
 0x195   :  { %4128 = vmatprep.subr.bf16.mxu1 %v10533_v21  ;;  %v10591_v21 = vld [vmem:[%s15547_s1 + $0x920] ss:$48 sps:$4 sm:$0xff]  }
 0x197   :  { %4086 = vmatpush1.bf16.msra.mxu0 %v10528_v24  ;;  %v637_v24 = vsub.s32 4, %v12574_v31 }
 0x198   :  { %4129 = vmatpush1.bf16.msra.mxu1 %v10531_v25  ;;  %4087 = vmatprep.subr.bf16.mxu0 %v10536_v26  ;;  %v10596_v25 = vld [vmem:[%s15547_s1 + $0xec4] ss:$48 sps:$4 sm:$0xff]   ;;  %v10599_v26 = vld [vmem:[%s15547_s1 + $0x2cc] ss:$48 sps:$4 sm:$0xff]  }
 0x199   :  { %4130 = vmatprep.subr.bf16.mxu1 %v10539_v27  ;;  %v10594_v27 = vld [vmem:[%s15547_s1 + $0xec0] ss:$48 sps:$4 sm:$0xff]  }
 0x19b   :  { %4088 = vmatpush1.bf16.msra.mxu0 %v10534_v28  ;;  %v10597_v28 = vld [vmem:[%s15547_s1 + $0x2c8] ss:$48 sps:$4 sm:$0xff]  }
 0x19c   :  { %4131 = vmatpush1.bf16.msra.mxu1 %v10537_v30  ;;  %4089 = vmatprep.subr.bf16.mxu0 %v10542_v32  ;;  %v638_v30 = vrot.slane %v13019_v33, %v637_v24  ;;  %v13239_v32 = vpop.f32.mrf.mxu0  ;;  %v10603_v33 = vld [vmem:[%s15547_s1 + $0x268] ss:$48 sps:$4 sm:$0xff]  }
 0x19d   :  { %4132 = vmatprep.subr.bf16.mxu1 %v10545_v34  ;;  %v13241_v34 = vpop.f32.mrf.mxu1 }
 0x19f   :  { %4090 = vmatpush1.bf16.msra.mxu0 %v10540_v35  ;;  %v10602_v35 = vld [vmem:[%s15547_s1 + $0xe64] ss:$48 sps:$4 sm:$0xff]  }
 0x1a0   :  { %4133 = vmatpush1.bf16.msra.mxu1 %v10543_v36  ;;  %4091 = vmatprep.subr.bf16.mxu0 %v10548_v40  ;;  %v10605_v36 = vld [vmem:[%s15547_s1 + $0x26c] ss:$48 sps:$4 sm:$0xff]   ;;  %v10600_v40 = vld [vmem:[%s15547_s1 + $0xe60] ss:$48 sps:$4 sm:$0xff]  }
 0x1a1   :  { %4134 = vmatprep.subr.bf16.mxu1 %v10551_v41 }
 0x1a3   :  { %4092 = vmatpush2.bf16.msra.mxu0 %v10546_v42 }
 0x1a4   :  { %4135 = vmatpush2.bf16.msra.mxu1 %v10549_v43  ;;  %4093 = vmatprep.subr.bf16.mxu0 %v10554_v45  ;;  %v10608_v43 = vld [vmem:[%s15547_s1 + $0xe04] ss:$48 sps:$4 sm:$0xff]   ;;  %v10611_v45 = vld [vmem:[%s15547_s1 + $0x20c] ss:$48 sps:$4 sm:$0xff]  }
 0x1a5   :  { %4136 = vmatprep.subr.bf16.mxu1 %v10557_v46 }
 0x1a7   :  { %4094 = vmatpush2.bf16.msra.mxu0 %v10552_v47 }
 0x1a8   :  { %4137 = vmatpush2.bf16.msra.mxu1 %v10555_v48  ;;  %4095 = vmatprep.subr.bf16.mxu0 %v10560_v55 }
 0x1a9   :  { %4138 = vmatprep.subr.bf16.mxu1 %v10563_v56  ;;  %v10606_v56 = vld [vmem:[%s15547_s1 + $0xe00] ss:$48 sps:$4 sm:$0xff]  }
 0x1ab   :  { %4096 = vmatpush2.bf16.msra.mxu0 %v10558_v58  ;;  %v10609_v58 = vld [vmem:[%s15547_s1 + $0x208] ss:$48 sps:$4 sm:$0xff]  }
 0x1ac   :  { %4139 = vmatpush2.bf16.msra.mxu1 %v10561_v59  ;;  %4097 = vmatprep.subr.bf16.mxu0 %v10566_v60  ;;  %v10614_v60 = vld [vmem:[%s15547_s1 + $0xda4] ss:$48 sps:$4 sm:$0xff]  }
 0x1ad   :  { %4140 = vmatprep.subr.bf16.mxu1 %v10569_v61  ;;  %v10617_v61 = vld [vmem:[%s15547_s1 + $0x1ac] ss:$48 sps:$4 sm:$0xff]  }
 0x1af   :  { %4098 = vmatpush2.bf16.msra.mxu0 %v10564_v62 }
 0x1b0   :  { %4141 = vmatpush2.bf16.msra.mxu1 %v10567_v63  ;;  %4099 = vmatprep.subr.bf16.mxu0 %v10572_v0 }
 0x1b1   :  { %4142 = vmatprep.subr.bf16.mxu1 %v10575_v2  ;;  %v10615_v2 = vld [vmem:[%s15547_s1 + $0x1a8] ss:$48 sps:$4 sm:$0xff]  }
 0x1b3   :  { %4100 = vmatpush2.bf16.msra.mxu0 %v10570_v3  ;;  %v10620_v3 = vld [vmem:[%s15547_s1 + $0xd44] ss:$48 sps:$4 sm:$0xff]  }
 0x1b4   :  { %4143 = vmatpush2.bf16.msra.mxu1 %v10573_v5  ;;  %4101 = vmatprep.subr.bf16.mxu0 %v10578_v6  ;;  %v10623_v5 = vld [vmem:[%s15547_s1 + $0x14c] ss:$48 sps:$4 sm:$0xff]   ;;  %v10618_v6 = vld [vmem:[%s15547_s1 + $0xd40] ss:$48 sps:$4 sm:$0xff]  }
 0x1b5   :  { %4144 = vmatprep.subr.bf16.mxu1 %v10581_v7  ;;  %v10621_v7 = vld [vmem:[%s15547_s1 + $0x148] ss:$48 sps:$4 sm:$0xff]  }
 0x1b7   :  { %4102 = vmatpush2.bf16.msra.mxu0 %v10576_v8  ;;  %v10626_v8 = vld [vmem:[%s15547_s1 + $0xce4] ss:$48 sps:$4 sm:$0xff]  }
 0x1b8   :  { %4145 = vmatpush2.bf16.msra.mxu1 %v10579_v9  ;;  %4103 = vmatprep.subr.bf16.mxu0 %v10584_v10  ;;  %v10629_v9 = vld [vmem:[%s15547_s1 + $0xec] ss:$48 sps:$4 sm:$0xff]   ;;  %v10624_v10 = vld [vmem:[%s15547_s1 + $0xce0] ss:$48 sps:$4 sm:$0xff]  }
 0x1b9   :  { %4146 = vmatprep.subr.bf16.mxu1 %v10587_v14  ;;  %v10627_v14 = vld [vmem:[%s15547_s1 + $0xe8] ss:$48 sps:$4 sm:$0xff]  }
 0x1bb   :  { %4104 = vmatpush2.bf16.msra.mxu0 %v10582_v16  ;;  %v10632_v16 = vld [vmem:[%s15547_s1 + $0xc84] ss:$48 sps:$4 sm:$0xff]  }
 0x1bc   :  { %4147 = vmatpush2.bf16.msra.mxu1 %v10585_v57  ;;  %4105 = vmatprep.subr.bf16.mxu0 %v10590_v18  ;;  %v10635_v57 = vld [vmem:[%s15547_s1 + $0x8c] ss:$48 sps:$4 sm:$0xff]   ;;  %v10630_v18 = vld [vmem:[%s15547_s1 + $0xc80] ss:$48 sps:$4 sm:$0xff]  }
 0x1bd   :  { %4148 = vmatprep.subr.bf16.mxu1 %v10593_v19  ;;  %v10633_v19 = vld [vmem:[%s15547_s1 + $0x88] ss:$48 sps:$4 sm:$0xff]  }
 0x1bf   :  { %4106 = vmatpush2.bf16.msra.mxu0 %v10588_v20  ;;  %v10638_v20 = vld [vmem:[%s15547_s1 + $0xc24] ss:$48 sps:$4 sm:$0xff]  }
 0x1c0   :  { %4149 = vmatpush2.bf16.msra.mxu1 %v10591_v21  ;;  %4161 = vmatprep.subr.bf16.mxu0 %v10596_v25  ;;  %v10641_v21 = vld [vmem:[%s15547_s1 + $0x2c] ss:$48 sps:$4 sm:$0xff]   ;;  %v10636_v25 = vld [vmem:[%s15547_s1 + $0xc20] ss:$48 sps:$4 sm:$0xff]  }
 0x1c1   :  { %4204 = vmatprep.subr.bf16.mxu1 %v10599_v26  ;;  %v10639_v26 = vld [vmem:[%s15547_s1 + $0x28] ss:$48 sps:$4 sm:$0xff]  }
 0x1c2   :  { %v3851_v41 = vpop.f32.mrf.mxu0  ;;  %4108 = vmatmul.mubr.bf16.vlgmr.msra.gmra.mxu0 %v11984_v12 }
 0x1c3   :  { %v3894_v42 = vpop.f32.mrf.mxu1  ;;  %4151 = vmatmul.mubr.bf16.vlgmr.msra.gmra.mxu1 %v11986_v13  ;;  %v3852_v46 = vadd.f32 %v3851_v41, %v638_v30  ;;  %4162 = vmatpush1.bf16.msra.mxu0 %v10594_v27  ;;  %v10644_v27 = vld [vmem:[%s15547_s1 + $0x11c4] ss:$48 sps:$4 sm:$0xff]   ;;  %v10651_v41 = vld [vmem:[%s15547_s1 + $0x568] ss:$48 sps:$4 sm:$0xff]  }
 0x1c4   :  { %4205 = vmatpush1.bf16.msra.mxu1 %v10597_v28  ;;  %v13263_v47 = vpop.f32.mrf.mxu0  ;;  %4163 = vmatprep.subr.bf16.mxu0 %v10602_v35  ;;  %v10647_v28 = vld [vmem:[%s15547_s1 + $0x5cc] ss:$48 sps:$4 sm:$0xff]   ;;  %v10645_v35 = vld [vmem:[%s15547_s1 + $0x5c8] ss:$48 sps:$4 sm:$0xff]  }
 0x1c5   :  { %v13265_v48 = vpop.f32.mrf.mxu1  ;;  %4206 = vmatprep.subr.bf16.mxu1 %v10605_v36  ;;  %v13267_v55 = vadd.f32 %v3894_v42, %v3852_v46  ;;  %4193 = vmatprep.mubr.bf16.mxu0 %v12081_v44  ;;  %v10650_v36 = vld [vmem:[%s15547_s1 + $0x1164] ss:$48 sps:$4 sm:$0xff]   ;;  %v10657_v46 = vld [vmem:[%s15547_s1 + $0x508] ss:$48 sps:$4 sm:$0xff]  }
 0x1c6   :  { %4236 = vmatprep.mubr.bf16.mxu1 %v11915_v53  ;;  %v3855_v59 = vpop.f32.mrf.mxu0  ;;  %v10612_v53 = vld [vmem:[%s15547_s1 + $0xda0] ss:$48 sps:$4 sm:$0xff]   ;;  %v10656_v42 = vld [vmem:[%s15547_s1 + $0x1104] ss:$48 sps:$4 sm:$0xff]  }
 0x1c7   :  { %v3856_v62 = vadd.f32 %v3855_v59, %v638_v30  ;;  %4164 = vmatpush1.bf16.msra.mxu0 %v10600_v40  ;;  %v3898_v63 = vpop.f32.mrf.mxu1  ;;  %v10642_v30 = vld [vmem:[%s15547_s1 + $0x11c0] ss:$48 sps:$4 sm:$0xff]   ;;  %v10653_v40 = vld [vmem:[%s15547_s1 + $0x56c] ss:$48 sps:$4 sm:$0xff]  }
 0x1c8   :  { %4207 = vmatpush1.bf16.msra.mxu1 %v10603_v33  ;;  %4165 = vmatprep.subr.bf16.mxu0 %v10608_v43  ;;  %v10648_v33 = vld [vmem:[%s15547_s1 + $0x1160] ss:$48 sps:$4 sm:$0xff]   ;;  %v10659_v43 = vld [vmem:[%s15547_s1 + $0x50c] ss:$48 sps:$4 sm:$0xff]  }
 0x1c9   :  { %4208 = vmatprep.subr.bf16.mxu1 %v10611_v45  ;;  %v13283_v0 = vadd.f32 %v3898_v63, %v3856_v62  ;;  %v10654_v45 = vld [vmem:[%s15547_s1 + $0x1100] ss:$48 sps:$4 sm:$0xff]   ;;  %v10671_v62 = vld [vmem:[%s15547_s1 + $0x44c] ss:$48 sps:$4 sm:$0xff]  }
 0x1ca   :  { %v10660_v59 = vld [vmem:[%s15547_s1 + $0x10a0] ss:$48 sps:$4 sm:$0xff]  }
 0x1cb   :  { %4166 = vmatpush1.bf16.msra.mxu0 %v10606_v56  ;;  %v10662_v56 = vld [vmem:[%s15547_s1 + $0x10a4] ss:$48 sps:$4 sm:$0xff]   ;;  %v10666_v63 = vld [vmem:[%s15547_s1 + $0x1040] ss:$48 sps:$4 sm:$0xff]  }
 0x1cc   :  { %4209 = vmatpush1.bf16.msra.mxu1 %v10609_v58  ;;  %4167 = vmatprep.subr.bf16.mxu0 %v10614_v60  ;;  %v10665_v58 = vld [vmem:[%s15547_s1 + $0x4ac] ss:$48 sps:$4 sm:$0xff]   ;;  %v10663_v60 = vld [vmem:[%s15547_s1 + $0x4a8] ss:$48 sps:$4 sm:$0xff]  }
 0x1cd   :  { %4210 = vmatprep.subr.bf16.mxu1 %v10617_v61  ;;  %v10668_v61 = vld [vmem:[%s15547_s1 + $0x1044] ss:$48 sps:$4 sm:$0xff]  }
 0x1cf   :  { %4168 = vmatpush1.bf16.msra.mxu0 %v10612_v53  ;;  %v10669_v53 = vld [vmem:[%s15547_s1 + $0x448] ss:$48 sps:$4 sm:$0xff]  }
 0x1d0   :  { %4211 = vmatpush1.bf16.msra.mxu1 %v10615_v2  ;;  %4169 = vmatprep.subr.bf16.mxu0 %v10620_v3  ;;  %v10674_v2 = vld [vmem:[%s15547_s1 + $0xfe4] ss:$48 sps:$4 sm:$0xff]   ;;  %v10677_v3 = vld [vmem:[%s15547_s1 + $0x3ec] ss:$48 sps:$4 sm:$0xff]  }
 0x1d1   :  { %4212 = vmatprep.subr.bf16.mxu1 %v10623_v5  ;;  %v10672_v5 = vld [vmem:[%s15547_s1 + $0xfe0] ss:$48 sps:$4 sm:$0xff]  }
 0x1d3   :  { %4170 = vmatpush1.bf16.msra.mxu0 %v10618_v6  ;;  %v10675_v6 = vld [vmem:[%s15547_s1 + $0x3e8] ss:$48 sps:$4 sm:$0xff]  }
 0x1d4   :  { %4213 = vmatpush1.bf16.msra.mxu1 %v10621_v7  ;;  %4171 = vmatprep.subr.bf16.mxu0 %v10626_v8  ;;  %v10680_v7 = vld [vmem:[%s15547_s1 + $0xf84] ss:$48 sps:$4 sm:$0xff]   ;;  %v10683_v8 = vld [vmem:[%s15547_s1 + $0x38c] ss:$48 sps:$4 sm:$0xff]  }
 0x1d5   :  { %4214 = vmatprep.subr.bf16.mxu1 %v10629_v9  ;;  %v10678_v9 = vld [vmem:[%s15547_s1 + $0xf80] ss:$48 sps:$4 sm:$0xff]  }
 0x1d7   :  { %4172 = vmatpush1.bf16.msra.mxu0 %v10624_v10  ;;  %v10681_v10 = vld [vmem:[%s15547_s1 + $0x388] ss:$48 sps:$4 sm:$0xff]  }
 0x1d8   :  { %4215 = vmatpush1.bf16.msra.mxu1 %v10627_v14  ;;  %4173 = vmatprep.subr.bf16.mxu0 %v10632_v16  ;;  %v10686_v14 = vld [vmem:[%s15547_s1 + $0xf24] ss:$48 sps:$4 sm:$0xff]   ;;  %v10689_v16 = vld [vmem:[%s15547_s1 + $0x32c] ss:$48 sps:$4 sm:$0xff]  }
 0x1d9   :  { %4216 = vmatprep.subr.bf16.mxu1 %v10635_v57  ;;  %v10684_v57 = vld [vmem:[%s15547_s1 + $0xf20] ss:$48 sps:$4 sm:$0xff]  }
 0x1db   :  { %4174 = vmatpush1.bf16.msra.mxu0 %v10630_v18  ;;  %v10687_v18 = vld [vmem:[%s15547_s1 + $0x328] ss:$48 sps:$4 sm:$0xff]  }
 0x1dc   :  { %4217 = vmatpush1.bf16.msra.mxu1 %v10633_v19  ;;  %4175 = vmatprep.subr.bf16.mxu0 %v10638_v20  ;;  %v10692_v19 = vld [vmem:[%s15547_s1 + $0x8cc] ss:$48 sps:$4 sm:$0xff]  }
 0x1dd   :  { %4218 = vmatprep.subr.bf16.mxu1 %v10641_v21  ;;  %v10695_v20 = vld [vmem:[%s15547_s1 + $0xecc] ss:$48 sps:$4 sm:$0xff]   ;;  %v10690_v21 = vld [vmem:[%s15547_s1 + $0x8c8] ss:$48 sps:$4 sm:$0xff]  }
 0x1df   :  { %4176 = vmatpush1.bf16.msra.mxu0 %v10636_v25  ;;  %v10693_v25 = vld [vmem:[%s15547_s1 + $0xec8] ss:$48 sps:$4 sm:$0xff]  }
 0x1e0   :  { %4219 = vmatpush1.bf16.msra.mxu1 %v10639_v26  ;;  %4177 = vmatprep.subr.bf16.mxu0 %v10644_v27  ;;  %v10698_v26 = vld [vmem:[%s15547_s1 + $0x86c] ss:$48 sps:$4 sm:$0xff]   ;;  %v13450_v27 = vpop.f32.mrf.mxu0 }
 0x1e1   :  { %4220 = vmatprep.subr.bf16.mxu1 %v10647_v28  ;;  %v10701_v28 = vld [vmem:[%s15547_s1 + $0xe6c] ss:$48 sps:$4 sm:$0xff]  }
 0x1e3   :  { %4178 = vmatpush2.bf16.msra.mxu0 %v10642_v30  ;;  %v10696_v30 = vld [vmem:[%s15547_s1 + $0x868] ss:$48 sps:$4 sm:$0xff]  }
 0x1e4   :  { %4221 = vmatpush2.bf16.msra.mxu1 %v10645_v35  ;;  %4179 = vmatprep.subr.bf16.mxu0 %v10650_v36  ;;  %v10699_v35 = vld [vmem:[%s15547_s1 + $0xe68] ss:$48 sps:$4 sm:$0xff]  }
 0x1e5   :  { %4222 = vmatprep.subr.bf16.mxu1 %v10653_v40  ;;  %v10704_v40 = vld [vmem:[%s15547_s1 + $0x80c] ss:$48 sps:$4 sm:$0xff]  }
 0x1e7   :  { %4180 = vmatpush2.bf16.msra.mxu0 %v10648_v33  ;;  %v10707_v33 = vld [vmem:[%s15547_s1 + $0xe0c] ss:$48 sps:$4 sm:$0xff]  }
 0x1e8   :  { %4223 = vmatpush2.bf16.msra.mxu1 %v10651_v41  ;;  %4181 = vmatprep.subr.bf16.mxu0 %v10656_v42 }
 0x1e9   :  { %4224 = vmatprep.subr.bf16.mxu1 %v10659_v43  ;;  %v10702_v43 = vld [vmem:[%s15547_s1 + $0x808] ss:$48 sps:$4 sm:$0xff]  }
 0x1eb   :  { %4182 = vmatpush2.bf16.msra.mxu0 %v10654_v45  ;;  %v10705_v45 = vld [vmem:[%s15547_s1 + $0xe08] ss:$48 sps:$4 sm:$0xff]  }
 0x1ec   :  { %4225 = vmatpush2.bf16.msra.mxu1 %v10657_v46  ;;  %4183 = vmatprep.subr.bf16.mxu0 %v10662_v56 }
 0x1ed   :  { %4226 = vmatprep.subr.bf16.mxu1 %v10665_v58 }
 0x1ef   :  { %4184 = vmatpush2.bf16.msra.mxu0 %v10660_v59 }
 0x1f0   :  { %4227 = vmatpush2.bf16.msra.mxu1 %v10663_v60  ;;  %4185 = vmatprep.subr.bf16.mxu0 %v10668_v61  ;;  %v10711_v60 = vld [vmem:[%s15547_s1 + $0xda8] ss:$48 sps:$4 sm:$0xff]   ;;  %v10716_v61 = vld [vmem:[%s15547_s1 + $0x74c] ss:$48 sps:$4 sm:$0xff]  }
 0x1f1   :  { %4228 = vmatprep.subr.bf16.mxu1 %v10671_v62  ;;  %v10719_v62 = vld [vmem:[%s15547_s1 + $0xd4c] ss:$48 sps:$4 sm:$0xff]  }
 0x1f3   :  { %4186 = vmatpush2.bf16.msra.mxu0 %v10666_v63 }
 0x1f4   :  { %4229 = vmatpush2.bf16.msra.mxu1 %v10669_v53  ;;  %4187 = vmatprep.subr.bf16.mxu0 %v10674_v2  ;;  %v10714_v53 = vld [vmem:[%s15547_s1 + $0x748] ss:$48 sps:$4 sm:$0xff]  }
 0x1f5   :  { %4230 = vmatprep.subr.bf16.mxu1 %v10677_v3  ;;  %v10717_v2 = vld [vmem:[%s15547_s1 + $0xd48] ss:$48 sps:$4 sm:$0xff]   ;;  %v10722_v3 = vld [vmem:[%s15547_s1 + $0x6ec] ss:$48 sps:$4 sm:$0xff]  }
 0x1f7   :  { %4188 = vmatpush2.bf16.msra.mxu0 %v10672_v5  ;;  %v10725_v5 = vld [vmem:[%s15547_s1 + $0xcec] ss:$48 sps:$4 sm:$0xff]  }
 0x1f8   :  { %4231 = vmatpush2.bf16.msra.mxu1 %v10675_v6  ;;  %4189 = vmatprep.subr.bf16.mxu0 %v10680_v7  ;;  %v10720_v6 = vld [vmem:[%s15547_s1 + $0x6e8] ss:$48 sps:$4 sm:$0xff]  }
 0x1f9   :  { %4232 = vmatprep.subr.bf16.mxu1 %v10683_v8  ;;  %v10723_v7 = vld [vmem:[%s15547_s1 + $0xce8] ss:$48 sps:$4 sm:$0xff]   ;;  %v10728_v8 = vld [vmem:[%s15547_s1 + $0x68c] ss:$48 sps:$4 sm:$0xff]  }
 0x1fb   :  { %4190 = vmatpush2.bf16.msra.mxu0 %v10678_v9  ;;  %v10731_v9 = vld [vmem:[%s15547_s1 + $0xc8c] ss:$48 sps:$4 sm:$0xff]  }
 0x1fc   :  { %4233 = vmatpush2.bf16.msra.mxu1 %v10681_v10  ;;  %4191 = vmatprep.subr.bf16.mxu0 %v10686_v14  ;;  %v10726_v10 = vld [vmem:[%s15547_s1 + $0x688] ss:$48 sps:$4 sm:$0xff]  }
 0x1fd   :  { %4234 = vmatprep.subr.bf16.mxu1 %v10689_v16  ;;  %v10729_v14 = vld [vmem:[%s15547_s1 + $0xc88] ss:$48 sps:$4 sm:$0xff]   ;;  %v10734_v16 = vld [vmem:[%s15547_s1 + $0x62c] ss:$48 sps:$4 sm:$0xff]  }
 0x1ff   :  { %4192 = vmatpush2.bf16.msra.mxu0 %v10684_v57  ;;  %v10737_v57 = vld [vmem:[%s15547_s1 + $0xc2c] ss:$48 sps:$4 sm:$0xff]  }
 0x200   :  { %4235 = vmatpush2.bf16.msra.mxu1 %v10687_v18  ;;  %4247 = vmatprep.subr.bf16.mxu0 %v10692_v19  ;;  %v10732_v18 = vld [vmem:[%s15547_s1 + $0x628] ss:$48 sps:$4 sm:$0xff]  }
 0x201   :  { %4290 = vmatprep.subr.bf16.mxu1 %v10695_v20  ;;  %v10735_v19 = vld [vmem:[%s15547_s1 + $0xc28] ss:$48 sps:$4 sm:$0xff]   ;;  %v10740_v20 = vld [vmem:[%s15547_s1 + $0xbcc] ss:$48 sps:$4 sm:$0xff]  }
 0x202   :  { %v3937_v36 = vpop.f32.mrf.mxu0  ;;  %4194 = vmatmul.mubr.bf16.vlgmr.msra.gmra.mxu0 %v12198_v23 }
 0x203   :  { %4237 = vmatmul.mubr.bf16.vlgmr.msra.gmra.mxu1 %v11984_v12  ;;  %v3938_v41 = vadd.f32 %v3937_v36, %v13267_v55  ;;  %4248 = vmatpush1.bf16.msra.mxu0 %v10690_v21  ;;  %v10743_v21 = vld [vmem:[%s15547_s1 + $0x11cc] ss:$48 sps:$4 sm:$0xff]   ;;  %v10747_v36 = vld [vmem:[%s15547_s1 + $0x1168] ss:$48 sps:$4 sm:$0xff]  }
 0x204   :  { %4291 = vmatpush1.bf16.msra.mxu1 %v10693_v25  ;;  %v13470_v42 = vpop.f32.mrf.mxu0  ;;  %4249 = vmatprep.subr.bf16.mxu0 %v10698_v26  ;;  %v10738_v25 = vld [vmem:[%s15547_s1 + $0xbc8] ss:$48 sps:$4 sm:$0xff]  }
 0x205   :  { %4292 = vmatprep.subr.bf16.mxu1 %v10701_v28  ;;  %4279 = vmatprep.mubr.bf16.mxu0 %v11917_v54  ;;  %v4337_v55 = vmul.f32 0.01, %v3938_v41  ;;  %v10710_v54 = vld [vmem:[%s15547_s1 + $0x7ac] ss:$48 sps:$4 sm:$0xff]   ;;  %v10741_v26 = vld [vmem:[%s15547_s1 + $0x11c8] ss:$48 sps:$4 sm:$0xff]  }
 0x206   :  { %4322 = vmatprep.mubr.bf16.mxu1 %v12081_v44  ;;  %v3941_v12 = vpop.f32.mrf.mxu0  ;;  %v10713_v44 = vld [vmem:[%s15547_s1 + $0xdac] ss:$48 sps:$4 sm:$0xff]  }
 0x207   :  { %v3942_v46 = vadd.f32 %v3941_v12, %v13283_v0  ;;  %4250 = vmatpush1.bf16.msra.mxu0 %v10696_v30  ;;  %v4361_v58 = vmax.f32 %v3938_v41, %v4337_v55  ;;  %v10708_v0 = vld [vmem:[%s15547_s1 + $0x7a8] ss:$48 sps:$4 sm:$0xff]   ;;  %v10746_v28 = vld [vmem:[%s15547_s1 + $0xb6c] ss:$48 sps:$4 sm:$0xff]  }
 0x208   :  { %4293 = vmatpush1.bf16.msra.mxu1 %v10699_v35  ;;  %4251 = vmatprep.subr.bf16.mxu0 %v10704_v40  ;;  %v10749_v30 = vld [vmem:[%s15547_s1 + $0x116c] ss:$48 sps:$4 sm:$0xff]   ;;  %v10744_v35 = vld [vmem:[%s15547_s1 + $0xb68] ss:$48 sps:$4 sm:$0xff]  }
 0x209   :  { %4294 = vmatprep.subr.bf16.mxu1 %v10707_v33  ;;  %v4349_v56 = vmul.f32 0.01, %v3942_v46  ;;  %v10752_v40 = vld [vmem:[%s15547_s1 + $0xb0c] ss:$48 sps:$4 sm:$0xff]   ;;  %v10750_v41 = vld [vmem:[%s15547_s1 + $0xb08] ss:$48 sps:$4 sm:$0xff]  }
 0x20a   :  { %v10755_v33 = vld [vmem:[%s15547_s1 + $0x110c] ss:$48 sps:$4 sm:$0xff]   ;;  %v10753_v12 = vld [vmem:[%s15547_s1 + $0x1108] ss:$48 sps:$4 sm:$0xff]  }
 0x20b   :  { %v4373_v59 = vmax.f32 %v3942_v46, %v4349_v56  ;;  %4252 = vmatpush1.bf16.msra.mxu0 %v10702_v43  ;;  %v13580_v43 = vsub.s32 1, %v12574_v31  ;;  %v10761_v55 = vld [vmem:[%s15547_s1 + $0x10ac] ss:$48 sps:$4 sm:$0xff]   ;;  %v10756_v46 = vld [vmem:[%s15547_s1 + $0xaa8] ss:$48 sps:$4 sm:$0xff]   ;;  %v13600_v56 = vld [vmem:[%s15548_s2] sm:$0xff] }
 0x20c   :  { %4295 = vmatpush1.bf16.msra.mxu1 %v10705_v45  ;;  %4253 = vmatprep.subr.bf16.mxu0 %v10710_v54  ;;  %v10758_v45 = vld [vmem:[%s15547_s1 + $0xaac] ss:$48 sps:$4 sm:$0xff]   ;;  %v10759_v54 = vld [vmem:[%s15547_s1 + $0x10a8] ss:$48 sps:$4 sm:$0xff]  }
 0x20d   :  { %4296 = vmatprep.subr.bf16.mxu1 %v10713_v44  ;;  %v13499_v63 = vpack.c.bf16 %v4373_v59, %v4361_v58  ;;  %v13595_v44 = vsub.s32 3, %v12574_v31  ;;  %v626_v58 = vrot.slane %v13600_v56, %v13580_v43  ;;  %v10764_v59 = vld [vmem:[%s15547_s1 + $0xa4c] ss:$48 sps:$4 sm:$0xff]  }
 0x20f   :  { %4254 = vmatpush1.bf16.msra.mxu0 %v10708_v0  ;;  %v10767_v0 = vld [vmem:[%s15547_s1 + $0x104c] ss:$48 sps:$4 sm:$0xff]  }
 0x210   :  { %4297 = vmatpush1.bf16.msra.mxu1 %v10711_v60  ;;  %4255 = vmatprep.subr.bf16.mxu0 %v10716_v61  ;;  %v10762_v60 = vld [vmem:[%s15547_s1 + $0xa48] ss:$48 sps:$4 sm:$0xff]  }
 0x211   :  { %4298 = vmatprep.subr.bf16.mxu1 %v10719_v62  ;;  %v10765_v61 = vld [vmem:[%s15547_s1 + $0x1048] ss:$48 sps:$4 sm:$0xff]   ;;  %v3600_v62 = vadd.f32 %v12811_v4, %v626_v58 }
 0x212   :  { %v10768_v4 = vld [vmem:[%s15547_s1 + $0x9e8] ss:$48 sps:$4 sm:$0xff]  }
 0x213   :  { %4256 = vmatpush1.bf16.msra.mxu0 %v10714_v53  ;;  %v634_v53 = vrot.slane %v13600_v56, %v13595_v44 }
 0x214   :  { %4299 = vmatpush1.bf16.msra.mxu1 %v10717_v2  ;;  %4257 = vmatprep.subr.bf16.mxu0 %v10722_v3  ;;  %v10770_v3 = vld [vmem:[%s15547_s1 + $0x9ec] ss:$48 sps:$4 sm:$0xff]  }
 0x215   :  { %4300 = vmatprep.subr.bf16.mxu1 %v10725_v5  ;;  %v3729_v2 = vadd.f32 %v13031_v39, %v634_v53  ;;  %v10773_v5 = vld [vmem:[%s15547_s1 + $0xfec] ss:$48 sps:$4 sm:$0xff]   ;;  %v10771_v39 = vld [vmem:[%s15547_s1 + $0xfe8] ss:$48 sps:$4 sm:$0xff]  }
 0x217   :  { %4258 = vmatpush1.bf16.msra.mxu0 %v10720_v6  ;;  %v3596_v6 = vadd.f32 %v12621_v51, %v626_v58  ;;  %v10797_v58 = vld [vmem:[%s15549_s3 + $0x424] ss:$24 sps:$4 sm:$0xff]  }
 0x218   :  { %4301 = vmatpush1.bf16.msra.mxu1 %v10723_v7  ;;  %4259 = vmatprep.subr.bf16.mxu0 %v10728_v8  ;;  %v3643_v7 = vadd.f32 %v12973_v15, %v3600_v62  ;;  %v3725_v8 = vadd.f32 %v12993_v22, %v634_v53  ;;  %v10779_v15 = vld [vmem:[%s15547_s1 + $0xf8c] ss:$48 sps:$4 sm:$0xff]   ;;  %v10792_v53 = vld [vmem:[%s15549_s3 + $0x120] ss:$24 sps:$4 sm:$0xff]  }
 0x219   :  { %4302 = vmatprep.subr.bf16.mxu1 %v10731_v9  ;;  %v3772_v9 = vadd.f32 %v13239_v32, %v3729_v2  ;;  %v3639_v22 = vadd.f32 %v12623_v52, %v3596_v6  ;;  %v10774_v32 = vld [vmem:[%s15547_s1 + $0x988] ss:$48 sps:$4 sm:$0xff]   ;;  %v10782_v52 = vld [vmem:[%s15547_s1 + $0x92c] ss:$48 sps:$4 sm:$0xff]  }
 0x21a   :  { %v3686_v51 = vadd.f32 %v13029_v38, %v3643_v7  ;;  %v10777_v38 = vld [vmem:[%s15547_s1 + $0xf88] ss:$48 sps:$4 sm:$0xff]  }
 0x21b   :  { %4260 = vmatpush1.bf16.msra.mxu0 %v10726_v10  ;;  %v13636_v10 = vpop.f32.mrf.mxu1  ;;  %v10795_v6 = vld [vmem:[%s15549_s3 + $0x420] ss:$24 sps:$4 sm:$0xff]  }
 0x21c   :  { %4303 = vmatpush1.bf16.msra.mxu1 %v10729_v14  ;;  %4261 = vmatprep.subr.bf16.mxu0 %v10734_v16  ;;  %v3768_v14 = vadd.f32 %v13047_v49, %v3725_v8  ;;  %v3815_v49 = vadd.f32 %v13241_v34, %v3772_v9  ;;  %v645_v34 = vsub.s32 6, %v12574_v31 }
 0x21d   :  { %4304 = vmatprep.subr.bf16.mxu1 %v10737_v57  ;;  %v3980_v16 = vpop.f32.mrf.mxu1  ;;  %v10776_v57 = vld [vmem:[%s15547_s1 + $0x98c] ss:$48 sps:$4 sm:$0xff]  }
 0x21f   :  { %4262 = vmatpush1.bf16.msra.mxu0 %v10732_v18  ;;  %v3682_v18 = vadd.f32 %v12828_v11, %v3639_v22  ;;  %v10780_v11 = vld [vmem:[%s15547_s1 + $0x928] ss:$48 sps:$4 sm:$0xff]   ;;  %v10809_v22 = vld [vmem:[%s15549_s3 + $0x3c4] ss:$24 sps:$4 sm:$0xff]  }
 0x220   :  { %4305 = vmatpush1.bf16.msra.mxu1 %v10735_v19  ;;  %4263 = vmatprep.subr.bf16.mxu0 %v10740_v20  ;;  %v4346_v19 = vmul.f32 0.01, %v3686_v51  ;;  %v3811_v20 = vadd.f32 %v13049_v50, %v3768_v14  ;;  %v10783_v50 = vld [vmem:[%s15547_s1 + $0xf28] ss:$48 sps:$4 sm:$0xff]  }
 0x221   :  { %4306 = vmatprep.subr.bf16.mxu1 %v10743_v21  ;;  %v13656_v21 = vpop.f32.mrf.mxu1 }
 0x223   :  { %4264 = vmatpush2.bf16.msra.mxu0 %v10738_v25  ;;  %v10785_v25 = vld [vmem:[%s15547_s1 + $0xf2c] ss:$48 sps:$4 sm:$0xff]  }
 0x224   :  { %4307 = vmatpush2.bf16.msra.mxu1 %v10741_v26  ;;  %4265 = vmatprep.subr.bf16.mxu0 %v10746_v28  ;;  %v4348_v26 = vmul.f32 0.01, %v3815_v49  ;;  %v4334_v28 = vmul.f32 0.01, %v3682_v18 }
 0x225   :  { %4308 = vmatprep.subr.bf16.mxu1 %v10749_v30  ;;  %v4336_v30 = vmul.f32 0.01, %v3811_v20 }
 0x227   :  { %4266 = vmatpush2.bf16.msra.mxu0 %v10744_v35  ;;  %v3984_v35 = vpop.f32.mrf.mxu1 }
 0x228   :  { %4309 = vmatpush2.bf16.msra.mxu1 %v10747_v36  ;;  %4267 = vmatprep.subr.bf16.mxu0 %v10752_v40  ;;  %v10788_v36 = vld [vmem:[%s15549_s3 + $0x154] ss:$24 sps:$4 sm:$0xff]  }
 0x229   :  { %4310 = vmatprep.subr.bf16.mxu1 %v10755_v33  ;;  %v10791_v40 = vld [vmem:[%s15549_s3 + $0x454] ss:$24 sps:$4 sm:$0xff]   ;;  %v4370_v33 = vmax.f32 %v3686_v51, %v4346_v19  ;;  %v10798_v51 = vld [vmem:[%s15549_s3 + $0xf0] ss:$24 sps:$4 sm:$0xff]   ;;  %v10807_v19 = vld [vmem:[%s15549_s3 + $0x3c0] ss:$24 sps:$4 sm:$0xff]  }
 0x22b   :  { %4268 = vmatpush2.bf16.msra.mxu0 %v10750_v41  ;;  %v646_v41 = vrot.slane %v13600_v56, %v645_v34 }
 0x22c   :  { %4311 = vmatpush2.bf16.msra.mxu1 %v10753_v12  ;;  %4269 = vmatprep.subr.bf16.mxu0 %v10758_v45  ;;  %v10786_v12 = vld [vmem:[%s15549_s3 + $0x150] ss:$24 sps:$4 sm:$0xff]   ;;  %v4372_v45 = vmax.f32 %v3815_v49, %v4348_v26 }
 0x22d   :  { %4312 = vmatprep.subr.bf16.mxu1 %v10761_v55  ;;  %v10789_v55 = vld [vmem:[%s15549_s3 + $0x450] ss:$24 sps:$4 sm:$0xff]   ;;  %v3985_v8 = vadd.f32 %v3984_v35, %v646_v41  ;;  %v10821_v35 = vld [vmem:[%s15549_s3 + $0x364] ss:$24 sps:$4 sm:$0xff]  }
 0x22e   :  { %v10813_v26 = vld [vmem:[%s15549_s3 + $0x390] ss:$24 sps:$4 sm:$0xff]  }
 0x22f   :  { %4270 = vmatpush2.bf16.msra.mxu0 %v10756_v46  ;;  %v4358_v46 = vmax.f32 %v3682_v18, %v4334_v28  ;;  %v10804_v18 = vld [vmem:[%s15549_s3 + $0xc0] ss:$24 sps:$4 sm:$0xff]   ;;  %v10818_v28 = vld [vmem:[%s15549_s3 + $0x64] ss:$24 sps:$4 sm:$0xff]  }
 0x230   :  { %4313 = vmatpush2.bf16.msra.mxu1 %v10759_v54  ;;  %4271 = vmatprep.subr.bf16.mxu0 %v10764_v59  ;;  %v10794_v54 = vld [vmem:[%s15549_s3 + $0x124] ss:$24 sps:$4 sm:$0xff]   ;;  %v4360_v59 = vmax.f32 %v3811_v20, %v4336_v30 }
 0x231   :  { %4314 = vmatprep.subr.bf16.mxu1 %v10767_v0  ;;  %v13690_v0 = vpop.f32.mrf.mxu0  ;;  %v13694_v62 = vpack.c.bf16 %v4370_v33, %v4358_v46  ;;  %v10824_v33 = vld [vmem:[%s15549_s3 + $0x34] ss:$24 sps:$4 sm:$0xff]   ;;  %v10833_v46 = vld [vmem:[%s15549_s3 + $0x304] ss:$24 sps:$4 sm:$0xff]  }
 0x233   :  { %4272 = vmatpush2.bf16.msra.mxu0 %v10762_v60  ;;  %v13692_v60 = vpop.f32.mrf.mxu1 }
 0x234   :  { %4315 = vmatpush2.bf16.msra.mxu1 %v10765_v61  ;;  %4273 = vmatprep.subr.bf16.mxu0 %v10770_v3  ;;  %v3981_v61 = vadd.f32 %v3980_v16, %v646_v41  ;;  %v10801_v16 = vld [vmem:[%s15549_s3 + $0x3f0] ss:$24 sps:$4 sm:$0xff]   ;;  %v10827_v41 = vld [vmem:[%s15549_s3 + $0x334] ss:$24 sps:$4 sm:$0xff]  }
 0x235   :  { %4316 = vmatprep.subr.bf16.mxu1 %v10773_v5  ;;  %v13701_v5 = vpack.c.bf16 %v4372_v45, %v4360_v59  ;;  %v10825_v45 = vld [vmem:[%s15549_s3 + $0x330] ss:$24 sps:$4 sm:$0xff]   ;;  %v10836_v59 = vld [vmem:[%s15549_s3 + $0x2d4] ss:$24 sps:$4 sm:$0xff]  }
 0x237   :  { %4274 = vmatpush2.bf16.msra.mxu0 %v10768_v4  ;;  %v10800_v4 = vld [vmem:[%s15549_s3 + $0xf4] ss:$24 sps:$4 sm:$0xff]  }
 0x238   :  { %4317 = vmatpush2.bf16.msra.mxu1 %v10771_v39  ;;  %4275 = vmatprep.subr.bf16.mxu0 %v10776_v57  ;;  %v10806_v57 = vld [vmem:[%s15549_s3 + $0xc4] ss:$24 sps:$4 sm:$0xff]  }
 0x239   :  { %4318 = vmatprep.subr.bf16.mxu1 %v10779_v15 }
 0x23b   :  { %4276 = vmatpush2.bf16.msra.mxu0 %v10774_v32 }
 0x23c   :  { %4319 = vmatpush2.bf16.msra.mxu1 %v10777_v38  ;;  %4277 = vmatprep.subr.bf16.mxu0 %v10782_v52  ;;  %v10812_v52 = vld [vmem:[%s15549_s3 + $0x94] ss:$24 sps:$4 sm:$0xff]  }
 0x23d   :  { %4320 = vmatprep.subr.bf16.mxu1 %v10785_v25 }
 0x23f   :  { %4278 = vmatpush2.bf16.msra.mxu0 %v10780_v11  ;;  %v10810_v11 = vld [vmem:[%s15549_s3 + $0x90] ss:$24 sps:$4 sm:$0xff]  }
 0x240   :  { %4321 = vmatpush2.bf16.msra.mxu1 %v10783_v50  ;;  %7881 = vmatprep.subr.bf16.mxu0 %v10788_v36  ;;  %v10815_v50 = vld [vmem:[%s15549_s3 + $0x394] ss:$24 sps:$4 sm:$0xff]   ;;  %v10816_v36 = vld [vmem:[%s15549_s3 + $0x60] ss:$24 sps:$4 sm:$0xff]  }
 0x241   :  { %7924 = vmatprep.subr.bf16.mxu1 %v10791_v40  ;;  %v10819_v40 = vld [vmem:[%s15549_s3 + $0x360] ss:$24 sps:$4 sm:$0xff]  }
 0x242   :  { %v4023_v2 = vpop.f32.mrf.mxu0  ;;  %4280 = vmatmul.mubr.bf16.vlgmr.msra.gmra.mxu0 %v11986_v13  ;;  %v10803_v13 = vld [vmem:[%s15549_s3 + $0x3f4] ss:$24 sps:$4 sm:$0xff]  }
 0x243   :  { %v4066_v3 = vpop.f32.mrf.mxu1  ;;  %4323 = vmatmul.mubr.bf16.vlgmr.msra.gmra.mxu1 %v12198_v23  ;;  %v4024_v39 = vadd.f32 %v4023_v2, %v3981_v61  ;;  %7882 = vmatpush1.bf16.msra.mxu0 %v10786_v12  ;;  %v10822_v12 = vld [vmem:[%s15549_s3 + $0x30] ss:$24 sps:$4 sm:$0xff]   ;;  %v10839_v61 = vld [vmem:[%s15549_s3 + $0x5d4] ss:$24 sps:$4 sm:$0xff]  }
 0x244   :  { %7913 = vmatprep.mubr.bf16.mxu0 %v13694_v62  ;;  %7925 = vmatpush1.bf16.msra.mxu1 %v10789_v55  ;;  %v13714_v23 = vpop.f32.mrf.mxu0  ;;  %v10830_v55 = vld [vmem:[%s15549_s3 + $0x4] ss:$24 sps:$4 sm:$0xff]   ;;  %v10837_v2 = vld [vmem:[%s15549_s3 + $0x5d0] ss:$24 sps:$4 sm:$0xff]  }
 0x245   :  { %7956 = vmatprep.mubr.bf16.mxu1 %v13701_v5  ;;  %v13716_v7 = vpop.f32.mrf.mxu1  ;;  %v4067_v9 = vadd.f32 %v4066_v3, %v4024_v39  ;;  %7883 = vmatprep.subr.bf16.mxu0 %v10794_v54  ;;  %v10828_v54 = vld [vmem:[%s15549_s3] ss:$24 sps:$4 sm:$0xff]   ;;  %v10842_v3 = vld [vmem:[%s15549_s3 + $0x2a4] ss:$24 sps:$4 sm:$0xff]  }
 0x246   :  { %7926 = vmatprep.subr.bf16.mxu1 %v10797_v58  ;;  %v4027_v14 = vpop.f32.mrf.mxu0  ;;  %v10831_v58 = vld [vmem:[%s15549_s3 + $0x300] ss:$24 sps:$4 sm:$0xff]  }
 0x247   :  { %v4028_v15 = vadd.f32 %v4027_v14, %v3985_v8  ;;  %7884 = vmatpush1.bf16.msra.mxu0 %v10792_v53  ;;  %v4070_v32 = vpop.f32.mrf.mxu1  ;;  %v4339_v38 = vmul.f32 0.01, %v4067_v9  ;;  %v10834_v53 = vld [vmem:[%s15549_s3 + $0x2d0] ss:$24 sps:$4 sm:$0xff]   ;;  %v10843_v39 = vld [vmem:[%s15549_s3 + $0x5a0] ss:$24 sps:$4 sm:$0xff]  }
 0x248   :  { %7927 = vmatpush1.bf16.msra.mxu1 %v10795_v6  ;;  %7885 = vmatprep.subr.bf16.mxu0 %v10800_v4  ;;  %v10845_v6 = vld [vmem:[%s15549_s3 + $0x5a4] ss:$24 sps:$4 sm:$0xff]   ;;  %v10840_v4 = vld [vmem:[%s15549_s3 + $0x2a0] ss:$24 sps:$4 sm:$0xff]   ;;  %v10851_v8 = vld [vmem:[%s15549_s3 + $0x574] ss:$24 sps:$4 sm:$0xff]  }
 0x249   :  { %v4071_v49 = vadd.f32 %v4070_v32, %v4028_v15  ;;  %7928 = vmatprep.subr.bf16.mxu1 %v10803_v13  ;;  %v4363_v25 = vmax.f32 %v4067_v9, %v4339_v38  ;;  %v10848_v13 = vld [vmem:[%s15549_s3 + $0x274] ss:$24 sps:$4 sm:$0xff]   ;;  %v10846_v9 = vld [vmem:[%s15549_s3 + $0x270] ss:$24 sps:$4 sm:$0xff]   ;;  %v10854_v14 = vld [vmem:[%s15549_s3 + $0x244] ss:$24 sps:$4 sm:$0xff]  }
 0x24a   :  { %v649_v15 = vsub.s32 7, %v12574_v31  ;;  %v10855_v32 = vld [vmem:[%s15549_s3 + $0x540] ss:$24 sps:$4 sm:$0xff]   ;;  %v10860_v38 = vld [vmem:[%s15549_s3 + $0x214] ss:$24 sps:$4 sm:$0xff]  }
 0x24b   :  { %v4351_v20 = vmul.f32 0.01, %v4071_v49  ;;  %7886 = vmatpush1.bf16.msra.mxu0 %v10798_v51  ;;  %v10849_v51 = vld [vmem:[%s15549_s3 + $0x570] ss:$24 sps:$4 sm:$0xff]  }
 0x24c   :  { %7929 = vmatpush1.bf16.msra.mxu1 %v10801_v16  ;;  %7887 = vmatprep.subr.bf16.mxu0 %v10806_v57  ;;  %v10857_v16 = vld [vmem:[%s15549_s3 + $0x544] ss:$24 sps:$4 sm:$0xff]   ;;  %v641_v57 = vsub.s32 5, %v12574_v31 }
 0x24d   :  { %v4375_v34 = vmax.f32 %v4071_v49, %v4351_v20  ;;  %7930 = vmatprep.subr.bf16.mxu1 %v10809_v22  ;;  %v10852_v22 = vld [vmem:[%s15549_s3 + $0x240] ss:$24 sps:$4 sm:$0xff]   ;;  %v10863_v49 = vld [vmem:[%s15549_s3 + $0x514] ss:$24 sps:$4 sm:$0xff]   ;;  %v10858_v20 = vld [vmem:[%s15549_s3 + $0x210] ss:$24 sps:$4 sm:$0xff]  }
 0x24f   :  { %v13751_v30 = vpack.c.bf16 %v4375_v34, %v4363_v25  ;;  %7888 = vmatpush1.bf16.msra.mxu0 %v10804_v18  ;;  %v642_v18 = vrot.slane %v13600_v56, %v641_v57  ;;  %v10866_v25 = vld [vmem:[%s15549_s3 + $0x1e4] ss:$24 sps:$4 sm:$0xff]  }
 0x250   :  { %7931 = vmatpush1.bf16.msra.mxu1 %v10807_v19  ;;  %7889 = vmatprep.subr.bf16.mxu0 %v10812_v52  ;;  %v650_v19 = vrot.slane %v13600_v56, %v649_v15  ;;  %v10861_v52 = vld [vmem:[%s15549_s3 + $0x510] ss:$24 sps:$4 sm:$0xff]   ;;  %v10869_v56 = vld [vmem:[%s15549_s3 + $0x4e4] ss:$24 sps:$4 sm:$0xff]   ;;  %v10888_v15 = vld [vmem:[%s15549_s3 + $0x720] ss:$24 sps:$4 sm:$0xff]  }
 0x251   :  { %7932 = vmatprep.subr.bf16.mxu1 %v10815_v50  ;;  %v3858_v34 = vadd.f32 %v13450_v27, %v642_v18  ;;  %v10864_v27 = vld [vmem:[%s15549_s3 + $0x1e0] ss:$24 sps:$4 sm:$0xff]  }
 0x252   :  { %v3987_v50 = vadd.f32 %v13692_v60, %v650_v19 }
 0x253   :  { %7890 = vmatpush1.bf16.msra.mxu0 %v10810_v11  ;;  %v4029_v11 = vpop.f32.mrf.mxu0  ;;  %v3901_v60 = vadd.f32 %v13636_v10, %v3858_v34  ;;  %v10870_v10 = vld [vmem:[%s15549_s3 + $0x1b0] ss:$24 sps:$4 sm:$0xff]  }
 0x254   :  { %7933 = vmatpush1.bf16.msra.mxu1 %v10813_v26  ;;  %7891 = vmatprep.subr.bf16.mxu0 %v10818_v28  ;;  %v3854_v26 = vadd.f32 %v13263_v47, %v642_v18  ;;  %v3983_v28 = vadd.f32 %v13656_v21, %v650_v19  ;;  %v10875_v47 = vld [vmem:[%s15549_s3 + $0x4b4] ss:$24 sps:$4 sm:$0xff]  }
 0x255   :  { %7934 = vmatprep.subr.bf16.mxu1 %v10821_v35  ;;  %v4030_v35 = vadd.f32 %v4029_v11, %v3987_v50 }
 0x256   :  { %v4026_v21 = vadd.f32 %v13714_v23, %v3983_v28  ;;  %v10878_v23 = vld [vmem:[%s15549_s3 + $0x184] ss:$24 sps:$4 sm:$0xff]  }
 0x257   :  { %7892 = vmatpush1.bf16.msra.mxu0 %v10816_v36  ;;  %v10867_v36 = vld [vmem:[%s15549_s3 + $0x4e0] ss:$24 sps:$4 sm:$0xff]  }
 0x258   :  { %7935 = vmatpush1.bf16.msra.mxu1 %v10819_v40  ;;  %7893 = vmatprep.subr.bf16.mxu0 %v10824_v33  ;;  %v10872_v40 = vld [vmem:[%s15549_s3 + $0x1b4] ss:$24 sps:$4 sm:$0xff]   ;;  %v3897_v33 = vadd.f32 %v13265_v48, %v3854_v26  ;;  %v10881_v48 = vld [vmem:[%s15549_s3 + $0x484] ss:$24 sps:$4 sm:$0xff]  }
 0x259   :  { %7936 = vmatprep.subr.bf16.mxu1 %v10827_v41  ;;  %v3944_v41 = vadd.f32 %v13690_v0, %v3901_v60  ;;  %v4069_v0 = vadd.f32 %v13716_v7, %v4026_v21  ;;  %v10887_v7 = vld [vmem:[%s15549_s3 + $0xa54] ss:$24 sps:$4 sm:$0xff]  }
 0x25b   :  { %7894 = vmatpush1.bf16.msra.mxu0 %v10822_v12  ;;  %v4072_v12 = vpop.f32.mrf.mxu1 }
 0x25c   :  { %7937 = vmatpush1.bf16.msra.mxu1 %v10825_v45  ;;  %7895 = vmatprep.subr.bf16.mxu0 %v10830_v55  ;;  %v4073_v45 = vadd.f32 %v4072_v12, %v4030_v35  ;;  %v10873_v55 = vld [vmem:[%s15549_s3 + $0x4b0] ss:$24 sps:$4 sm:$0xff]  }
 0x25d   :  { %7938 = vmatprep.subr.bf16.mxu1 %v10833_v46  ;;  %v3940_v46 = vadd.f32 %v13470_v42, %v3897_v33  ;;  %v10879_v42 = vld [vmem:[%s15549_s3 + $0x480] ss:$24 sps:$4 sm:$0xff]  }
 0x25f   :  { %7896 = vmatpush1.bf16.msra.mxu0 %v10828_v54  ;;  %v10876_v54 = vld [vmem:[%s15549_s3 + $0x180] ss:$24 sps:$4 sm:$0xff]  }
 0x260   :  { %7939 = vmatpush1.bf16.msra.mxu1 %v10831_v58  ;;  %7897 = vmatprep.subr.bf16.mxu0 %v10836_v59  ;;  %v4350_v58 = vmul.f32 0.01, %v3944_v41  ;;  %v4352_v59 = vmul.f32 0.01, %v4073_v45 }
 0x261   :  { %7940 = vmatprep.subr.bf16.mxu1 %v10839_v61  ;;  %v10884_v61 = vld [vmem:[%s15549_s3 + $0x754] ss:$24 sps:$4 sm:$0xff]  }
 0x263   :  { %7898 = vmatpush2.bf16.msra.mxu0 %v10834_v53  ;;  %v4338_v53 = vmul.f32 0.01, %v3940_v46 }
 0x264   :  { %7941 = vmatpush2.bf16.msra.mxu1 %v10837_v2  ;;  %7899 = vmatprep.subr.bf16.mxu0 %v10842_v3  ;;  %v4340_v2 = vmul.f32 0.01, %v4069_v0  ;;  %v10882_v3 = vld [vmem:[%s15549_s3 + $0x750] ss:$24 sps:$4 sm:$0xff]  }
 0x265   :  { %7942 = vmatprep.subr.bf16.mxu1 %v10845_v6  ;;  %v4374_v6 = vmax.f32 %v3944_v41, %v4350_v58 }
 0x267   :  { %7900 = vmatpush2.bf16.msra.mxu0 %v10840_v4  ;;  %v4376_v4 = vmax.f32 %v4073_v45, %v4352_v59 }
 0x268   :  { %7943 = vmatpush2.bf16.msra.mxu1 %v10843_v39  ;;  %7901 = vmatprep.subr.bf16.mxu0 %v10848_v13  ;;  %v10885_v39 = vld [vmem:[%s15549_s3 + $0xa50] ss:$24 sps:$4 sm:$0xff]   ;;  %v10890_v13 = vld [vmem:[%s15549_s3 + $0x724] ss:$24 sps:$4 sm:$0xff]  }
 0x269   :  { %7944 = vmatprep.subr.bf16.mxu1 %v10851_v8  ;;  %v4362_v8 = vmax.f32 %v3940_v46, %v4338_v53 }
 0x26b   :  { %7902 = vmatpush2.bf16.msra.mxu0 %v10846_v9  ;;  %v4364_v9 = vmax.f32 %v4069_v0, %v4340_v2 }
 0x26c   :  { %7945 = vmatpush2.bf16.msra.mxu1 %v10849_v51  ;;  %7903 = vmatprep.subr.bf16.mxu0 %v10854_v14  ;;  %v13914_v51 = vpack.c.bf16 %v4374_v6, %v4362_v8  ;;  %v10893_v14 = vld [vmem:[%s15549_s3 + $0xa24] ss:$24 sps:$4 sm:$0xff]  }
 0x26d   :  { %7946 = vmatprep.subr.bf16.mxu1 %v10857_v16  ;;  %v13920_v16 = vpack.c.bf16 %v4376_v4, %v4364_v9 }
 0x26f   :  { %7904 = vmatpush2.bf16.msra.mxu0 %v10852_v22  ;;  %v10891_v22 = vld [vmem:[%s15549_s3 + $0xa20] ss:$24 sps:$4 sm:$0xff]  }
 0x270   :  { %7947 = vmatpush2.bf16.msra.mxu1 %v10855_v32  ;;  %7905 = vmatprep.subr.bf16.mxu0 %v10860_v38  ;;  %v10896_v32 = vld [vmem:[%s15549_s3 + $0x6f4] ss:$24 sps:$4 sm:$0xff]  }
 0x271   :  { %7948 = vmatprep.subr.bf16.mxu1 %v10863_v49  ;;  %v10899_v38 = vld [vmem:[%s15549_s3 + $0x9f4] ss:$24 sps:$4 sm:$0xff]  }
 0x273   :  { %7906 = vmatpush2.bf16.msra.mxu0 %v10858_v20 }
 0x274   :  { %7949 = vmatpush2.bf16.msra.mxu1 %v10861_v52  ;;  %7907 = vmatprep.subr.bf16.mxu0 %v10866_v25 }
 0x275   :  { %7950 = vmatprep.subr.bf16.mxu1 %v10869_v56 }
 0x277   :  { %7908 = vmatpush2.bf16.msra.mxu0 %v10864_v27 }
 0x278   :  { %7951 = vmatpush2.bf16.msra.mxu1 %v10867_v36  ;;  %7909 = vmatprep.subr.bf16.mxu0 %v10872_v40 }
 0x279   :  { %7952 = vmatprep.subr.bf16.mxu1 %v10875_v47 }
 0x27b   :  { %7910 = vmatpush2.bf16.msra.mxu0 %v10870_v10 }
 0x27c   :  { %7953 = vmatpush2.bf16.msra.mxu1 %v10873_v55  ;;  %7911 = vmatprep.subr.bf16.mxu0 %v10878_v23 }
 0x27d   :  { %7954 = vmatprep.subr.bf16.mxu1 %v10881_v48 }
 0x27f   :  { %7912 = vmatpush2.bf16.msra.mxu0 %v10876_v54 }
 0x280   :  { %7955 = vmatpush2.bf16.msra.mxu1 %v10879_v42  ;;  %7967 = vmatprep.subr.bf16.mxu0 %v10884_v61 }
 0x281   :  { %8010 = vmatprep.subr.bf16.mxu1 %v10887_v7 }
 0x282   :  { %7914 = vmatmul.mubr.bf16.vlgmr.msra.gmra.mxu0 %v12863_v29 }
 0x283   :  { %7957 = vmatmul.mubr.bf16.vlgmr.msra.gmra.mxu1 %v13083_v17  ;;  %7968 = vmatpush1.bf16.msra.mxu0 %v10882_v3 }
 0x284   :  { %7999 = vmatprep.mubr.bf16.mxu0 %v13914_v51  ;;  %8011 = vmatpush1.bf16.msra.mxu1 %v10885_v39 }
 0x285   :  { %8042 = vmatprep.mubr.bf16.mxu1 %v13920_v16  ;;  %7969 = vmatprep.subr.bf16.mxu0 %v10890_v13 }
 0x286   :  { %10 = vsyncpa [#allocation3], 0  ;;  %8012 = vmatprep.subr.bf16.mxu1 %v10893_v14  ;;  %v10894_v49 = vld [vmem:[%s15549_s3 + $0x6f0] ss:$24 sps:$4 sm:$0xff]   ;;  %v10902_v19 = vld [vmem:[%s15549_s3 + $0x6c4] ss:$24 sps:$4 sm:$0xff]  }
 0x287   :  { %7970 = vmatpush1.bf16.msra.mxu0 %v10888_v15  ;;  %v10897_v18 = vld [vmem:[%s15549_s3 + $0x9f0] ss:$24 sps:$4 sm:$0xff]   ;;  %v10905_v20 = vld [vmem:[%s15549_s3 + $0x9c4] ss:$24 sps:$4 sm:$0xff]   ;;  %v10900_v52 = vld [vmem:[%s15549_s3 + $0x6c0] ss:$24 sps:$4 sm:$0xff]   ;;  %v14071_v15 = vpop.f32.mrf.mxu0 }
 0x288   :  { %8013 = vmatpush1.bf16.msra.mxu1 %v10891_v22  ;;  %7971 = vmatprep.subr.bf16.mxu0 %v10896_v32  ;;  %v10903_v25 = vld [vmem:[%s15549_s3 + $0x9c0] ss:$24 sps:$4 sm:$0xff]   ;;  %v10908_v34 = vld [vmem:[%s15549_s3 + $0x694] ss:$24 sps:$4 sm:$0xff]   ;;  %v10906_v56 = vld [vmem:[%s15549_s3 + $0x690] ss:$24 sps:$4 sm:$0xff]  }
 0x289   :  { %8014 = vmatprep.subr.bf16.mxu1 %v10899_v38  ;;  %v10911_v11 = vld [vmem:[%s15549_s3 + $0x994] ss:$24 sps:$4 sm:$0xff]   ;;  %v10909_v50 = vld [vmem:[%s15549_s3 + $0x990] ss:$24 sps:$4 sm:$0xff]   ;;  %v10914_v26 = vld [vmem:[%s15549_s3 + $0x664] ss:$24 sps:$4 sm:$0xff]  }
 0x28a   :  { %v10917_v28 = vld [vmem:[%s15549_s3 + $0x964] ss:$24 sps:$4 sm:$0xff]   ;;  %v10912_v35 = vld [vmem:[%s15549_s3 + $0x660] ss:$24 sps:$4 sm:$0xff]   ;;  %v10920_v36 = vld [vmem:[%s15549_s3 + $0x634] ss:$24 sps:$4 sm:$0xff]  }
 0x28b   :  { %7972 = vmatpush1.bf16.msra.mxu0 %v10894_v49  ;;  %v10915_v27 = vld [vmem:[%s15549_s3 + $0x960] ss:$24 sps:$4 sm:$0xff]   ;;  %v10923_v40 = vld [vmem:[%s15549_s3 + $0x934] ss:$24 sps:$4 sm:$0xff]   ;;  %v10918_v60 = vld [vmem:[%s15549_s3 + $0x630] ss:$24 sps:$4 sm:$0xff]  }
 0x28c   :  { %8015 = vmatpush1.bf16.msra.mxu1 %v10897_v18  ;;  %7973 = vmatprep.subr.bf16.mxu0 %v10902_v19  ;;  %v10921_v47 = vld [vmem:[%s15549_s3 + $0x930] ss:$24 sps:$4 sm:$0xff]   ;;  %v10926_v21 = vld [vmem:[%s15549_s3 + $0x604] ss:$24 sps:$4 sm:$0xff]   ;;  %v10924_v41 = vld [vmem:[%s15549_s3 + $0x600] ss:$24 sps:$4 sm:$0xff]   ;;  %v4111_v19 = vpop.f32.mrf.mxu0 }
 0x28d   :  { %8016 = vmatprep.subr.bf16.mxu1 %v10905_v20  ;;  %v10929_v33 = vld [vmem:[%s15549_s3 + $0x904] ss:$24 sps:$4 sm:$0xff]   ;;  %v10927_v12 = vld [vmem:[%s15549_s3 + $0x900] ss:$24 sps:$4 sm:$0xff]   ;;  %v10932_v45 = vld [vmem:[%s15549_s3 + $0x8d4] ss:$24 sps:$4 sm:$0xff]  }
 0x28e   :  { %v10935_v10 = vld [vmem:[%s15549_s3 + $0xbd4] ss:$24 sps:$4 sm:$0xff]   ;;  %v10930_v55 = vld [vmem:[%s15549_s3 + $0x8d0] ss:$24 sps:$4 sm:$0xff]   ;;  %v10938_v46 = vld [vmem:[%s15549_s3 + $0x8a4] ss:$24 sps:$4 sm:$0xff]  }
 0x28f   :  { %7974 = vmatpush1.bf16.msra.mxu0 %v10900_v52  ;;  %v10933_v23 = vld [vmem:[%s15549_s3 + $0xbd0] ss:$24 sps:$4 sm:$0xff]   ;;  %v10941_v48 = vld [vmem:[%s15549_s3 + $0xba4] ss:$24 sps:$4 sm:$0xff]   ;;  %v10936_v0 = vld [vmem:[%s15549_s3 + $0x8a0] ss:$24 sps:$4 sm:$0xff]  }
 0x290   :  { %8017 = vmatpush1.bf16.msra.mxu1 %v10903_v25  ;;  %7975 = vmatprep.subr.bf16.mxu0 %v10908_v34  ;;  %v10939_v54 = vld [vmem:[%s15549_s3 + $0xba0] ss:$24 sps:$4 sm:$0xff]   ;;  %v10944_v58 = vld [vmem:[%s15549_s3 + $0x874] ss:$24 sps:$4 sm:$0xff]   ;;  %v10942_v42 = vld [vmem:[%s15549_s3 + $0x870] ss:$24 sps:$4 sm:$0xff]   ;;  %v14099_v34 = vpop.f32.mrf.mxu1 }
 0x291   :  { %8018 = vmatprep.subr.bf16.mxu1 %v10911_v11  ;;  %v10947_v59 = vld [vmem:[%s15549_s3 + $0xb74] ss:$24 sps:$4 sm:$0xff]   ;;  %v10945_v61 = vld [vmem:[%s15549_s3 + $0xb70] ss:$24 sps:$4 sm:$0xff]   ;;  %v10950_v53 = vld [vmem:[%s15549_s3 + $0x844] ss:$24 sps:$4 sm:$0xff]  }
 0x292   :  { %v10953_v7 = vld [vmem:[%s15549_s3 + $0xb44] ss:$24 sps:$4 sm:$0xff]   ;;  %v10948_v2 = vld [vmem:[%s15549_s3 + $0x840] ss:$24 sps:$4 sm:$0xff]   ;;  %v10956_v6 = vld [vmem:[%s15549_s3 + $0x814] ss:$24 sps:$4 sm:$0xff]  }
 0x293   :  { %7976 = vmatpush1.bf16.msra.mxu0 %v10906_v56  ;;  %v10951_v3 = vld [vmem:[%s15549_s3 + $0xb40] ss:$24 sps:$4 sm:$0xff]   ;;  %v10959_v4 = vld [vmem:[%s15549_s3 + $0xb14] ss:$24 sps:$4 sm:$0xff]   ;;  %v10954_v39 = vld [vmem:[%s15549_s3 + $0x810] ss:$24 sps:$4 sm:$0xff]  }
 0x294   :  { %8019 = vmatpush1.bf16.msra.mxu1 %v10909_v50  ;;  %7977 = vmatprep.subr.bf16.mxu0 %v10914_v26  ;;  %v10957_v13 = vld [vmem:[%s15549_s3 + $0xb10] ss:$24 sps:$4 sm:$0xff]   ;;  %v10962_v8 = vld [vmem:[%s15549_s3 + $0x7e4] ss:$24 sps:$4 sm:$0xff]   ;;  %v10960_v14 = vld [vmem:[%s15549_s3 + $0x7e0] ss:$24 sps:$4 sm:$0xff]   ;;  %v14106_v50 = vpop.f32.mrf.mxu0 }
 0x295   :  { %8020 = vmatprep.subr.bf16.mxu1 %v10917_v28  ;;  %v10965_v9 = vld [vmem:[%s15549_s3 + $0xae4] ss:$24 sps:$4 sm:$0xff]   ;;  %v10963_v22 = vld [vmem:[%s15549_s3 + $0xae0] ss:$24 sps:$4 sm:$0xff]   ;;  %v10968_v32 = vld [vmem:[%s15549_s3 + $0x7b4] ss:$24 sps:$4 sm:$0xff]  }
 0x296   :  { %v10971_v38 = vld [vmem:[%s15549_s3 + $0xab4] ss:$24 sps:$4 sm:$0xff]   ;;  %v10966_v49 = vld [vmem:[%s15549_s3 + $0x7b0] ss:$24 sps:$4 sm:$0xff]   ;;  %v10974_v52 = vld [vmem:[%s15549_s3 + $0x784] ss:$24 sps:$4 sm:$0xff]  }
 0x297   :  { %7978 = vmatpush1.bf16.msra.mxu0 %v10912_v35  ;;  %v14088_v18 = vld [vmem:[%s15548_s2 + $0x8] sm:$0xf]  ;;  %v10977_v25 = vld [vmem:[%s15549_s3 + $0xa84] ss:$24 sps:$4 sm:$0xff]   ;;  %v10972_v56 = vld [vmem:[%s15549_s3 + $0x780] ss:$24 sps:$4 sm:$0xff]  }
 0x298   :  { %8021 = vmatpush1.bf16.msra.mxu1 %v10915_v27  ;;  %7979 = vmatprep.subr.bf16.mxu0 %v10920_v36  ;;  %v10969_v20 = vld [vmem:[%s15549_s3 + $0xab0] ss:$24 sps:$4 sm:$0xff]   ;;  %v658_v11 = vrot.slane %v14088_v18, %v13580_v43  ;;  %v10975_v26 = vld [vmem:[%s15549_s3 + $0xa80] ss:$24 sps:$4 sm:$0xff]   ;;  %v10980_v28 = vld [vmem:[%s15549_s3 + $0xd54] ss:$24 sps:$4 sm:$0xff]   ;;  %v4154_v27 = vpop.f32.mrf.mxu1 }
 0x299   :  { %8022 = vmatprep.subr.bf16.mxu1 %v10923_v40  ;;  %v10995_v35 = vld [vmem:[%s15549_s3 + $0x1054] ss:$24 sps:$4 sm:$0xff]   ;;  %v10978_v40 = vld [vmem:[%s15549_s3 + $0xd50] ss:$24 sps:$4 sm:$0xff]  }
 0x29a   :  { %v4112_v36 = vadd.f32 %v4111_v19, %v658_v11  ;;  %v10998_v19 = vld [vmem:[%s15549_s3 + $0xc64] ss:$24 sps:$4 sm:$0xff]  }
 0x29b   :  { %7980 = vmatpush1.bf16.msra.mxu0 %v10918_v60  ;;  %v4115_v60 = vpop.f32.mrf.mxu0 }
 0x29c   :  { %8023 = vmatpush1.bf16.msra.mxu1 %v10921_v47  ;;  %7981 = vmatprep.subr.bf16.mxu0 %v10926_v21  ;;  %v10983_v47 = vld [vmem:[%s15549_s3 + $0xd24] ss:$24 sps:$4 sm:$0xff]   ;;  %v10993_v21 = vld [vmem:[%s15549_s3 + $0x1050] ss:$24 sps:$4 sm:$0xff]  }
 0x29d   :  { %8024 = vmatprep.subr.bf16.mxu1 %v10929_v33  ;;  %v11001_v33 = vld [vmem:[%s15549_s3 + $0x1024] ss:$24 sps:$4 sm:$0xff]  }
 0x29f   :  { %7982 = vmatpush1.bf16.msra.mxu0 %v10924_v41  ;;  %v14129_v41 = vpop.f32.mrf.mxu1 }
 0x2a0   :  { %8025 = vmatpush1.bf16.msra.mxu1 %v10927_v12  ;;  %7983 = vmatprep.subr.bf16.mxu0 %v10932_v45  ;;  %v4155_v45 = vadd.f32 %v4154_v27, %v4112_v36  ;;  %v11029_v27 = vld [vmem:[%s15549_s3 + $0xf30] ss:$24 sps:$4 sm:$0xff]   ;;  %v11037_v36 = vld [vmem:[%s15549_s3 + $0xf04] ss:$24 sps:$4 sm:$0xff]  }
 0x2a1   :  { %8026 = vmatprep.subr.bf16.mxu1 %v10935_v10  ;;  %v4116_v10 = vadd.f32 %v4115_v60, %v658_v11  ;;  %v11004_v11 = vld [vmem:[%s15549_s3 + $0xc34] ss:$24 sps:$4 sm:$0xff]  }
 0x2a2   :  { %v11016_v60 = vld [vmem:[%s15549_s3 + $0xed4] ss:$24 sps:$4 sm:$0xff]  }
 0x2a3   :  { %7984 = vmatpush2.bf16.msra.mxu0 %v10930_v55  ;;  %v10981_v55 = vld [vmem:[%s15549_s3 + $0xd20] ss:$24 sps:$4 sm:$0xff]  }
 0x2a4   :  { %8027 = vmatpush2.bf16.msra.mxu1 %v10933_v23  ;;  %7985 = vmatprep.subr.bf16.mxu0 %v10938_v46  ;;  %v10986_v46 = vld [vmem:[%s15549_s3 + $0xcf4] ss:$24 sps:$4 sm:$0xff]  }
 0x2a5   :  { %8028 = vmatprep.subr.bf16.mxu1 %v10941_v48  ;;  %v10999_v48 = vld [vmem:[%s15549_s3 + $0x1020] ss:$24 sps:$4 sm:$0xff]  }
 0x2a7   :  { %7986 = vmatpush2.bf16.msra.mxu0 %v10936_v0 }
 0x2a8   :  { %8029 = vmatpush2.bf16.msra.mxu1 %v10939_v54  ;;  %7987 = vmatprep.subr.bf16.mxu0 %v10944_v58  ;;  %v11007_v54 = vld [vmem:[%s15549_s3 + $0xff4] ss:$24 sps:$4 sm:$0xff]   ;;  %v4158_v58 = vpop.f32.mrf.mxu1 }
 0x2a9   :  { %8030 = vmatprep.subr.bf16.mxu1 %v10947_v59 }
 0x2ab   :  { %7988 = vmatpush2.bf16.msra.mxu0 %v10942_v42  ;;  %v4159_v42 = vadd.f32 %v4158_v58, %v4116_v10  ;;  %v11041_v10 = vld [vmem:[%s15549_s3 + $0x11d0] ss:$24 sps:$4 sm:$0xff]   ;;  %v11034_v58 = vld [vmem:[%s15549_s3 + $0xe44] ss:$24 sps:$4 sm:$0xff]  }
 0x2ac   :  { %8031 = vmatpush2.bf16.msra.mxu1 %v10945_v61  ;;  %7989 = vmatprep.subr.bf16.mxu0 %v10950_v53  ;;  %v10984_v61 = vld [vmem:[%s15549_s3 + $0xcf0] ss:$24 sps:$4 sm:$0xff]  }
 0x2ad   :  { %8032 = vmatprep.subr.bf16.mxu1 %v10953_v7  ;;  %v10989_v7 = vld [vmem:[%s15549_s3 + $0xcc4] ss:$24 sps:$4 sm:$0xff]  }
 0x2af   :  { %7990 = vmatpush2.bf16.msra.mxu0 %v10948_v2  ;;  %v11005_v2 = vld [vmem:[%s15549_s3 + $0xff0] ss:$24 sps:$4 sm:$0xff]  }
 0x2b0   :  { %8033 = vmatpush2.bf16.msra.mxu1 %v10951_v3  ;;  %7991 = vmatprep.subr.bf16.mxu0 %v10956_v6 }
 0x2b1   :  { %8034 = vmatprep.subr.bf16.mxu1 %v10959_v4  ;;  %v11013_v4 = vld [vmem:[%s15549_s3 + $0xfc4] ss:$24 sps:$4 sm:$0xff]  }
 0x2b3   :  { %7992 = vmatpush2.bf16.msra.mxu0 %v10954_v39 }
 0x2b4   :  { %8035 = vmatpush2.bf16.msra.mxu1 %v10957_v13  ;;  %7993 = vmatprep.subr.bf16.mxu0 %v10962_v8  ;;  %v10987_v13 = vld [vmem:[%s15549_s3 + $0xcc0] ss:$24 sps:$4 sm:$0xff]   ;;  %v10992_v8 = vld [vmem:[%s15549_s3 + $0xc94] ss:$24 sps:$4 sm:$0xff]  }
 0x2b5   :  { %8036 = vmatprep.subr.bf16.mxu1 %v10965_v9  ;;  %v11011_v9 = vld [vmem:[%s15549_s3 + $0xfc0] ss:$24 sps:$4 sm:$0xff]  }
 0x2b7   :  { %7994 = vmatpush2.bf16.msra.mxu0 %v10960_v14 }
 0x2b8   :  { %8037 = vmatpush2.bf16.msra.mxu1 %v10963_v22  ;;  %7995 = vmatprep.subr.bf16.mxu0 %v10968_v32  ;;  %v11019_v32 = vld [vmem:[%s15549_s3 + $0xf94] ss:$24 sps:$4 sm:$0xff]  }
 0x2b9   :  { %8038 = vmatprep.subr.bf16.mxu1 %v10971_v38 }
 0x2bb   :  { %7996 = vmatpush2.bf16.msra.mxu0 %v10966_v49  ;;  %v10990_v49 = vld [vmem:[%s15549_s3 + $0xc90] ss:$24 sps:$4 sm:$0xff]  }
 0x2bc   :  { %8039 = vmatpush2.bf16.msra.mxu1 %v10969_v20  ;;  %7997 = vmatprep.subr.bf16.mxu0 %v10974_v52  ;;  %v11017_v20 = vld [vmem:[%s15549_s3 + $0xf90] ss:$24 sps:$4 sm:$0xff]   ;;  %v11025_v52 = vld [vmem:[%s15549_s3 + $0xf64] ss:$24 sps:$4 sm:$0xff]  }
 0x2bd   :  { %8040 = vmatprep.subr.bf16.mxu1 %v10977_v25  ;;  %v10996_v25 = vld [vmem:[%s15549_s3 + $0xc60] ss:$24 sps:$4 sm:$0xff]  }
 0x2bf   :  { %7998 = vmatpush2.bf16.msra.mxu0 %v10972_v56  ;;  %v11023_v56 = vld [vmem:[%s15549_s3 + $0xf60] ss:$24 sps:$4 sm:$0xff]  }
 0x2c0   :  { %8041 = vmatpush2.bf16.msra.mxu1 %v10975_v26  ;;  %8053 = vmatprep.subr.bf16.mxu0 %v10980_v28  ;;  %v11031_v26 = vld [vmem:[%s15549_s3 + $0xf34] ss:$24 sps:$4 sm:$0xff]   ;;  %v11002_v28 = vld [vmem:[%s15549_s3 + $0xc30] ss:$24 sps:$4 sm:$0xff]  }
 0x2c1   :  { %8096 = vmatprep.subr.bf16.mxu1 %v10995_v35  ;;  %v11010_v35 = vld [vmem:[%s15549_s3 + $0xc04] ss:$24 sps:$4 sm:$0xff]  }
 0x2c2   :  { %v14131_v12 = vpop.f32.mrf.mxu0  ;;  %8000 = vmatmul.mubr.bf16.vlgmr.msra.gmra.mxu0 %v13499_v63 }
 0x2c3   :  { %8043 = vmatmul.mubr.bf16.vlgmr.msra.gmra.mxu1 %v13751_v30  ;;  %8054 = vmatpush1.bf16.msra.mxu0 %v10978_v40  ;;  %v11008_v40 = vld [vmem:[%s15549_s3 + $0xc00] ss:$24 sps:$4 sm:$0xff]  }
 0x2c4   :  { %v4197_v23 = vpop.f32.mrf.mxu0  ;;  %8055 = vmatprep.subr.bf16.mxu0 %v10983_v47  ;;  %8097 = vmatpush1.bf16.msra.mxu1 %v10993_v21  ;;  %v11035_v47 = vld [vmem:[%s15549_s3 + $0xf00] ss:$24 sps:$4 sm:$0xff]   ;;  %v11043_v21 = vld [vmem:[%s15549_s3 + $0x11d4] ss:$24 sps:$4 sm:$0xff]  }
 0x2c5   :  { %v4198_v0 = vadd.f32 %v4197_v23, %v4155_v45  ;;  %8098 = vmatprep.subr.bf16.mxu1 %v11001_v33  ;;  %v11014_v33 = vld [vmem:[%s15549_s3 + $0xed0] ss:$24 sps:$4 sm:$0xff]   ;;  %v11022_v45 = vld [vmem:[%s15549_s3 + $0xea4] ss:$24 sps:$4 sm:$0xff]   ;;  %v11020_v23 = vld [vmem:[%s15549_s3 + $0xea0] ss:$24 sps:$4 sm:$0xff]  }
 0x2c6   :  { %v14147_v59 = vpop.f32.mrf.mxu0 }
 0x2c7   :  { %8056 = vmatpush1.bf16.msra.mxu0 %v10981_v55  ;;  %v4342_v3 = vmul.f32 0.01, %v4198_v0  ;;  %v11049_v55 = vld [vmem:[%s15549_s3 + $0x11a4] ss:$24 sps:$4 sm:$0xff]  }
 0x2c8   :  { %v4201_v53 = vpop.f32.mrf.mxu0  ;;  %8057 = vmatprep.subr.bf16.mxu0 %v10986_v46  ;;  %8099 = vmatpush1.bf16.msra.mxu1 %v10999_v48  ;;  %v11028_v46 = vld [vmem:[%s15549_s3 + $0xe74] ss:$24 sps:$4 sm:$0xff]   ;;  %v11047_v48 = vld [vmem:[%s15549_s3 + $0x11a0] ss:$24 sps:$4 sm:$0xff]  }
 0x2c9   :  { %v4202_v6 = vadd.f32 %v4201_v53, %v4159_v42  ;;  %8100 = vmatprep.subr.bf16.mxu1 %v11007_v54  ;;  %v4366_v14 = vmax.f32 %v4198_v0, %v4342_v3  ;;  %v11055_v0 = vld [vmem:[%s15549_s3 + $0x1174] ss:$24 sps:$4 sm:$0xff]   ;;  %v11026_v54 = vld [vmem:[%s15549_s3 + $0xe70] ss:$24 sps:$4 sm:$0xff]   ;;  %v11032_v53 = vld [vmem:[%s15549_s3 + $0xe40] ss:$24 sps:$4 sm:$0xff]  }
 0x2ca   :  { %v11053_v42 = vld [vmem:[%s15549_s3 + $0x1170] ss:$24 sps:$4 sm:$0xff]   ;;  %v11059_v3 = vld [vmem:[%s15549_s3 + $0x1140] ss:$24 sps:$4 sm:$0xff]  }
 0x2cb   :  { %v4354_v39 = vmul.f32 0.01, %v4202_v6  ;;  %8058 = vmatpush1.bf16.msra.mxu0 %v10984_v61  ;;  %v11061_v61 = vld [vmem:[%s15549_s3 + $0x1144] ss:$24 sps:$4 sm:$0xff]  }
 0x2cc   :  { %8059 = vmatprep.subr.bf16.mxu0 %v10989_v7  ;;  %8101 = vmatpush1.bf16.msra.mxu1 %v11005_v2  ;;  %v654_v7 = vrot.slane %v14088_v18, %v12592_v37  ;;  %v11040_v2 = vld [vmem:[%s15549_s3 + $0xe14] ss:$24 sps:$4 sm:$0xff]  }
 0x2cd   :  { %v4378_v22 = vmax.f32 %v4202_v6, %v4354_v39  ;;  %8102 = vmatprep.subr.bf16.mxu1 %v11013_v4  ;;  %v11067_v6 = vld [vmem:[%s15549_s3 + $0x1114] ss:$24 sps:$4 sm:$0xff]   ;;  %v11038_v39 = vld [vmem:[%s15549_s3 + $0xe10] ss:$24 sps:$4 sm:$0xff]  }
 0x2ce   :  { %v4114_v4 = vadd.f32 %v14106_v50, %v654_v7  ;;  %v11073_v50 = vld [vmem:[%s15549_s3 + $0x10e4] ss:$24 sps:$4 sm:$0xff]  }
 0x2cf   :  { %8060 = vmatpush1.bf16.msra.mxu0 %v10987_v13  ;;  %v14173_v38 = vpack.c.bf16 %v4378_v22, %v4366_v14  ;;  %v4110_v13 = vadd.f32 %v14071_v15, %v654_v7  ;;  %v11044_v15 = vld [vmem:[%s15549_s3 + $0xde0] ss:$24 sps:$4 sm:$0xff]  }
 0x2d0   :  { %8061 = vmatprep.subr.bf16.mxu0 %v10992_v8  ;;  %8103 = vmatpush1.bf16.msra.mxu1 %v11011_v9  ;;  %v11046_v8 = vld [vmem:[%s15549_s3 + $0xde4] ss:$24 sps:$4 sm:$0xff]   ;;  %v11065_v9 = vld [vmem:[%s15549_s3 + $0x1110] ss:$24 sps:$4 sm:$0xff]   ;;  %v4157_v14 = vadd.f32 %v14129_v41, %v4114_v4  ;;  %v11071_v41 = vld [vmem:[%s15549_s3 + $0x10e0] ss:$24 sps:$4 sm:$0xff]  }
 0x2d1   :  { %8085 = vmatprep.mubr.bf16.mxu0 %v14173_v38  ;;  %8104 = vmatprep.subr.bf16.mxu1 %v11019_v32  ;;  %v4153_v22 = vadd.f32 %v14099_v34, %v4110_v13  ;;  %v4238_v32 = vpop.f32.mrf.mxu1 }
 0x2d3   :  { %8062 = vmatpush1.bf16.msra.mxu0 %v10990_v49  ;;  %v4200_v49 = vadd.f32 %v14147_v59, %v4157_v14  ;;  %v4196_v34 = vadd.f32 %v14131_v12, %v4153_v22  ;;  %v11050_v59 = vld [vmem:[%s15549_s3 + $0xdb0] ss:$24 sps:$4 sm:$0xff]   ;;  %v11085_v12 = vld [vmem:[%s15549_s3 + $0x1084] ss:$24 sps:$4 sm:$0xff]  }
 0x2d4   :  { %8063 = vmatprep.subr.bf16.mxu0 %v10998_v19  ;;  %8105 = vmatpush1.bf16.msra.mxu1 %v11017_v20  ;;  %v11052_v19 = vld [vmem:[%s15549_s3 + $0xdb4] ss:$24 sps:$4 sm:$0xff]  }
 0x2d5   :  { %8106 = vmatprep.subr.bf16.mxu1 %v11025_v52  ;;  %v11079_v20 = vld [vmem:[%s15549_s3 + $0x10b4] ss:$24 sps:$4 sm:$0xff]   ;;  %v4240_v52 = vpop.f32.mrf.mxu1 }
 0x2d6   :  { %v11082_v14 = vld [vmem:[%s15549_s3 + $0xcc] ss:$24 sps:$4 sm:$0xff]  }
 0x2d7   :  { %8064 = vmatpush1.bf16.msra.mxu0 %v10996_v25  ;;  %v4353_v25 = vmul.f32 0.01, %v4200_v49 }
 0x2d8   :  { %8065 = vmatprep.subr.bf16.mxu0 %v11004_v11  ;;  %8107 = vmatpush1.bf16.msra.mxu1 %v11023_v56  ;;  %v11058_v11 = vld [vmem:[%s15549_s3 + $0xd84] ss:$24 sps:$4 sm:$0xff]   ;;  %v11077_v56 = vld [vmem:[%s15549_s3 + $0x10b0] ss:$24 sps:$4 sm:$0xff]  }
 0x2d9   :  { %8108 = vmatprep.subr.bf16.mxu1 %v11031_v26  ;;  %v4341_v26 = vmul.f32 0.01, %v4196_v34 }
 0x2db   :  { %8066 = vmatpush1.bf16.msra.mxu0 %v11002_v28  ;;  %v11056_v28 = vld [vmem:[%s15549_s3 + $0xd80] ss:$24 sps:$4 sm:$0xff]  }
 0x2dc   :  { %8067 = vmatprep.subr.bf16.mxu0 %v11010_v35  ;;  %8109 = vmatpush1.bf16.msra.mxu1 %v11029_v27  ;;  %v4377_v35 = vmax.f32 %v4200_v49, %v4353_v25  ;;  %v4242_v27 = vpop.f32.mrf.mxu1 }
 0x2dd   :  { %8110 = vmatprep.subr.bf16.mxu1 %v11037_v36  ;;  %v11064_v36 = vld [vmem:[%s15549_s3 + $0x15c] ss:$24 sps:$4 sm:$0xff]  }
 0x2df   :  { %8068 = vmatpush1.bf16.msra.mxu0 %v11008_v40  ;;  %v11083_v40 = vld [vmem:[%s15549_s3 + $0x1080] ss:$24 sps:$4 sm:$0xff]  }
 0x2e0   :  { %8069 = vmatprep.subr.bf16.mxu0 %v11016_v60  ;;  %8111 = vmatpush1.bf16.msra.mxu1 %v11035_v47  ;;  %v11091_v60 = vld [vmem:[%s15549_s3 + $0x45c] ss:$24 sps:$4 sm:$0xff]   ;;  %v4365_v47 = vmax.f32 %v4196_v34, %v4341_v26 }
 0x2e1   :  { %8112 = vmatprep.subr.bf16.mxu1 %v11043_v21  ;;  %v662_v21 = vrot.slane %v14088_v18, %v13002_v1 }
 0x2e3   :  { %8070 = vmatpush2.bf16.msra.mxu0 %v11014_v33  ;;  %v666_v33 = vrot.slane %v14088_v18, %v13595_v44  ;;  %v4243_v7 = vadd.f32 %v4242_v27, %v662_v21  ;;  %v11089_v27 = vld [vmem:[%s15549_s3 + $0x458] ss:$24 sps:$4 sm:$0xff]  }
 0x2e4   :  { %8071 = vmatprep.subr.bf16.mxu0 %v11022_v45  ;;  %8113 = vmatpush2.bf16.msra.mxu1 %v11041_v10  ;;  %v11062_v45 = vld [vmem:[%s15549_s3 + $0x158] ss:$24 sps:$4 sm:$0xff]   ;;  %v14335_v10 = vpack.c.bf16 %v4377_v35, %v4365_v47  ;;  %v11100_v47 = vld [vmem:[%s15549_s3 + $0x3c] ss:$24 sps:$4 sm:$0xff]  }
 0x2e5   :  { %8114 = vmatprep.subr.bf16.mxu1 %v11049_v55  ;;  %v4244_v55 = vpop.f32.mrf.mxu1  ;;  %v4241_v18 = vadd.f32 %v4240_v52, %v666_v33 }
 0x2e6   :  { %v4245_v4 = vadd.f32 %v4244_v55, %v666_v33  ;;  %v11103_v33 = vld [vmem:[%s15549_s3 + $0x3fc] ss:$24 sps:$4 sm:$0xff]   ;;  %v11106_v55 = vld [vmem:[%s15549_s3 + $0xc] ss:$24 sps:$4 sm:$0xff]  }
 0x2e7   :  { %8072 = vmatpush2.bf16.msra.mxu0 %v11020_v23  ;;  %v11070_v23 = vld [vmem:[%s15549_s3 + $0x12c] ss:$24 sps:$4 sm:$0xff]  }
 0x2e8   :  { %8073 = vmatprep.subr.bf16.mxu0 %v11028_v46  ;;  %8115 = vmatpush2.bf16.msra.mxu1 %v11047_v48  ;;  %v4239_v46 = vadd.f32 %v4238_v32, %v662_v21  ;;  %v11095_v21 = vld [vmem:[%s15549_s3 + $0x428] ss:$24 sps:$4 sm:$0xff]  }
 0x2e9   :  { %8116 = vmatprep.subr.bf16.mxu1 %v11055_v0 }
 0x2eb   :  { %8074 = vmatpush2.bf16.msra.mxu0 %v11026_v54  ;;  %v11068_v54 = vld [vmem:[%s15549_s3 + $0x128] ss:$24 sps:$4 sm:$0xff]  }
 0x2ec   :  { %8075 = vmatprep.subr.bf16.mxu0 %v11034_v58  ;;  %8117 = vmatpush2.bf16.msra.mxu1 %v11053_v42 }
 0x2ed   :  { %8118 = vmatprep.subr.bf16.mxu1 %v11061_v61 }
 0x2ef   :  { %8076 = vmatpush2.bf16.msra.mxu0 %v11032_v53  ;;  %v11076_v53 = vld [vmem:[%s15549_s3 + $0xfc] ss:$24 sps:$4 sm:$0xff]  }
 0x2f0   :  { %8077 = vmatprep.subr.bf16.mxu0 %v11040_v2  ;;  %8119 = vmatpush2.bf16.msra.mxu1 %v11059_v3 }
 0x2f1   :  { %8120 = vmatprep.subr.bf16.mxu1 %v11067_v6 }
 0x2f3   :  { %8078 = vmatpush2.bf16.msra.mxu0 %v11038_v39 }
 0x2f4   :  { %8079 = vmatprep.subr.bf16.mxu0 %v11046_v8  ;;  %8121 = vmatpush2.bf16.msra.mxu1 %v11065_v9  ;;  %v11074_v8 = vld [vmem:[%s15549_s3 + $0xf8] ss:$24 sps:$4 sm:$0xff]  }
 0x2f5   :  { %8122 = vmatprep.subr.bf16.mxu1 %v11073_v50 }
 0x2f7   :  { %8080 = vmatpush2.bf16.msra.mxu0 %v11044_v15 }
 0x2f8   :  { %8081 = vmatprep.subr.bf16.mxu0 %v11052_v19  ;;  %8123 = vmatpush2.bf16.msra.mxu1 %v11071_v41 }
 0x2f9   :  { %8124 = vmatprep.subr.bf16.mxu1 %v11079_v20  ;;  %v11080_v20 = vld [vmem:[%s15549_s3 + $0xc8] ss:$24 sps:$4 sm:$0xff]  }
 0x2fb   :  { %8082 = vmatpush2.bf16.msra.mxu0 %v11050_v59  ;;  %v11088_v59 = vld [vmem:[%s15549_s3 + $0x9c] ss:$24 sps:$4 sm:$0xff]  }
 0x2fc   :  { %8083 = vmatprep.subr.bf16.mxu0 %v11058_v11  ;;  %8125 = vmatpush2.bf16.msra.mxu1 %v11077_v56 }
 0x2fd   :  { %8126 = vmatprep.subr.bf16.mxu1 %v11085_v12  ;;  %v11086_v12 = vld [vmem:[%s15549_s3 + $0x98] ss:$24 sps:$4 sm:$0xff]  }
 0x2ff   :  { %8084 = vmatpush2.bf16.msra.mxu0 %v11056_v28  ;;  %v11094_v28 = vld [vmem:[%s15549_s3 + $0x6c] ss:$24 sps:$4 sm:$0xff]  }
 0x300   :  { %8139 = vmatprep.subr.bf16.mxu0 %v11064_v36  ;;  %8127 = vmatpush2.bf16.msra.mxu1 %v11083_v40  ;;  %v11097_v40 = vld [vmem:[%s15549_s3 + $0x42c] ss:$24 sps:$4 sm:$0xff]  }
 0x301   :  { %8182 = vmatprep.subr.bf16.mxu1 %v11091_v60  ;;  %v11092_v60 = vld [vmem:[%s15549_s3 + $0x68] ss:$24 sps:$4 sm:$0xff]  }
 0x302   :  { %v4281_v48 = vpop.f32.mrf.mxu0  ;;  %8086 = vmatmul.mubr.bf16.vlgmr.msra.gmra.mxu0 %v14335_v10 }
 0x303   :  { %v4324_v0 = vpop.f32.mrf.mxu1  ;;  %8140 = vmatpush1.bf16.msra.mxu0 %v11062_v45  ;;  %8171 = vmatprep.mubr.bf16.mxu0 %v13694_v62  ;;  %v4282_v58 = vadd.f32 %v4281_v48, %v4239_v46  ;;  %v11098_v45 = vld [vmem:[%s15549_s3 + $0x38] ss:$24 sps:$4 sm:$0xff]   ;;  %v11109_v46 = vld [vmem:[%s15549_s3 + $0x3cc] ss:$24 sps:$4 sm:$0xff]   ;;  %v11104_v48 = vld [vmem:[%s15549_s3 + $0x8] ss:$24 sps:$4 sm:$0xff]  }
 0x304   :  { %v4283_v42 = vpop.f32.mrf.mxu0  ;;  %8141 = vmatprep.subr.bf16.mxu0 %v11070_v23  ;;  %v11101_v23 = vld [vmem:[%s15549_s3 + $0x3f8] ss:$24 sps:$4 sm:$0xff]  }
 0x305   :  { %v4326_v61 = vpop.f32.mrf.mxu1  ;;  %v4284_v2 = vadd.f32 %v4283_v42, %v4241_v18  ;;  %v4325_v9 = vadd.f32 %v4324_v0, %v4282_v58  ;;  %v11112_v0 = vld [vmem:[%s15549_s3 + $0x2dc] ss:$24 sps:$4 sm:$0xff]   ;;  %v11107_v18 = vld [vmem:[%s15549_s3 + $0x3c8] ss:$24 sps:$4 sm:$0xff]   ;;  %v11110_v58 = vld [vmem:[%s15549_s3 + $0x2d8] ss:$24 sps:$4 sm:$0xff]  }
 0x306   :  { %v4285_v3 = vpop.f32.mrf.mxu0  ;;  %v11118_v42 = vld [vmem:[%s15549_s3 + $0x2ac] ss:$24 sps:$4 sm:$0xff]  }
 0x307   :  { %v4328_v6 = vpop.f32.mrf.mxu1  ;;  %v4327_v39 = vadd.f32 %v4326_v61, %v4284_v2  ;;  %v4286_v13 = vadd.f32 %v4285_v3, %v4243_v7  ;;  %8142 = vmatpush1.bf16.msra.mxu0 %v11068_v54  ;;  %v4343_v34 = vmul.f32 0.01, %v4325_v9  ;;  %v11115_v54 = vld [vmem:[%s15549_s3 + $0x39c] ss:$24 sps:$4 sm:$0xff]   ;;  %v11113_v61 = vld [vmem:[%s15549_s3 + $0x398] ss:$24 sps:$4 sm:$0xff]  }
 0x308   :  { %v4287_v50 = vpop.f32.mrf.mxu0  ;;  %8143 = vmatprep.subr.bf16.mxu0 %v11076_v53  ;;  %v11121_v53 = vld [vmem:[%s15549_s3 + $0x36c] ss:$24 sps:$4 sm:$0xff]   ;;  %v11116_v7 = vld [vmem:[%s15549_s3 + $0x2a8] ss:$24 sps:$4 sm:$0xff]   ;;  %v11124_v2 = vld [vmem:[%s15549_s3 + $0x27c] ss:$24 sps:$4 sm:$0xff]  }
 0x309   :  { %v4329_v15 = vadd.f32 %v4328_v6, %v4286_v13  ;;  %v4288_v22 = vadd.f32 %v4287_v50, %v4245_v4  ;;  %v4330_v32 = vpop.f32.mrf.mxu1  ;;  %v4344_v49 = vmul.f32 0.01, %v4327_v39  ;;  %v4367_v26 = vmax.f32 %v4325_v9, %v4343_v34  ;;  %v11119_v3 = vld [vmem:[%s15549_s3 + $0x368] ss:$24 sps:$4 sm:$0xff]   ;;  %v11127_v6 = vld [vmem:[%s15549_s3 + $0x33c] ss:$24 sps:$4 sm:$0xff]  }
 0x30a   :  { %v11122_v4 = vld [vmem:[%s15549_s3 + $0x278] ss:$24 sps:$4 sm:$0xff]   ;;  %v11128_v9 = vld [vmem:[%s15549_s3 + $0x248] ss:$24 sps:$4 sm:$0xff]   ;;  %v11136_v50 = vld [vmem:[%s15549_s3 + $0x21c] ss:$24 sps:$4 sm:$0xff]  }
 0x30b   :  { %v4355_v19 = vmul.f32 0.01, %v4329_v15  ;;  %v4331_v41 = vadd.f32 %v4330_v32, %v4288_v22  ;;  %8144 = vmatpush1.bf16.msra.mxu0 %v11074_v8  ;;  %v4368_v11 = vmax.f32 %v4327_v39, %v4344_v49  ;;  %v11130_v39 = vld [vmem:[%s15549_s3 + $0x24c] ss:$24 sps:$4 sm:$0xff]   ;;  %v11125_v13 = vld [vmem:[%s15549_s3 + $0x338] ss:$24 sps:$4 sm:$0xff]  }
 0x30c   :  { %8145 = vmatprep.subr.bf16.mxu0 %v11082_v14  ;;  %v11133_v8 = vld [vmem:[%s15549_s3 + $0x30c] ss:$24 sps:$4 sm:$0xff]   ;;  %v11131_v14 = vld [vmem:[%s15549_s3 + $0x308] ss:$24 sps:$4 sm:$0xff]   ;;  %v11134_v22 = vld [vmem:[%s15549_s3 + $0x218] ss:$24 sps:$4 sm:$0xff]  }
 0x30d   :  { %v4356_v52 = vmul.f32 0.01, %v4331_v41  ;;  %v4379_v25 = vmax.f32 %v4329_v15, %v4355_v19  ;;  %v11139_v15 = vld [vmem:[%s15549_s3 + $0x5dc] ss:$24 sps:$4 sm:$0xff]   ;;  %v11142_v32 = vld [vmem:[%s15549_s3 + $0x1ec] ss:$24 sps:$4 sm:$0xff]  }
 0x30e   :  { %v11137_v49 = vld [vmem:[%s15549_s3 + $0x5d8] ss:$24 sps:$4 sm:$0xff]   ;;  %v11145_v19 = vld [vmem:[%s15549_s3 + $0x5ac] ss:$24 sps:$4 sm:$0xff]   ;;  %v11143_v34 = vld [vmem:[%s15549_s3 + $0x5a8] ss:$24 sps:$4 sm:$0xff]  }
 0x30f   :  { %v4380_v56 = vmax.f32 %v4331_v41, %v4356_v52  ;;  %8146 = vmatpush1.bf16.msra.mxu0 %v11080_v20  ;;  %v14371_v36 = vpack.c.bf16 %v4379_v25, %v4367_v26  ;;  %v11140_v41 = vld [vmem:[%s15549_s3 + $0x1e8] ss:$24 sps:$4 sm:$0xff]   ;;  %v11148_v20 = vld [vmem:[%s15549_s3 + $0x1bc] ss:$24 sps:$4 sm:$0xff]   ;;  %v11146_v52 = vld [vmem:[%s15549_s3 + $0x1b8] ss:$24 sps:$4 sm:$0xff]  }
 0x310   :  { %8147 = vmatprep.subr.bf16.mxu0 %v11088_v59  ;;  %v11151_v59 = vld [vmem:[%s15549_s3 + $0x57c] ss:$24 sps:$4 sm:$0xff]   ;;  %v11154_v25 = vld [vmem:[%s15549_s3 + $0x18c] ss:$24 sps:$4 sm:$0xff]  }
 0x311   :  { %v14366_v35 = vpack.c.bf16 %v4380_v56, %v4368_v11  ;;  %v11149_v11 = vld [vmem:[%s15549_s3 + $0x578] ss:$24 sps:$4 sm:$0xff]   ;;  %v11157_v56 = vld [vmem:[%s15549_s3 + $0x54c] ss:$24 sps:$4 sm:$0xff]   ;;  %v11160_v26 = vld [vmem:[%s15549_s3 + $0x75c] ss:$24 sps:$4 sm:$0xff]  }
 0x313   :  { %8128 = vmatprep.mubr.bf16.mxu1 %v14366_v35  ;;  %8148 = vmatpush1.bf16.msra.mxu0 %v11086_v12  ;;  %v11152_v12 = vld [vmem:[%s15549_s3 + $0x188] ss:$24 sps:$4 sm:$0xff]  }
 0x314   :  { %8129 = vmatmul.mubr.bf16.vlgmr.msra.gmra.mxu1 %v14371_v36  ;;  %8149 = vmatprep.subr.bf16.mxu0 %v11094_v28  ;;  %v11155_v28 = vld [vmem:[%s15549_s3 + $0x548] ss:$24 sps:$4 sm:$0xff]  }
 0x315   :  { %8183 = vmatpush1.bf16.msra.mxu1 %v11089_v27  ;;  %8214 = vmatprep.mubr.bf16.mxu1 %v13701_v5  ;;  %v11163_v27 = vld [vmem:[%s15549_s3 + $0x51c] ss:$24 sps:$4 sm:$0xff]  }
 0x316   :  { %8184 = vmatprep.subr.bf16.mxu1 %v11097_v40  ;;  %v11158_v40 = vld [vmem:[%s15549_s3 + $0x758] ss:$24 sps:$4 sm:$0xff]  }
 0x317   :  { %8150 = vmatpush1.bf16.msra.mxu0 %v11092_v60  ;;  %v11166_v60 = vld [vmem:[%s15549_s3 + $0x72c] ss:$24 sps:$4 sm:$0xff]  }
 0x318   :  { %8151 = vmatprep.subr.bf16.mxu0 %v11100_v47  ;;  %v11161_v47 = vld [vmem:[%s15549_s3 + $0x518] ss:$24 sps:$4 sm:$0xff]  }
 0x319   :  { %8185 = vmatpush1.bf16.msra.mxu1 %v11095_v21  ;;  %v11169_v21 = vld [vmem:[%s15549_s3 + $0x4ec] ss:$24 sps:$4 sm:$0xff]  }
 0x31a   :  { %8186 = vmatprep.subr.bf16.mxu1 %v11103_v33  ;;  %v11164_v33 = vld [vmem:[%s15549_s3 + $0x728] ss:$24 sps:$4 sm:$0xff]  }
 0x31b   :  { %8152 = vmatpush1.bf16.msra.mxu0 %v11098_v45  ;;  %v11172_v45 = vld [vmem:[%s15549_s3 + $0x6fc] ss:$24 sps:$4 sm:$0xff]  }
 0x31c   :  { %8153 = vmatprep.subr.bf16.mxu0 %v11106_v55  ;;  %v11167_v55 = vld [vmem:[%s15549_s3 + $0x4e8] ss:$24 sps:$4 sm:$0xff]  }
 0x31d   :  { %8187 = vmatpush1.bf16.msra.mxu1 %v11101_v23  ;;  %v11175_v23 = vld [vmem:[%s15549_s3 + $0x4bc] ss:$24 sps:$4 sm:$0xff]  }
 0x31e   :  { %8188 = vmatprep.subr.bf16.mxu1 %v11109_v46  ;;  %v11170_v46 = vld [vmem:[%s15549_s3 + $0x6f8] ss:$24 sps:$4 sm:$0xff]  }
 0x31f   :  { %8154 = vmatpush1.bf16.msra.mxu0 %v11104_v48  ;;  %v11178_v48 = vld [vmem:[%s15549_s3 + $0x6cc] ss:$24 sps:$4 sm:$0xff]  }
 0x320   :  { %8155 = vmatprep.subr.bf16.mxu0 %v11112_v0  ;;  %v11173_v0 = vld [vmem:[%s15549_s3 + $0x4b8] ss:$24 sps:$4 sm:$0xff]  }
 0x321   :  { %8189 = vmatpush1.bf16.msra.mxu1 %v11107_v18  ;;  %v11181_v18 = vld [vmem:[%s15549_s3 + $0x48c] ss:$24 sps:$4 sm:$0xff]  }
 0x322   :  { %8190 = vmatprep.subr.bf16.mxu1 %v11115_v54  ;;  %v11176_v54 = vld [vmem:[%s15549_s3 + $0x6c8] ss:$24 sps:$4 sm:$0xff]  }
 0x323   :  { %8156 = vmatpush2.bf16.msra.mxu0 %v11110_v58  ;;  %v11184_v58 = vld [vmem:[%s15549_s3 + $0x69c] ss:$24 sps:$4 sm:$0xff]  }
 0x324   :  { %8157 = vmatprep.subr.bf16.mxu0 %v11118_v42  ;;  %v11179_v42 = vld [vmem:[%s15549_s3 + $0x488] ss:$24 sps:$4 sm:$0xff]  }
 0x325   :  { %8191 = vmatpush1.bf16.msra.mxu1 %v11113_v61  ;;  %v11187_v61 = vld [vmem:[%s15549_s3 + $0xa5c] ss:$24 sps:$4 sm:$0xff]  }
 0x326   :  { %8192 = vmatprep.subr.bf16.mxu1 %v11121_v53  ;;  %v11182_v53 = vld [vmem:[%s15549_s3 + $0x698] ss:$24 sps:$4 sm:$0xff]  }
 0x327   :  { %8158 = vmatpush2.bf16.msra.mxu0 %v11116_v7  ;;  %v11190_v7 = vld [vmem:[%s15549_s3 + $0x66c] ss:$24 sps:$4 sm:$0xff]  }
 0x328   :  { %8159 = vmatprep.subr.bf16.mxu0 %v11124_v2  ;;  %v11185_v2 = vld [vmem:[%s15549_s3 + $0xa58] ss:$24 sps:$4 sm:$0xff]  }
 0x329   :  { %8193 = vmatpush1.bf16.msra.mxu1 %v11119_v3  ;;  %v11193_v3 = vld [vmem:[%s15549_s3 + $0xa2c] ss:$24 sps:$4 sm:$0xff]  }
 0x32a   :  { %8194 = vmatprep.subr.bf16.mxu1 %v11127_v6  ;;  %v11188_v6 = vld [vmem:[%s15549_s3 + $0x668] ss:$24 sps:$4 sm:$0xff]  }
 0x32b   :  { %8160 = vmatpush2.bf16.msra.mxu0 %v11122_v4  ;;  %v11196_v4 = vld [vmem:[%s15549_s3 + $0x63c] ss:$24 sps:$4 sm:$0xff]  }
 0x32c   :  { %8161 = vmatprep.subr.bf16.mxu0 %v11130_v39  ;;  %v11191_v39 = vld [vmem:[%s15549_s3 + $0xa28] ss:$24 sps:$4 sm:$0xff]  }
 0x32d   :  { %8195 = vmatpush1.bf16.msra.mxu1 %v11125_v13  ;;  %v11199_v13 = vld [vmem:[%s15549_s3 + $0x9fc] ss:$24 sps:$4 sm:$0xff]  }
 0x32e   :  { %8196 = vmatprep.subr.bf16.mxu1 %v11133_v8  ;;  %v11194_v8 = vld [vmem:[%s15549_s3 + $0x638] ss:$24 sps:$4 sm:$0xff]  }
 0x32f   :  { %8162 = vmatpush2.bf16.msra.mxu0 %v11128_v9  ;;  %v11202_v9 = vld [vmem:[%s15549_s3 + $0x60c] ss:$24 sps:$4 sm:$0xff]  }
 0x330   :  { %8163 = vmatprep.subr.bf16.mxu0 %v11136_v50  ;;  %v11197_v50 = vld [vmem:[%s15549_s3 + $0x9f8] ss:$24 sps:$4 sm:$0xff]  }
 0x331   :  { %8197 = vmatpush1.bf16.msra.mxu1 %v11131_v14  ;;  %v11205_v14 = vld [vmem:[%s15549_s3 + $0x9cc] ss:$24 sps:$4 sm:$0xff]  }
 0x332   :  { %8198 = vmatprep.subr.bf16.mxu1 %v11139_v15  ;;  %v11200_v15 = vld [vmem:[%s15549_s3 + $0x608] ss:$24 sps:$4 sm:$0xff]  }
 0x333   :  { %8164 = vmatpush2.bf16.msra.mxu0 %v11134_v22  ;;  %v11208_v22 = vld [vmem:[%s15549_s3 + $0x8dc] ss:$24 sps:$4 sm:$0xff]  }
 0x334   :  { %8165 = vmatprep.subr.bf16.mxu0 %v11142_v32  ;;  %v11203_v32 = vld [vmem:[%s15549_s3 + $0x9c8] ss:$24 sps:$4 sm:$0xff]  }
 0x335   :  { %8199 = vmatpush2.bf16.msra.mxu1 %v11137_v49  ;;  %v11211_v49 = vld [vmem:[%s15549_s3 + $0x99c] ss:$24 sps:$4 sm:$0xff]  }
 0x336   :  { %8200 = vmatprep.subr.bf16.mxu1 %v11145_v19  ;;  %v11206_v19 = vld [vmem:[%s15549_s3 + $0x8d8] ss:$24 sps:$4 sm:$0xff]  }
 0x337   :  { %8166 = vmatpush2.bf16.msra.mxu0 %v11140_v41  ;;  %v11214_v41 = vld [vmem:[%s15549_s3 + $0x8ac] ss:$24 sps:$4 sm:$0xff]  }
 0x338   :  { %8167 = vmatprep.subr.bf16.mxu0 %v11148_v20  ;;  %v11209_v20 = vld [vmem:[%s15549_s3 + $0x998] ss:$24 sps:$4 sm:$0xff]  }
 0x339   :  { %8201 = vmatpush2.bf16.msra.mxu1 %v11143_v34  ;;  %v11217_v34 = vld [vmem:[%s15549_s3 + $0x96c] ss:$24 sps:$4 sm:$0xff]  }
 0x33a   :  { %8202 = vmatprep.subr.bf16.mxu1 %v11151_v59  ;;  %v11212_v59 = vld [vmem:[%s15549_s3 + $0x8a8] ss:$24 sps:$4 sm:$0xff]  }
 0x33b   :  { %8168 = vmatpush2.bf16.msra.mxu0 %v11146_v52  ;;  %v11220_v52 = vld [vmem:[%s15549_s3 + $0x87c] ss:$24 sps:$4 sm:$0xff]  }
 0x33c   :  { %8169 = vmatprep.subr.bf16.mxu0 %v11154_v25  ;;  %v11215_v25 = vld [vmem:[%s15549_s3 + $0x968] ss:$24 sps:$4 sm:$0xff]  }
 0x33d   :  { %8203 = vmatpush2.bf16.msra.mxu1 %v11149_v11  ;;  %v11223_v11 = vld [vmem:[%s15549_s3 + $0x93c] ss:$24 sps:$4 sm:$0xff]  }
 0x33e   :  { %8204 = vmatprep.subr.bf16.mxu1 %v11157_v56  ;;  %v11218_v56 = vld [vmem:[%s15549_s3 + $0x878] ss:$24 sps:$4 sm:$0xff]  }
 0x33f   :  { %8170 = vmatpush2.bf16.msra.mxu0 %v11152_v12  ;;  %v11226_v12 = vld [vmem:[%s15549_s3 + $0x84c] ss:$24 sps:$4 sm:$0xff]  }
 0x340   :  { %8225 = vmatprep.subr.bf16.mxu0 %v11160_v26  ;;  %v11221_v26 = vld [vmem:[%s15549_s3 + $0x938] ss:$24 sps:$4 sm:$0xff]  }
 0x341   :  { %8205 = vmatpush2.bf16.msra.mxu1 %v11155_v28  ;;  %v11229_v28 = vld [vmem:[%s15549_s3 + $0x90c] ss:$24 sps:$4 sm:$0xff]  }
 0x342   :  { %8172 = vmatmul.mubr.bf16.vlgmr.msra.gmra.mxu0 %v12863_v29  ;;  %8206 = vmatprep.subr.bf16.mxu1 %v11163_v27  ;;  %v11224_v27 = vld [vmem:[%s15549_s3 + $0x848] ss:$24 sps:$4 sm:$0xff]  }
 0x343   :  { %8226 = vmatpush1.bf16.msra.mxu0 %v11158_v40  ;;  %8257 = vmatprep.mubr.bf16.mxu0 %v13914_v51  ;;  %v11232_v40 = vld [vmem:[%s15549_s3 + $0x81c] ss:$24 sps:$4 sm:$0xff]  }
 0x344   :  { %8227 = vmatprep.subr.bf16.mxu0 %v11166_v60  ;;  %v11227_v60 = vld [vmem:[%s15549_s3 + $0x908] ss:$24 sps:$4 sm:$0xff]  }
 0x345   :  { %8207 = vmatpush2.bf16.msra.mxu1 %v11161_v47  ;;  %v11235_v47 = vld [vmem:[%s15549_s3 + $0xbdc] ss:$24 sps:$4 sm:$0xff]  }
 0x346   :  { %8208 = vmatprep.subr.bf16.mxu1 %v11169_v21  ;;  %v11230_v21 = vld [vmem:[%s15549_s3 + $0x818] ss:$24 sps:$4 sm:$0xff]  }
 0x347   :  { %8228 = vmatpush1.bf16.msra.mxu0 %v11164_v33  ;;  %v11238_v33 = vld [vmem:[%s15549_s3 + $0x7ec] ss:$24 sps:$4 sm:$0xff]  }
 0x348   :  { %8229 = vmatprep.subr.bf16.mxu0 %v11172_v45  ;;  %v11233_v45 = vld [vmem:[%s15549_s3 + $0xbd8] ss:$24 sps:$4 sm:$0xff]  }
 0x349   :  { %8209 = vmatpush2.bf16.msra.mxu1 %v11167_v55  ;;  %v11241_v55 = vld [vmem:[%s15549_s3 + $0xbac] ss:$24 sps:$4 sm:$0xff]  }
 0x34a   :  { %8210 = vmatprep.subr.bf16.mxu1 %v11175_v23  ;;  %v11236_v23 = vld [vmem:[%s15549_s3 + $0x7e8] ss:$24 sps:$4 sm:$0xff]  }
 0x34b   :  { %8230 = vmatpush1.bf16.msra.mxu0 %v11170_v46  ;;  %v11244_v46 = vld [vmem:[%s15549_s3 + $0x7bc] ss:$24 sps:$4 sm:$0xff]  }
 0x34c   :  { %8231 = vmatprep.subr.bf16.mxu0 %v11178_v48  ;;  %v11239_v48 = vld [vmem:[%s15549_s3 + $0xba8] ss:$24 sps:$4 sm:$0xff]  }
 0x34d   :  { %8211 = vmatpush2.bf16.msra.mxu1 %v11173_v0  ;;  %v11247_v0 = vld [vmem:[%s15549_s3 + $0xb7c] ss:$24 sps:$4 sm:$0xff]  }
 0x34e   :  { %8212 = vmatprep.subr.bf16.mxu1 %v11181_v18  ;;  %v11242_v18 = vld [vmem:[%s15549_s3 + $0x7b8] ss:$24 sps:$4 sm:$0xff]  }
 0x34f   :  { %8232 = vmatpush1.bf16.msra.mxu0 %v11176_v54  ;;  %v11250_v54 = vld [vmem:[%s15549_s3 + $0x78c] ss:$24 sps:$4 sm:$0xff]  }
 0x350   :  { %8233 = vmatprep.subr.bf16.mxu0 %v11184_v58  ;;  %v11245_v58 = vld [vmem:[%s15549_s3 + $0xb78] ss:$24 sps:$4 sm:$0xff]  }
 0x351   :  { %8213 = vmatpush2.bf16.msra.mxu1 %v11179_v42  ;;  %v11253_v42 = vld [vmem:[%s15549_s3 + $0xb4c] ss:$24 sps:$4 sm:$0xff]  }
 0x352   :  { %8268 = vmatprep.subr.bf16.mxu1 %v11187_v61  ;;  %v11248_v61 = vld [vmem:[%s15549_s3 + $0x788] ss:$24 sps:$4 sm:$0xff]  }
 0x353   :  { %8234 = vmatpush1.bf16.msra.mxu0 %v11182_v53  ;;  %v11256_v53 = vld [vmem:[%s15549_s3 + $0xd5c] ss:$24 sps:$4 sm:$0xff]  }
 0x354   :  { %8215 = vmatmul.mubr.bf16.vlgmr.msra.gmra.mxu1 %v13083_v17  ;;  %8235 = vmatprep.subr.bf16.mxu0 %v11190_v7  ;;  %v11251_v7 = vld [vmem:[%s15549_s3 + $0xb48] ss:$24 sps:$4 sm:$0xff]  }
 0x355   :  { %8269 = vmatpush1.bf16.msra.mxu1 %v11185_v2  ;;  %8300 = vmatprep.mubr.bf16.mxu1 %v13920_v16  ;;  %v11259_v2 = vld [vmem:[%s15549_s3 + $0xb1c] ss:$24 sps:$4 sm:$0xff]  }
 0x356   :  { %8270 = vmatprep.subr.bf16.mxu1 %v11193_v3  ;;  %v11254_v3 = vld [vmem:[%s15549_s3 + $0xd58] ss:$24 sps:$4 sm:$0xff]  }
 0x357   :  { %8236 = vmatpush1.bf16.msra.mxu0 %v11188_v6  ;;  %v11262_v6 = vld [vmem:[%s15549_s3 + $0xd2c] ss:$24 sps:$4 sm:$0xff]  }
 0x358   :  { %8237 = vmatprep.subr.bf16.mxu0 %v11196_v4  ;;  %v11257_v4 = vld [vmem:[%s15549_s3 + $0xb18] ss:$24 sps:$4 sm:$0xff]  }
 0x359   :  { %8271 = vmatpush1.bf16.msra.mxu1 %v11191_v39  ;;  %v11265_v39 = vld [vmem:[%s15549_s3 + $0xaec] ss:$24 sps:$4 sm:$0xff]  }
 0x35a   :  { %8272 = vmatprep.subr.bf16.mxu1 %v11199_v13  ;;  %v11260_v13 = vld [vmem:[%s15549_s3 + $0xd28] ss:$24 sps:$4 sm:$0xff]  }
 0x35b   :  { %8238 = vmatpush1.bf16.msra.mxu0 %v11194_v8  ;;  %v11268_v8 = vld [vmem:[%s15549_s3 + $0xcfc] ss:$24 sps:$4 sm:$0xff]  }
 0x35c   :  { %8239 = vmatprep.subr.bf16.mxu0 %v11202_v9  ;;  %v11263_v9 = vld [vmem:[%s15549_s3 + $0xae8] ss:$24 sps:$4 sm:$0xff]  }
 0x35d   :  { %8273 = vmatpush1.bf16.msra.mxu1 %v11197_v50  ;;  %v11271_v50 = vld [vmem:[%s15549_s3 + $0xabc] ss:$24 sps:$4 sm:$0xff]  }
 0x35e   :  { %8274 = vmatprep.subr.bf16.mxu1 %v11205_v14  ;;  %v11266_v14 = vld [vmem:[%s15549_s3 + $0xcf8] ss:$24 sps:$4 sm:$0xff]  }
 0x35f   :  { %8240 = vmatpush1.bf16.msra.mxu0 %v11200_v15  ;;  %v11274_v15 = vld [vmem:[%s15549_s3 + $0xccc] ss:$24 sps:$4 sm:$0xff]  }
 0x360   :  { %8241 = vmatprep.subr.bf16.mxu0 %v11208_v22  ;;  %v11269_v22 = vld [vmem:[%s15549_s3 + $0xab8] ss:$24 sps:$4 sm:$0xff]  }
 0x361   :  { %8275 = vmatpush1.bf16.msra.mxu1 %v11203_v32  ;;  %v11277_v32 = vld [vmem:[%s15549_s3 + $0xa8c] ss:$24 sps:$4 sm:$0xff]  }
 0x362   :  { %8276 = vmatprep.subr.bf16.mxu1 %v11211_v49  ;;  %v11272_v49 = vld [vmem:[%s15549_s3 + $0xcc8] ss:$24 sps:$4 sm:$0xff]  }
 0x363   :  { %8242 = vmatpush2.bf16.msra.mxu0 %v11206_v19  ;;  %v11280_v19 = vld [vmem:[%s15549_s3 + $0xc9c] ss:$24 sps:$4 sm:$0xff]  }
 0x364   :  { %8243 = vmatprep.subr.bf16.mxu0 %v11214_v41  ;;  %v11275_v41 = vld [vmem:[%s15549_s3 + $0xa88] ss:$24 sps:$4 sm:$0xff]  }
 0x365   :  { %8277 = vmatpush1.bf16.msra.mxu1 %v11209_v20  ;;  %v11283_v20 = vld [vmem:[%s15549_s3 + $0x105c] ss:$24 sps:$4 sm:$0xff]  }
 0x366   :  { %8278 = vmatprep.subr.bf16.mxu1 %v11217_v34  ;;  %v11278_v34 = vld [vmem:[%s15549_s3 + $0xc98] ss:$24 sps:$4 sm:$0xff]  }
 0x367   :  { %8244 = vmatpush2.bf16.msra.mxu0 %v11212_v59  ;;  %v11286_v59 = vld [vmem:[%s15549_s3 + $0xc6c] ss:$24 sps:$4 sm:$0xff]  }
 0x368   :  { %8245 = vmatprep.subr.bf16.mxu0 %v11220_v52  ;;  %v11281_v52 = vld [vmem:[%s15549_s3 + $0x1058] ss:$24 sps:$4 sm:$0xff]  }
 0x369   :  { %8279 = vmatpush1.bf16.msra.mxu1 %v11215_v25  ;;  %v11289_v25 = vld [vmem:[%s15549_s3 + $0x102c] ss:$24 sps:$4 sm:$0xff]  }
 0x36a   :  { %8280 = vmatprep.subr.bf16.mxu1 %v11223_v11  ;;  %v11284_v11 = vld [vmem:[%s15549_s3 + $0xc68] ss:$24 sps:$4 sm:$0xff]  }
 0x36b   :  { %8246 = vmatpush2.bf16.msra.mxu0 %v11218_v56  ;;  %v11292_v56 = vld [vmem:[%s15549_s3 + $0xc3c] ss:$24 sps:$4 sm:$0xff]  }
 0x36c   :  { %8247 = vmatprep.subr.bf16.mxu0 %v11226_v12  ;;  %v11287_v12 = vld [vmem:[%s15549_s3 + $0x1028] ss:$24 sps:$4 sm:$0xff]  }
 0x36d   :  { %8281 = vmatpush1.bf16.msra.mxu1 %v11221_v26  ;;  %v11295_v26 = vld [vmem:[%s15549_s3 + $0xffc] ss:$24 sps:$4 sm:$0xff]  }
 0x36e   :  { %8282 = vmatprep.subr.bf16.mxu1 %v11229_v28  ;;  %v11290_v28 = vld [vmem:[%s15549_s3 + $0xc38] ss:$24 sps:$4 sm:$0xff]  }
 0x36f   :  { %8248 = vmatpush2.bf16.msra.mxu0 %v11224_v27  ;;  %v11298_v27 = vld [vmem:[%s15549_s3 + $0xc0c] ss:$24 sps:$4 sm:$0xff]  }
 0x370   :  { %8249 = vmatprep.subr.bf16.mxu0 %v11232_v40  ;;  %v11293_v40 = vld [vmem:[%s15549_s3 + $0xff8] ss:$24 sps:$4 sm:$0xff]  }
 0x371   :  { %8283 = vmatpush1.bf16.msra.mxu1 %v11227_v60  ;;  %v11301_v60 = vld [vmem:[%s15549_s3 + $0xfcc] ss:$24 sps:$4 sm:$0xff]  }
 0x372   :  { %8284 = vmatprep.subr.bf16.mxu1 %v11235_v47  ;;  %v11296_v47 = vld [vmem:[%s15549_s3 + $0xc08] ss:$24 sps:$4 sm:$0xff]  }
 0x373   :  { %8250 = vmatpush2.bf16.msra.mxu0 %v11230_v21  ;;  %v11304_v21 = vld [vmem:[%s15549_s3 + $0xedc] ss:$24 sps:$4 sm:$0xff]  }
 0x374   :  { %8251 = vmatprep.subr.bf16.mxu0 %v11238_v33  ;;  %v11299_v33 = vld [vmem:[%s15549_s3 + $0xfc8] ss:$24 sps:$4 sm:$0xff]  }
 0x375   :  { %8285 = vmatpush2.bf16.msra.mxu1 %v11233_v45  ;;  %v11307_v45 = vld [vmem:[%s15549_s3 + $0xf9c] ss:$24 sps:$4 sm:$0xff]  }
 0x376   :  { %8286 = vmatprep.subr.bf16.mxu1 %v11241_v55  ;;  %v11302_v55 = vld [vmem:[%s15549_s3 + $0xed8] ss:$24 sps:$4 sm:$0xff]  }
 0x377   :  { %8252 = vmatpush2.bf16.msra.mxu0 %v11236_v23  ;;  %v11310_v23 = vld [vmem:[%s15549_s3 + $0xeac] ss:$24 sps:$4 sm:$0xff]  }
 0x378   :  { %8253 = vmatprep.subr.bf16.mxu0 %v11244_v46  ;;  %v11305_v46 = vld [vmem:[%s15549_s3 + $0xf98] ss:$24 sps:$4 sm:$0xff]  }
 0x379   :  { %8287 = vmatpush2.bf16.msra.mxu1 %v11239_v48  ;;  %v11313_v48 = vld [vmem:[%s15549_s3 + $0xf6c] ss:$24 sps:$4 sm:$0xff]  }
 0x37a   :  { %8288 = vmatprep.subr.bf16.mxu1 %v11247_v0  ;;  %v11308_v0 = vld [vmem:[%s15549_s3 + $0xea8] ss:$24 sps:$4 sm:$0xff]  }
 0x37b   :  { %8254 = vmatpush2.bf16.msra.mxu0 %v11242_v18  ;;  %v11316_v18 = vld [vmem:[%s15549_s3 + $0xe7c] ss:$24 sps:$4 sm:$0xff]  }
 0x37c   :  { %8255 = vmatprep.subr.bf16.mxu0 %v11250_v54  ;;  %v11311_v54 = vld [vmem:[%s15549_s3 + $0xf68] ss:$24 sps:$4 sm:$0xff]  }
 0x37d   :  { %8289 = vmatpush2.bf16.msra.mxu1 %v11245_v58  ;;  %v11319_v58 = vld [vmem:[%s15549_s3 + $0xf3c] ss:$24 sps:$4 sm:$0xff]  }
 0x37e   :  { %8290 = vmatprep.subr.bf16.mxu1 %v11253_v42  ;;  %v11314_v42 = vld [vmem:[%s15549_s3 + $0xe78] ss:$24 sps:$4 sm:$0xff]  }
 0x37f   :  { %8256 = vmatpush2.bf16.msra.mxu0 %v11248_v61  ;;  %v11322_v61 = vld [vmem:[%s15549_s3 + $0xe4c] ss:$24 sps:$4 sm:$0xff]  }
 0x380   :  { %8311 = vmatprep.subr.bf16.mxu0 %v11256_v53  ;;  %v11317_v53 = vld [vmem:[%s15549_s3 + $0xf38] ss:$24 sps:$4 sm:$0xff]  }
 0x381   :  { %8291 = vmatpush2.bf16.msra.mxu1 %v11251_v7  ;;  %v11325_v7 = vld [vmem:[%s15549_s3 + $0xf0c] ss:$24 sps:$4 sm:$0xff]  }
 0x382   :  { %8258 = vmatmul.mubr.bf16.vlgmr.msra.gmra.mxu0 %v13499_v63  ;;  %8292 = vmatprep.subr.bf16.mxu1 %v11259_v2  ;;  %v11320_v2 = vld [vmem:[%s15549_s3 + $0xe48] ss:$24 sps:$4 sm:$0xff]  }
 0x383   :  { %8312 = vmatpush1.bf16.msra.mxu0 %v11254_v3  ;;  %8343 = vmatprep.mubr.bf16.mxu0 %v14173_v38  ;;  %v11328_v3 = vld [vmem:[%s15549_s3 + $0xe1c] ss:$24 sps:$4 sm:$0xff]  }
 0x384   :  { %8313 = vmatprep.subr.bf16.mxu0 %v11262_v6  ;;  %v11323_v6 = vld [vmem:[%s15549_s3 + $0xf08] ss:$24 sps:$4 sm:$0xff]  }
 0x385   :  { %8293 = vmatpush2.bf16.msra.mxu1 %v11257_v4  ;;  %v14852_v4 = vpop.f32.mrf.mxu0 }
 0x386   :  { %8294 = vmatprep.subr.bf16.mxu1 %v11265_v39  ;;  %v11331_v39 = vld [vmem:[%s15549_s3 + $0x11dc] ss:$24 sps:$4 sm:$0xff]  }
 0x387   :  { %8314 = vmatpush1.bf16.msra.mxu0 %v11260_v13  ;;  %v11326_v13 = vld [vmem:[%s15549_s3 + $0xe18] ss:$24 sps:$4 sm:$0xff]  }
 0x388   :  { %8315 = vmatprep.subr.bf16.mxu0 %v11268_v8  ;;  %v11334_v8 = vld [vmem:[%s15549_s3 + $0xdec] ss:$24 sps:$4 sm:$0xff]  }
 0x389   :  { %8295 = vmatpush2.bf16.msra.mxu1 %v11263_v9  ;;  %v11329_v9 = vld [vmem:[%s15549_s3 + $0x11d8] ss:$24 sps:$4 sm:$0xff]  }
 0x38a   :  { %8296 = vmatprep.subr.bf16.mxu1 %v11271_v50  ;;  %v14866_v50 = vpop.f32.mrf.mxu0 }
 0x38b   :  { %8316 = vmatpush1.bf16.msra.mxu0 %v11266_v14  ;;  %v11337_v14 = vld [vmem:[%s15549_s3 + $0x11ac] ss:$24 sps:$4 sm:$0xff]  }
 0x38c   :  { %8317 = vmatprep.subr.bf16.mxu0 %v11274_v15  ;;  %v11332_v15 = vld [vmem:[%s15549_s3 + $0xde8] ss:$24 sps:$4 sm:$0xff]  }
 0x38d   :  { %8297 = vmatpush2.bf16.msra.mxu1 %v11269_v22  ;;  %v11340_v22 = vld [vmem:[%s15549_s3 + $0xdbc] ss:$24 sps:$4 sm:$0xff]  }
 0x38e   :  { %8298 = vmatprep.subr.bf16.mxu1 %v11277_v32  ;;  %v11335_v32 = vld [vmem:[%s15549_s3 + $0x11a8] ss:$24 sps:$4 sm:$0xff]  }
 0x38f   :  { %8318 = vmatpush1.bf16.msra.mxu0 %v11272_v49  ;;  %v14880_v49 = vpop.f32.mrf.mxu0 }
 0x390   :  { %8319 = vmatprep.subr.bf16.mxu0 %v11280_v19  ;;  %v11343_v19 = vld [vmem:[%s15549_s3 + $0x117c] ss:$24 sps:$4 sm:$0xff]  }
 0x391   :  { %8299 = vmatpush2.bf16.msra.mxu1 %v11275_v41  ;;  %v11338_v41 = vld [vmem:[%s15549_s3 + $0xdb8] ss:$24 sps:$4 sm:$0xff]  }
 0x392   :  { %8354 = vmatprep.subr.bf16.mxu1 %v11283_v20  ;;  %v7958_v20 = vpop.f32.mrf.mxu1 }
 0x393   :  { %8320 = vmatpush1.bf16.msra.mxu0 %v11278_v34  ;;  %v11346_v34 = vld [vmem:[%s15549_s3 + $0xd8c] ss:$24 sps:$4 sm:$0xff]  }
 0x394   :  { %8301 = vmatmul.mubr.bf16.vlgmr.msra.gmra.mxu1 %v13751_v30  ;;  %8321 = vmatprep.subr.bf16.mxu0 %v11286_v59  ;;  %v11341_v59 = vld [vmem:[%s15549_s3 + $0x1178] ss:$24 sps:$4 sm:$0xff]  }
 0x395   :  { %8355 = vmatpush1.bf16.msra.mxu1 %v11281_v52  ;;  %8386 = vmatprep.mubr.bf16.mxu1 %v14366_v35  ;;  %v7921_v52 = vpop.f32.mrf.mxu0 }
 0x396   :  { %8356 = vmatprep.subr.bf16.mxu1 %v11289_v25  ;;  %v11349_v25 = vld [vmem:[%s15549_s3 + $0x114c] ss:$24 sps:$4 sm:$0xff]  }
 0x397   :  { %8322 = vmatpush1.bf16.msra.mxu0 %v11284_v11  ;;  %v11344_v11 = vld [vmem:[%s15549_s3 + $0xd88] ss:$24 sps:$4 sm:$0xff]  }
 0x398   :  { %8323 = vmatprep.subr.bf16.mxu0 %v11292_v56  ;;  %v7960_v56 = vpop.f32.mrf.mxu1 }
 0x399   :  { %8357 = vmatpush1.bf16.msra.mxu1 %v11287_v12  ;;  %v8001_v12 = vpop.f32.mrf.mxu0 }
 0x39a   :  { %8358 = vmatprep.subr.bf16.mxu1 %v11295_v26  ;;  %v11352_v26 = vld [vmem:[%s15549_s3 + $0x164] ss:$24 sps:$4 sm:$0xff]  }
 0x39b   :  { %8324 = vmatpush1.bf16.msra.mxu0 %v11290_v28  ;;  %v11347_v28 = vld [vmem:[%s15549_s3 + $0x1148] ss:$24 sps:$4 sm:$0xff]  }
 0x39c   :  { %8325 = vmatprep.subr.bf16.mxu0 %v11298_v27  ;;  %v11355_v27 = vld [vmem:[%s15549_s3 + $0x111c] ss:$24 sps:$4 sm:$0xff]  }
 0x39d   :  { %8359 = vmatpush1.bf16.msra.mxu1 %v11293_v40  ;;  %v11350_v40 = vld [vmem:[%s15549_s3 + $0x160] ss:$24 sps:$4 sm:$0xff]  }
 0x39e   :  { %8360 = vmatprep.subr.bf16.mxu1 %v11301_v60  ;;  %v14915_v60 = vld [vmem:[%s15550_s4] sm:$0x3f] }
 0x39f   :  { %8326 = vmatpush1.bf16.msra.mxu0 %v11296_v47  ;;  %v7962_v47 = vpop.f32.mrf.mxu1 }
 0x3a0   :  { %8327 = vmatprep.subr.bf16.mxu0 %v11304_v21  ;;  %v8003_v21 = vpop.f32.mrf.mxu0 }
 0x3a1   :  { %8361 = vmatpush1.bf16.msra.mxu1 %v11299_v33  ;;  %v11358_v33 = vld [vmem:[%s15549_s3 + $0x134] ss:$24 sps:$4 sm:$0xff]  }
 0x3a2   :  { %8362 = vmatprep.subr.bf16.mxu1 %v11307_v45  ;;  %v11353_v45 = vld [vmem:[%s15549_s3 + $0x1118] ss:$24 sps:$4 sm:$0xff]  }
 0x3a3   :  { %8328 = vmatpush2.bf16.msra.mxu0 %v11302_v55  ;;  %v11361_v55 = vld [vmem:[%s15549_s3 + $0x10ec] ss:$24 sps:$4 sm:$0xff]  }
 0x3a4   :  { %8329 = vmatprep.subr.bf16.mxu0 %v11310_v23  ;;  %v4974_v23 = vrot.slane %v14915_v60, %v12592_v37  ;;  %v11359_v37 = vld [vmem:[%s15549_s3 + $0x10e8] ss:$24 sps:$4 sm:$0xff]  }
 0x3a5   :  { %8363 = vmatpush1.bf16.msra.mxu1 %v11305_v46  ;;  %v11356_v46 = vld [vmem:[%s15549_s3 + $0x130] ss:$24 sps:$4 sm:$0xff]  }
 0x3a6   :  { %8364 = vmatprep.subr.bf16.mxu1 %v11313_v48  ;;  %v7964_v48 = vpop.f32.mrf.mxu1 }
 0x3a7   :  { %8330 = vmatpush2.bf16.msra.mxu0 %v11308_v0  ;;  %v8005_v0 = vpop.f32.mrf.mxu0 }
 0x3a8   :  { %8331 = vmatprep.subr.bf16.mxu0 %v11316_v18  ;;  %v11364_v18 = vld [vmem:[%s15549_s3 + $0x104] ss:$24 sps:$4 sm:$0xff]  }
 0x3a9   :  { %8365 = vmatpush1.bf16.msra.mxu1 %v11311_v54  ;;  %v4978_v54 = vrot.slane %v14915_v60, %v13580_v43  ;;  %v11370_v43 = vld [vmem:[%s15549_s3 + $0xd4] ss:$24 sps:$4 sm:$0xff]  }
 0x3aa   :  { %8366 = vmatprep.subr.bf16.mxu1 %v11319_v58  ;;  %v11367_v58 = vld [vmem:[%s15549_s3 + $0x10bc] ss:$24 sps:$4 sm:$0xff]  }
 0x3ab   :  { %8332 = vmatpush2.bf16.msra.mxu0 %v11314_v42  ;;  %v7916_v42 = vadd.f32 %v14852_v4, %v4974_v23  ;;  %v11373_v4 = vld [vmem:[%s15549_s3 + $0x108c] ss:$24 sps:$4 sm:$0xff]  }
 0x3ac   :  { %8333 = vmatprep.subr.bf16.mxu0 %v11322_v61  ;;  %v11362_v61 = vld [vmem:[%s15549_s3 + $0x100] ss:$24 sps:$4 sm:$0xff]  }
 0x3ad   :  { %8367 = vmatpush1.bf16.msra.mxu1 %v11317_v53  ;;  %v8007_v53 = vpop.f32.mrf.mxu0 }
 0x3ae   :  { %8368 = vmatprep.subr.bf16.mxu1 %v11325_v7  ;;  %v7918_v7 = vadd.f32 %v14866_v50, %v4978_v54 }
 0x3af   :  { %8334 = vmatpush2.bf16.msra.mxu0 %v11320_v2  ;;  %v11365_v2 = vld [vmem:[%s15549_s3 + $0x10b8] ss:$24 sps:$4 sm:$0xff]  }
 0x3b0   :  { %8335 = vmatprep.subr.bf16.mxu0 %v11328_v3  ;;  %v7961_v50 = vadd.f32 %v7960_v56, %v7918_v7  ;;  %v11377_v56 = vld [vmem:[%s15549_s3 + $0x460] ss:$24 sps:$4 sm:$0xff]  }
 0x3b1   :  { %8369 = vmatpush1.bf16.msra.mxu1 %v11323_v6 }
 0x3b2   :  { %8370 = vmatprep.subr.bf16.mxu1 %v11331_v39  ;;  %v7959_v39 = vadd.f32 %v7958_v20, %v7916_v42  ;;  %v8004_v20 = vadd.f32 %v8003_v21, %v7961_v50  ;;  %v11380_v21 = vld [vmem:[%s15549_s3 + $0x70] ss:$24 sps:$4 sm:$0xff]  }
 0x3b3   :  { %8336 = vmatpush2.bf16.msra.mxu0 %v11326_v13  ;;  %v7920_v13 = vadd.f32 %v14880_v49, %v4974_v23 }
 0x3b4   :  { %8337 = vmatprep.subr.bf16.mxu0 %v11334_v8  ;;  %v11368_v8 = vld [vmem:[%s15549_s3 + $0xd0] ss:$24 sps:$4 sm:$0xff]  }
 0x3b5   :  { %8371 = vmatpush2.bf16.msra.mxu1 %v11329_v9  ;;  %v11376_v9 = vld [vmem:[%s15549_s3 + $0xa4] ss:$24 sps:$4 sm:$0xff]  }
 0x3b6   :  { %8372 = vmatprep.subr.bf16.mxu1 %v11337_v14  ;;  %v7922_v14 = vadd.f32 %v7921_v52, %v4978_v54  ;;  %v11391_v54 = vld [vmem:[%s15549_s3 + $0x404] ss:$24 sps:$4 sm:$0xff]  }
 0x3b7   :  { %8338 = vmatpush2.bf16.msra.mxu0 %v11332_v15  ;;  %v8002_v15 = vadd.f32 %v8001_v12, %v7959_v39 }
 0x3b8   :  { %8339 = vmatprep.subr.bf16.mxu0 %v11340_v22  ;;  %v11371_v22 = vld [vmem:[%s15549_s3 + $0x1088] ss:$24 sps:$4 sm:$0xff]   ;;  %v7965_v52 = vadd.f32 %v7964_v48, %v7922_v14 }
 0x3b9   :  { %8373 = vmatpush2.bf16.msra.mxu1 %v11335_v32  ;;  %v11383_v48 = vld [vmem:[%s15549_s3 + $0x430] ss:$24 sps:$4 sm:$0xff]  }
 0x3ba   :  { %8374 = vmatprep.subr.bf16.mxu1 %v11343_v19  ;;  %v11379_v19 = vld [vmem:[%s15549_s3 + $0x464] ss:$24 sps:$4 sm:$0xff]   ;;  %v11395_v14 = vld [vmem:[%s15549_s3 + $0x3d0] ss:$24 sps:$4 sm:$0xff]  }
 0x3bb   :  { %8340 = vmatpush2.bf16.msra.mxu0 %v11338_v41  ;;  %v7963_v41 = vadd.f32 %v7962_v47, %v7920_v13 }
 0x3bc   :  { %8341 = vmatprep.subr.bf16.mxu0 %v11346_v34  ;;  %v11374_v34 = vld [vmem:[%s15549_s3 + $0xa0] ss:$24 sps:$4 sm:$0xff]  }
 0x3bd   :  { %8375 = vmatpush2.bf16.msra.mxu1 %v11341_v59  ;;  %v11382_v59 = vld [vmem:[%s15549_s3 + $0x74] ss:$24 sps:$4 sm:$0xff]  }
 0x3be   :  { %8376 = vmatprep.subr.bf16.mxu1 %v11349_v25 }
 0x3bf   :  { %8342 = vmatpush2.bf16.msra.mxu0 %v11344_v11  ;;  %v8006_v11 = vadd.f32 %v8005_v0, %v7963_v41  ;;  %v11404_v41 = vld [vmem:[%s15549_s3 + $0x2b0] ss:$24 sps:$4 sm:$0xff]  }
 0x3c0   :  { %8397 = vmatprep.subr.bf16.mxu0 %v11352_v26 }
 0x3c1   :  { %8377 = vmatpush2.bf16.msra.mxu1 %v11347_v28  ;;  %v11385_v28 = vld [vmem:[%s15549_s3 + $0x434] ss:$24 sps:$4 sm:$0xff]  }
 0x3c2   :  { %8344 = vmatmul.mubr.bf16.vlgmr.msra.gmra.mxu0 %v14335_v10  ;;  %8378 = vmatprep.subr.bf16.mxu1 %v11355_v27  ;;  %v8087_v6 = vpop.f32.mrf.mxu0 }
 0x3c3   :  { %8398 = vmatpush1.bf16.msra.mxu0 %v11350_v40  ;;  %8429 = vmatprep.mubr.bf16.mxu0 %v13694_v62  ;;  %v8044_v62 = vpop.f32.mrf.mxu1  ;;  %v8008_v40 = vadd.f32 %v8007_v53, %v7965_v52  ;;  %v11394_v53 = vld [vmem:[%s15549_s3 + $0x14] ss:$24 sps:$4 sm:$0xff]   ;;  %v11415_v52 = vld [vmem:[%s15549_s3 + $0x344] ss:$24 sps:$4 sm:$0xff]  }
 0x3c4   :  { %8399 = vmatprep.subr.bf16.mxu0 %v11358_v33  ;;  %v8089_v49 = vpop.f32.mrf.mxu0  ;;  %v8045_v25 = vadd.f32 %v8044_v62, %v8002_v15  ;;  %v11403_v15 = vld [vmem:[%s15549_s3 + $0x3a4] ss:$24 sps:$4 sm:$0xff]  }
 0x3c5   :  { %8379 = vmatpush2.bf16.msra.mxu1 %v11353_v45  ;;  %v8046_v3 = vpop.f32.mrf.mxu1  ;;  %v11388_v45 = vld [vmem:[%s15549_s3 + $0x44] ss:$24 sps:$4 sm:$0xff]  }
 0x3c6   :  { %8380 = vmatprep.subr.bf16.mxu1 %v11361_v55  ;;  %v8091_v26 = vpop.f32.mrf.mxu0  ;;  %v8047_v27 = vadd.f32 %v8046_v3, %v8004_v20  ;;  %v8088_v47 = vadd.f32 %v8087_v6, %v8045_v25  ;;  %v11389_v3 = vld [vmem:[%s15549_s3 + $0x400] ss:$24 sps:$4 sm:$0xff]   ;;  %v11412_v20 = vld [vmem:[%s15549_s3 + $0x284] ss:$24 sps:$4 sm:$0xff]  }
 0x3c7   :  { %8400 = vmatpush1.bf16.msra.mxu0 %v11356_v46  ;;  %v8048_v32 = vpop.f32.mrf.mxu1 }
 0x3c8   :  { %8401 = vmatprep.subr.bf16.mxu0 %v11364_v18  ;;  %v8049_v55 = vadd.f32 %v8048_v32, %v8006_v11  ;;  %v8090_v23 = vadd.f32 %v8089_v49, %v8047_v27  ;;  %v8093_v0 = vpop.f32.mrf.mxu0  ;;  %v11406_v32 = vld [vmem:[%s15549_s3 + $0x2b4] ss:$24 sps:$4 sm:$0xff]   ;;  %v11401_v49 = vld [vmem:[%s15549_s3 + $0x3a0] ss:$24 sps:$4 sm:$0xff]  }
 0x3c9   :  { %8381 = vmatpush2.bf16.msra.mxu1 %v11359_v37  ;;  %v8050_v12 = vpop.f32.mrf.mxu1  ;;  %v11410_v11 = vld [vmem:[%s15549_s3 + $0x280] ss:$24 sps:$4 sm:$0xff]  }
 0x3ca   :  { %8382 = vmatprep.subr.bf16.mxu1 %v11367_v58  ;;  %v8051_v37 = vadd.f32 %v8050_v12, %v8008_v40  ;;  %v8092_v62 = vadd.f32 %v8091_v26, %v8049_v55  ;;  %v11418_v12 = vld [vmem:[%s15549_s3 + $0x254] ss:$24 sps:$4 sm:$0xff]  }
 0x3cb   :  { %8402 = vmatpush1.bf16.msra.mxu0 %v11362_v61  ;;  %v11421_v40 = vld [vmem:[%s15549_s3 + $0x314] ss:$24 sps:$4 sm:$0xff]  }
 0x3cc   :  { %8403 = vmatprep.subr.bf16.mxu0 %v11370_v43  ;;  %v8094_v43 = vadd.f32 %v8093_v0, %v8051_v37  ;;  %v11430_v0 = vld [vmem:[%s15549_s3 + $0x1f4] ss:$24 sps:$4 sm:$0xff]   ;;  %v11428_v37 = vld [vmem:[%s15549_s3 + $0x1f0] ss:$24 sps:$4 sm:$0xff]  }
 0x3cd   :  { %8383 = vmatpush2.bf16.msra.mxu1 %v11365_v2 }
 0x3ce   :  { %8384 = vmatprep.subr.bf16.mxu1 %v11373_v4  ;;  %v11397_v4 = vld [vmem:[%s15549_s3 + $0x3d4] ss:$24 sps:$4 sm:$0xff]  }
 0x3cf   :  { %8404 = vmatpush1.bf16.msra.mxu0 %v11368_v8  ;;  %v11392_v8 = vld [vmem:[%s15549_s3 + $0x10] ss:$24 sps:$4 sm:$0xff]  }
 0x3d0   :  { %8405 = vmatprep.subr.bf16.mxu0 %v11376_v9  ;;  %v11400_v9 = vld [vmem:[%s15549_s3 + $0x2e4] ss:$24 sps:$4 sm:$0xff]  }
 0x3d1   :  { %8385 = vmatpush2.bf16.msra.mxu1 %v11371_v22  ;;  %v11398_v22 = vld [vmem:[%s15549_s3 + $0x2e0] ss:$24 sps:$4 sm:$0xff]  }
 0x3d2   :  { %8440 = vmatprep.subr.bf16.mxu1 %v11379_v19  ;;  %v11409_v19 = vld [vmem:[%s15549_s3 + $0x374] ss:$24 sps:$4 sm:$0xff]  }
 0x3d3   :  { %8406 = vmatpush1.bf16.msra.mxu0 %v11374_v34  ;;  %v11407_v34 = vld [vmem:[%s15549_s3 + $0x370] ss:$24 sps:$4 sm:$0xff]  }
 0x3d4   :  { %8387 = vmatmul.mubr.bf16.vlgmr.msra.gmra.mxu1 %v14371_v36  ;;  %v8130_v33 = vpop.f32.mrf.mxu1  ;;  %8407 = vmatprep.subr.bf16.mxu0 %v11382_v59 }
 0x3d5   :  { %v8131_v46 = vadd.f32 %v8130_v33, %v8088_v47  ;;  %8441 = vmatpush1.bf16.msra.mxu1 %v11377_v56  ;;  %8472 = vmatprep.mubr.bf16.mxu1 %v13701_v5  ;;  %v11386_v5 = vld [vmem:[%s15549_s3 + $0x40] ss:$24 sps:$4 sm:$0xff]  }
 0x3d6   :  { %v8132_v18 = vpop.f32.mrf.mxu1  ;;  %8442 = vmatprep.subr.bf16.mxu1 %v11385_v28  ;;  %v11413_v28 = vld [vmem:[%s15549_s3 + $0x340] ss:$24 sps:$4 sm:$0xff]  }
 0x3d7   :  { %v9907_v58 = vmul.f32 -1.442695, %v8131_v46  ;;  %v8133_v42 = vadd.f32 %v8132_v18, %v8090_v23  ;;  %8408 = vmatpush1.bf16.msra.mxu0 %v11380_v21  ;;  %v11416_v21 = vld [vmem:[%s15549_s3 + $0x250] ss:$24 sps:$4 sm:$0xff]   ;;  %v11427_v46 = vld [vmem:[%s15549_s3 + $0x5e4] ss:$24 sps:$4 sm:$0xff]  }
 0x3d8   :  { %v8134_v61 = vpop.f32.mrf.mxu1  ;;  %8409 = vmatprep.subr.bf16.mxu0 %v11388_v45  ;;  %v11424_v45 = vld [vmem:[%s15549_s3 + $0x224] ss:$24 sps:$4 sm:$0xff]   ;;  %v11419_v23 = vld [vmem:[%s15549_s3 + $0x310] ss:$24 sps:$4 sm:$0xff]   ;;  %v11425_v18 = vld [vmem:[%s15549_s3 + $0x5e0] ss:$24 sps:$4 sm:$0xff]  }
 0x3d9   :  { %11650 = vpow2.f32 %v9907_v58  ;;  %v9908_v7 = vmul.f32 -1.442695, %v8133_v42  ;;  %v8135_v2 = vadd.f32 %v8134_v61, %v8092_v62  ;;  %8443 = vmatpush1.bf16.msra.mxu1 %v11383_v48  ;;  %v11422_v48 = vld [vmem:[%s15549_s3 + $0x220] ss:$24 sps:$4 sm:$0xff]   ;;  %v11436_v62 = vld [vmem:[%s15549_s3 + $0x1c4] ss:$24 sps:$4 sm:$0xff]  }
 0x3da   :  { %v8136_v6 = vpop.f32.mrf.mxu1  ;;  %8444 = vmatprep.subr.bf16.mxu1 %v11391_v54  ;;  %v11433_v54 = vld [vmem:[%s15549_s3 + $0x5b4] ss:$24 sps:$4 sm:$0xff]   ;;  %v11431_v58 = vld [vmem:[%s15549_s3 + $0x5b0] ss:$24 sps:$4 sm:$0xff]   ;;  %v11434_v61 = vld [vmem:[%s15549_s3 + $0x1c0] ss:$24 sps:$4 sm:$0xff]  }
 0x3db   :  { %11652 = vpow2.f32 %v9908_v7  ;;  %v9913_v39 = vmul.f32 -1.442695, %v8135_v2  ;;  %v8137_v13 = vadd.f32 %v8136_v6, %v8094_v43  ;;  %8410 = vmatpush1.bf16.msra.mxu0 %v11386_v5  ;;  %v11439_v5 = vld [vmem:[%s15549_s3 + $0x584] ss:$24 sps:$4 sm:$0xff]   ;;  %v11442_v43 = vld [vmem:[%s15549_s3 + $0x194] ss:$24 sps:$4 sm:$0xff]  }
 0x3dc   :  { %8411 = vmatprep.subr.bf16.mxu0 %v11394_v53  ;;  %v11437_v7 = vld [vmem:[%s15549_s3 + $0x580] ss:$24 sps:$4 sm:$0xff]   ;;  %v11440_v6 = vld [vmem:[%s15549_s3 + $0x190] ss:$24 sps:$4 sm:$0xff]  }
 0x3dd   :  { %11654 = vpow2.f32 %v9913_v39  ;;  %v9914_v50 = vmul.f32 -1.442695, %v8137_v13  ;;  %8445 = vmatpush1.bf16.msra.mxu1 %v11389_v3  ;;  %v11445_v3 = vld [vmem:[%s15549_s3 + $0x554] ss:$24 sps:$4 sm:$0xff]   ;;  %v11448_v39 = vld [vmem:[%s15549_s3 + $0x764] ss:$24 sps:$4 sm:$0xff]  }
 0x3de   :  { %8446 = vmatprep.subr.bf16.mxu1 %v11397_v4  ;;  %v11443_v13 = vld [vmem:[%s15549_s3 + $0x550] ss:$24 sps:$4 sm:$0xff]  }
 0x3df   :  { %11656 = vpow2.f32 %v9914_v50  ;;  %8412 = vmatpush1.bf16.msra.mxu0 %v11392_v8  ;;  %v11451_v8 = vld [vmem:[%s15549_s3 + $0x524] ss:$24 sps:$4 sm:$0xff]   ;;  %v11454_v50 = vld [vmem:[%s15549_s3 + $0x734] ss:$24 sps:$4 sm:$0xff]  }
 0x3e0   :  { %8413 = vmatprep.subr.bf16.mxu0 %v11400_v9  ;;  %v11446_v9 = vld [vmem:[%s15549_s3 + $0x760] ss:$24 sps:$4 sm:$0xff]  }
 0x3e1   :  { %8447 = vmatpush1.bf16.msra.mxu1 %v11395_v14  ;;  %v11449_v14 = vld [vmem:[%s15549_s3 + $0x520] ss:$24 sps:$4 sm:$0xff]  }
 0x3e2   :  { %8448 = vmatprep.subr.bf16.mxu1 %v11403_v15  ;;  %v11457_v15 = vld [vmem:[%s15549_s3 + $0x4f4] ss:$24 sps:$4 sm:$0xff]  }
 0x3e3   :  { %8414 = vmatpush2.bf16.msra.mxu0 %v11398_v22  ;;  %v11452_v22 = vld [vmem:[%s15549_s3 + $0x730] ss:$24 sps:$4 sm:$0xff]  }
 0x3e4   :  { %8415 = vmatprep.subr.bf16.mxu0 %v11406_v32  ;;  %v11460_v32 = vld [vmem:[%s15549_s3 + $0x704] ss:$24 sps:$4 sm:$0xff]  }
 0x3e5   :  { %8449 = vmatpush1.bf16.msra.mxu1 %v11401_v49  ;;  %v11463_v49 = vld [vmem:[%s15549_s3 + $0x4c4] ss:$24 sps:$4 sm:$0xff]  }
 0x3e6   :  { %v11651_v59 = vpop.eup %11650  ;;  %8450 = vmatprep.subr.bf16.mxu1 %v11409_v19  ;;  %v11466_v19 = vld [vmem:[%s15549_s3 + $0x6d4] ss:$24 sps:$4 sm:$0xff]  }
 0x3e7   :  { %v8691_v25 = vadd.f32 1.0, %v11651_v59  ;;  %8416 = vmatpush2.bf16.msra.mxu0 %v11404_v41  ;;  %v11461_v41 = vld [vmem:[%s15549_s3 + $0x4c0] ss:$24 sps:$4 sm:$0xff]   ;;  %v11472_v59 = vld [vmem:[%s15549_s3 + $0x6a4] ss:$24 sps:$4 sm:$0xff]  }
 0x3e8   :  { %v11653_v56 = vpop.eup %11652  ;;  %8417 = vmatprep.subr.bf16.mxu0 %v11412_v20  ;;  %v11469_v20 = vld [vmem:[%s15549_s3 + $0x494] ss:$24 sps:$4 sm:$0xff]  }
 0x3e9   :  { %11658 = vrcp.f32 %v8691_v25  ;;  %v8692_v26 = vadd.f32 1.0, %v11653_v56  ;;  %8451 = vmatpush1.bf16.msra.mxu1 %v11407_v34  ;;  %v11464_v34 = vld [vmem:[%s15549_s3 + $0x6d0] ss:$24 sps:$4 sm:$0xff]   ;;  %v11475_v25 = vld [vmem:[%s15549_s3 + $0xa64] ss:$24 sps:$4 sm:$0xff]  }
 0x3ea   :  { %v11655_v27 = vpop.eup %11654  ;;  %8452 = vmatprep.subr.bf16.mxu1 %v11415_v52  ;;  %v11467_v52 = vld [vmem:[%s15549_s3 + $0x490] ss:$24 sps:$4 sm:$0xff]   ;;  %v11478_v56 = vld [vmem:[%s15549_s3 + $0x674] ss:$24 sps:$4 sm:$0xff]  }
 0x3eb   :  { %11660 = vrcp.f32 %v8692_v26  ;;  %v8697_v47 = vadd.f32 1.0, %v11655_v27  ;;  %8418 = vmatpush2.bf16.msra.mxu0 %v11410_v11  ;;  %v11470_v11 = vld [vmem:[%s15549_s3 + $0x6a0] ss:$24 sps:$4 sm:$0xff]   ;;  %v11481_v26 = vld [vmem:[%s15549_s3 + $0xa34] ss:$24 sps:$4 sm:$0xff]  }
 0x3ec   :  { %v11657_v33 = vpop.eup %11656  ;;  %8419 = vmatprep.subr.bf16.mxu0 %v11418_v12  ;;  %v11473_v12 = vld [vmem:[%s15549_s3 + $0xa60] ss:$24 sps:$4 sm:$0xff]   ;;  %v11484_v27 = vld [vmem:[%s15549_s3 + $0x644] ss:$24 sps:$4 sm:$0xff]  }
 0x3ed   :  { %11662 = vrcp.f32 %v8697_v47  ;;  %v8698_v55 = vadd.f32 1.0, %v11657_v33  ;;  %8453 = vmatpush1.bf16.msra.mxu1 %v11413_v28  ;;  %v11476_v28 = vld [vmem:[%s15549_s3 + $0x670] ss:$24 sps:$4 sm:$0xff]   ;;  %v11487_v47 = vld [vmem:[%s15549_s3 + $0xa04] ss:$24 sps:$4 sm:$0xff]  }
 0x3ee   :  { %8454 = vmatprep.subr.bf16.mxu1 %v11421_v40  ;;  %v11479_v40 = vld [vmem:[%s15549_s3 + $0xa30] ss:$24 sps:$4 sm:$0xff]   ;;  %v11493_v33 = vld [vmem:[%s15549_s3 + $0x9d4] ss:$24 sps:$4 sm:$0xff]  }
 0x3ef   :  { %11664 = vrcp.f32 %v8698_v55  ;;  %8420 = vmatpush2.bf16.msra.mxu0 %v11416_v21  ;;  %v11490_v21 = vld [vmem:[%s15549_s3 + $0x614] ss:$24 sps:$4 sm:$0xff]   ;;  %v11496_v55 = vld [vmem:[%s15549_s3 + $0x8e4] ss:$24 sps:$4 sm:$0xff]  }
 0x3f0   :  { %8421 = vmatprep.subr.bf16.mxu0 %v11424_v45  ;;  %v11488_v45 = vld [vmem:[%s15549_s3 + $0x610] ss:$24 sps:$4 sm:$0xff]  }
 0x3f1   :  { %8455 = vmatpush1.bf16.msra.mxu1 %v11419_v23  ;;  %v11491_v23 = vld [vmem:[%s15549_s3 + $0x9d0] ss:$24 sps:$4 sm:$0xff]  }
 0x3f2   :  { %8456 = vmatprep.subr.bf16.mxu1 %v11427_v46  ;;  %v11499_v46 = vld [vmem:[%s15549_s3 + $0x9a4] ss:$24 sps:$4 sm:$0xff]  }
 0x3f3   :  { %8422 = vmatpush2.bf16.msra.mxu0 %v11422_v48  ;;  %v11494_v48 = vld [vmem:[%s15549_s3 + $0x8e0] ss:$24 sps:$4 sm:$0xff]  }
 0x3f4   :  { %8423 = vmatprep.subr.bf16.mxu0 %v11430_v0  ;;  %v11502_v0 = vld [vmem:[%s15549_s3 + $0x8b4] ss:$24 sps:$4 sm:$0xff]  }
 0x3f5   :  { %8457 = vmatpush2.bf16.msra.mxu1 %v11425_v18  ;;  %v11497_v18 = vld [vmem:[%s15549_s3 + $0x9a0] ss:$24 sps:$4 sm:$0xff]  }
 0x3f6   :  { %v11659_v42 = vpop.eup %11658  ;;  %8458 = vmatprep.subr.bf16.mxu1 %v11433_v54  ;;  %v11505_v54 = vld [vmem:[%s15549_s3 + $0x974] ss:$24 sps:$4 sm:$0xff]  }
 0x3f7   :  { %8727 = vst [vmem:[#allocation2] sm:$0xff] %v11659_v42  ;;  %8424 = vmatpush2.bf16.msra.mxu0 %v11428_v37  ;;  %v11500_v37 = vld [vmem:[%s15549_s3 + $0x8b0] ss:$24 sps:$4 sm:$0xff]   ;;  %v11511_v42 = vld [vmem:[%s15549_s3 + $0x944] ss:$24 sps:$4 sm:$0xff]  }
 0x3f8   :  { %v11661_v53 = vpop.eup %11660  ;;  %8425 = vmatprep.subr.bf16.mxu0 %v11436_v62  ;;  %v11508_v62 = vld [vmem:[%s15549_s3 + $0x884] ss:$24 sps:$4 sm:$0xff]  }
 0x3f9   :  { %8728 = vst [vmem:[#allocation2 + $0x8] sm:$0xff] %v11661_v53  ;;  %8459 = vmatpush2.bf16.msra.mxu1 %v11431_v58  ;;  %v11503_v58 = vld [vmem:[%s15549_s3 + $0x970] ss:$24 sps:$4 sm:$0xff]   ;;  %v11509_v53 = vld [vmem:[%s15549_s3 + $0x940] ss:$24 sps:$4 sm:$0xff]  }
 0x3fa   :  { %v11663_v2 = vpop.eup %11662  ;;  %8460 = vmatprep.subr.bf16.mxu1 %v11439_v5  ;;  %v11506_v5 = vld [vmem:[%s15549_s3 + $0x880] ss:$24 sps:$4 sm:$0xff]  }
 0x3fb   :  { %8733 = vst [vmem:[#allocation2 + $0x30] sm:$0xff] %v11663_v2  ;;  %8426 = vmatpush2.bf16.msra.mxu0 %v11434_v61  ;;  %v11514_v61 = vld [vmem:[%s15549_s3 + $0x854] ss:$24 sps:$4 sm:$0xff]   ;;  %v11520_v2 = vld [vmem:[%s15549_s3 + $0x824] ss:$24 sps:$4 sm:$0xff]  }
 0x3fc   :  { %v11665_v4 = vpop.eup %11664  ;;  %8427 = vmatprep.subr.bf16.mxu0 %v11442_v43  ;;  %v11517_v43 = vld [vmem:[%s15549_s3 + $0x914] ss:$24 sps:$4 sm:$0xff]  }
 0x3fd   :  { %8734 = vst [vmem:[#allocation2 + $0x38] sm:$0xff] %v11665_v4  ;;  %8461 = vmatpush2.bf16.msra.mxu1 %v11437_v7  ;;  %v11512_v7 = vld [vmem:[%s15549_s3 + $0x850] ss:$24 sps:$4 sm:$0xff]   ;;  %v11518_v4 = vld [vmem:[%s15549_s3 + $0x820] ss:$24 sps:$4 sm:$0xff]  }
 0x3fe   :  { %8462 = vmatprep.subr.bf16.mxu1 %v11445_v3  ;;  %v11515_v3 = vld [vmem:[%s15549_s3 + $0x910] ss:$24 sps:$4 sm:$0xff]  }
 0x3ff   :  { %8428 = vmatpush2.bf16.msra.mxu0 %v11440_v6  ;;  %v11523_v6 = vld [vmem:[%s15549_s3 + $0xbe4] ss:$24 sps:$4 sm:$0xff]  }
 0x400   :  { %8483 = vmatprep.subr.bf16.mxu0 %v11448_v39  ;;  %v11526_v39 = vld [vmem:[%s15549_s3 + $0x7f4] ss:$24 sps:$4 sm:$0xff]  }
 0x401   :  { %8463 = vmatpush2.bf16.msra.mxu1 %v11443_v13  ;;  %v11521_v13 = vld [vmem:[%s15549_s3 + $0xbe0] ss:$24 sps:$4 sm:$0xff]  }
 0x402   :  { %8430 = vmatmul.mubr.bf16.vlgmr.msra.gmra.mxu0 %v12863_v29  ;;  %8464 = vmatprep.subr.bf16.mxu1 %v11451_v8  ;;  %v11455_v29 = vld [vmem:[%s15549_s3 + $0x4f0] ss:$24 sps:$4 sm:$0xff]   ;;  %v11529_v8 = vld [vmem:[%s15549_s3 + $0xbb4] ss:$24 sps:$4 sm:$0xff]  }
 0x403   :  { %8484 = vmatpush1.bf16.msra.mxu0 %v11446_v9  ;;  %8515 = vmatprep.mubr.bf16.mxu0 %v13914_v51  ;;  %v11458_v51 = vld [vmem:[%s15549_s3 + $0x700] ss:$24 sps:$4 sm:$0xff]   ;;  %v11524_v9 = vld [vmem:[%s15549_s3 + $0x7f0] ss:$24 sps:$4 sm:$0xff]  }
 0x404   :  { %8485 = vmatprep.subr.bf16.mxu0 %v11454_v50  ;;  %v11532_v50 = vld [vmem:[%s15549_s3 + $0x7c4] ss:$24 sps:$4 sm:$0xff]  }
 0x405   :  { %8465 = vmatpush2.bf16.msra.mxu1 %v11449_v14  ;;  %v11527_v14 = vld [vmem:[%s15549_s3 + $0xbb0] ss:$24 sps:$4 sm:$0xff]  }
 0x406   :  { %8466 = vmatprep.subr.bf16.mxu1 %v11457_v15  ;;  %v11535_v15 = vld [vmem:[%s15549_s3 + $0xb84] ss:$24 sps:$4 sm:$0xff]  }
 0x407   :  { %8486 = vmatpush1.bf16.msra.mxu0 %v11452_v22  ;;  %v11530_v22 = vld [vmem:[%s15549_s3 + $0x7c0] ss:$24 sps:$4 sm:$0xff]  }
 0x408   :  { %8487 = vmatprep.subr.bf16.mxu0 %v11460_v32  ;;  %v11538_v32 = vld [vmem:[%s15549_s3 + $0x794] ss:$24 sps:$4 sm:$0xff]  }
 0x409   :  { %8467 = vmatpush2.bf16.msra.mxu1 %v11455_v29  ;;  %v11533_v29 = vld [vmem:[%s15549_s3 + $0xb80] ss:$24 sps:$4 sm:$0xff]  }
 0x40a   :  { %8468 = vmatprep.subr.bf16.mxu1 %v11463_v49  ;;  %v11541_v49 = vld [vmem:[%s15549_s3 + $0xb54] ss:$24 sps:$4 sm:$0xff]  }
 0x40b   :  { %8488 = vmatpush1.bf16.msra.mxu0 %v11458_v51  ;;  %v11536_v51 = vld [vmem:[%s15549_s3 + $0x790] ss:$24 sps:$4 sm:$0xff]  }
 0x40c   :  { %8489 = vmatprep.subr.bf16.mxu0 %v11466_v19  ;;  %v11544_v19 = vld [vmem:[%s15549_s3 + $0xd64] ss:$24 sps:$4 sm:$0xff]  }
 0x40d   :  { %8469 = vmatpush2.bf16.msra.mxu1 %v11461_v41  ;;  %v11539_v41 = vld [vmem:[%s15549_s3 + $0xb50] ss:$24 sps:$4 sm:$0xff]  }
 0x40e   :  { %8470 = vmatprep.subr.bf16.mxu1 %v11469_v20  ;;  %v11547_v20 = vld [vmem:[%s15549_s3 + $0xb24] ss:$24 sps:$4 sm:$0xff]  }
 0x40f   :  { %8490 = vmatpush1.bf16.msra.mxu0 %v11464_v34  ;;  %v11542_v34 = vld [vmem:[%s15549_s3 + $0xd60] ss:$24 sps:$4 sm:$0xff]  }
 0x410   :  { %8491 = vmatprep.subr.bf16.mxu0 %v11472_v59  ;;  %v11550_v59 = vld [vmem:[%s15549_s3 + $0xd34] ss:$24 sps:$4 sm:$0xff]  }
 0x411   :  { %8471 = vmatpush2.bf16.msra.mxu1 %v11467_v52  ;;  %v11545_v52 = vld [vmem:[%s15549_s3 + $0xb20] ss:$24 sps:$4 sm:$0xff]  }
 0x412   :  { %8526 = vmatprep.subr.bf16.mxu1 %v11475_v25  ;;  %v11553_v25 = vld [vmem:[%s15549_s3 + $0xaf4] ss:$24 sps:$4 sm:$0xff]  }
 0x413   :  { %8492 = vmatpush1.bf16.msra.mxu0 %v11470_v11  ;;  %v11548_v11 = vld [vmem:[%s15549_s3 + $0xd30] ss:$24 sps:$4 sm:$0xff]  }
 0x414   :  { %8473 = vmatmul.mubr.bf16.vlgmr.msra.gmra.mxu1 %v13083_v17  ;;  %8493 = vmatprep.subr.bf16.mxu0 %v11478_v56  ;;  %v11482_v17 = vld [vmem:[%s15549_s3 + $0x640] ss:$24 sps:$4 sm:$0xff]   ;;  %v11556_v56 = vld [vmem:[%s15549_s3 + $0xd04] ss:$24 sps:$4 sm:$0xff]  }
 0x415   :  { %8527 = vmatpush1.bf16.msra.mxu1 %v11473_v12  ;;  %8558 = vmatprep.mubr.bf16.mxu1 %v13920_v16  ;;  %v11485_v16 = vld [vmem:[%s15549_s3 + $0xa00] ss:$24 sps:$4 sm:$0xff]   ;;  %v11559_v12 = vld [vmem:[%s15549_s3 + $0xac4] ss:$24 sps:$4 sm:$0xff]  }
 0x416   :  { %8528 = vmatprep.subr.bf16.mxu1 %v11481_v26  ;;  %v11562_v26 = vld [vmem:[%s15549_s3 + $0xcd4] ss:$24 sps:$4 sm:$0xff]  }
 0x417   :  { %8494 = vmatpush1.bf16.msra.mxu0 %v11476_v28  ;;  %v11557_v28 = vld [vmem:[%s15549_s3 + $0xac0] ss:$24 sps:$4 sm:$0xff]  }
 0x418   :  { %8495 = vmatprep.subr.bf16.mxu0 %v11484_v27  ;;  %v11565_v27 = vld [vmem:[%s15549_s3 + $0xa94] ss:$24 sps:$4 sm:$0xff]  }
 0x419   :  { %8529 = vmatpush1.bf16.msra.mxu1 %v11479_v40  ;;  %v11560_v40 = vld [vmem:[%s15549_s3 + $0xcd0] ss:$24 sps:$4 sm:$0xff]  }
 0x41a   :  { %8530 = vmatprep.subr.bf16.mxu1 %v11487_v47  ;;  %v11568_v47 = vld [vmem:[%s15549_s3 + $0xca4] ss:$24 sps:$4 sm:$0xff]  }
 0x41b   :  { %8496 = vmatpush1.bf16.msra.mxu0 %v11482_v17  ;;  %v11563_v17 = vld [vmem:[%s15549_s3 + $0xa90] ss:$24 sps:$4 sm:$0xff]  }
 0x41c   :  { %8497 = vmatprep.subr.bf16.mxu0 %v11490_v21  ;;  %v11571_v21 = vld [vmem:[%s15549_s3 + $0x1064] ss:$24 sps:$4 sm:$0xff]  }
 0x41d   :  { %8531 = vmatpush1.bf16.msra.mxu1 %v11485_v16  ;;  %v11566_v16 = vld [vmem:[%s15549_s3 + $0xca0] ss:$24 sps:$4 sm:$0xff]  }
 0x41e   :  { %8532 = vmatprep.subr.bf16.mxu1 %v11493_v33  ;;  %v11574_v33 = vld [vmem:[%s15549_s3 + $0xc74] ss:$24 sps:$4 sm:$0xff]  }
 0x41f   :  { %8498 = vmatpush1.bf16.msra.mxu0 %v11488_v45  ;;  %v11569_v45 = vld [vmem:[%s15549_s3 + $0x1060] ss:$24 sps:$4 sm:$0xff]  }
 0x420   :  { %8499 = vmatprep.subr.bf16.mxu0 %v11496_v55  ;;  %v11577_v55 = vld [vmem:[%s15549_s3 + $0x1034] ss:$24 sps:$4 sm:$0xff]  }
 0x421   :  { %8533 = vmatpush1.bf16.msra.mxu1 %v11491_v23  ;;  %v11572_v23 = vld [vmem:[%s15549_s3 + $0xc70] ss:$24 sps:$4 sm:$0xff]  }
 0x422   :  { %8534 = vmatprep.subr.bf16.mxu1 %v11499_v46  ;;  %v11580_v46 = vld [vmem:[%s15549_s3 + $0xc44] ss:$24 sps:$4 sm:$0xff]  }
 0x423   :  { %8500 = vmatpush2.bf16.msra.mxu0 %v11494_v48  ;;  %v11575_v48 = vld [vmem:[%s15549_s3 + $0x1030] ss:$24 sps:$4 sm:$0xff]  }
 0x424   :  { %8501 = vmatprep.subr.bf16.mxu0 %v11502_v0  ;;  %v11583_v0 = vld [vmem:[%s15549_s3 + $0x1004] ss:$24 sps:$4 sm:$0xff]  }
 0x425   :  { %8535 = vmatpush1.bf16.msra.mxu1 %v11497_v18  ;;  %v11586_v18 = vld [vmem:[%s15549_s3 + $0xc14] ss:$24 sps:$4 sm:$0xff]  }
 0x426   :  { %8536 = vmatprep.subr.bf16.mxu1 %v11505_v54  ;;  %v11589_v54 = vld [vmem:[%s15549_s3 + $0xfd4] ss:$24 sps:$4 sm:$0xff]  }
 0x427   :  { %8502 = vmatpush2.bf16.msra.mxu0 %v11500_v37  ;;  %v11584_v37 = vld [vmem:[%s15549_s3 + $0xc10] ss:$24 sps:$4 sm:$0xff]  }
 0x428   :  { %8503 = vmatprep.subr.bf16.mxu0 %v11508_v62  ;;  %v11592_v62 = vld [vmem:[%s15549_s3 + $0xee4] ss:$24 sps:$4 sm:$0xff]  }
 0x429   :  { %8537 = vmatpush1.bf16.msra.mxu1 %v11503_v58  ;;  %v11587_v58 = vld [vmem:[%s15549_s3 + $0xfd0] ss:$24 sps:$4 sm:$0xff]  }
 0x42a   :  { %8538 = vmatprep.subr.bf16.mxu1 %v11511_v42  ;;  %v11595_v42 = vld [vmem:[%s15549_s3 + $0xfa4] ss:$24 sps:$4 sm:$0xff]  }
 0x42b   :  { %8504 = vmatpush2.bf16.msra.mxu0 %v11506_v5  ;;  %v11590_v5 = vld [vmem:[%s15549_s3 + $0xee0] ss:$24 sps:$4 sm:$0xff]  }
 0x42c   :  { %8505 = vmatprep.subr.bf16.mxu0 %v11514_v61  ;;  %v11598_v61 = vld [vmem:[%s15549_s3 + $0xeb4] ss:$24 sps:$4 sm:$0xff]  }
 0x42d   :  { %8539 = vmatpush1.bf16.msra.mxu1 %v11509_v53  ;;  %v11593_v53 = vld [vmem:[%s15549_s3 + $0xfa0] ss:$24 sps:$4 sm:$0xff]  }
 0x42e   :  { %8540 = vmatprep.subr.bf16.mxu1 %v11517_v43  ;;  %v11601_v43 = vld [vmem:[%s15549_s3 + $0xf74] ss:$24 sps:$4 sm:$0xff]  }
 0x42f   :  { %8506 = vmatpush2.bf16.msra.mxu0 %v11512_v7  ;;  %v11596_v7 = vld [vmem:[%s15549_s3 + $0xeb0] ss:$24 sps:$4 sm:$0xff]  }
 0x430   :  { %8507 = vmatprep.subr.bf16.mxu0 %v11520_v2  ;;  %v11604_v2 = vld [vmem:[%s15549_s3 + $0xe84] ss:$24 sps:$4 sm:$0xff]  }
 0x431   :  { %8541 = vmatpush1.bf16.msra.mxu1 %v11515_v3  ;;  %v11599_v3 = vld [vmem:[%s15549_s3 + $0xf70] ss:$24 sps:$4 sm:$0xff]  }
 0x432   :  { %8542 = vmatprep.subr.bf16.mxu1 %v11523_v6  ;;  %v11607_v6 = vld [vmem:[%s15549_s3 + $0xf44] ss:$24 sps:$4 sm:$0xff]  }
 0x433   :  { %8508 = vmatpush2.bf16.msra.mxu0 %v11518_v4  ;;  %v11602_v4 = vld [vmem:[%s15549_s3 + $0xe80] ss:$24 sps:$4 sm:$0xff]  }
 0x434   :  { %8509 = vmatprep.subr.bf16.mxu0 %v11526_v39  ;;  %v11610_v39 = vld [vmem:[%s15549_s3 + $0xe54] ss:$24 sps:$4 sm:$0xff]  }
 0x435   :  { %8543 = vmatpush2.bf16.msra.mxu1 %v11521_v13  ;;  %v11605_v13 = vld [vmem:[%s15549_s3 + $0xf40] ss:$24 sps:$4 sm:$0xff]  }
 0x436   :  { %8544 = vmatprep.subr.bf16.mxu1 %v11529_v8  ;;  %v11613_v8 = vld [vmem:[%s15549_s3 + $0xf14] ss:$24 sps:$4 sm:$0xff]  }
 0x437   :  { %8510 = vmatpush2.bf16.msra.mxu0 %v11524_v9  ;;  %v11608_v9 = vld [vmem:[%s15549_s3 + $0xe50] ss:$24 sps:$4 sm:$0xff]  }
 0x438   :  { %8511 = vmatprep.subr.bf16.mxu0 %v11532_v50  ;;  %v11616_v50 = vld [vmem:[%s15549_s3 + $0xe24] ss:$24 sps:$4 sm:$0xff]  }
 0x439   :  { %8545 = vmatpush2.bf16.msra.mxu1 %v11527_v14  ;;  %v11611_v14 = vld [vmem:[%s15549_s3 + $0xf10] ss:$24 sps:$4 sm:$0xff]  }
 0x43a   :  { %8546 = vmatprep.subr.bf16.mxu1 %v11535_v15  ;;  %v15458_v15 = vpop.f32.mrf.mxu0 }
 0x43b   :  { %8512 = vmatpush2.bf16.msra.mxu0 %v11530_v22  ;;  %v11619_v22 = vld [vmem:[%s15549_s3 + $0x11e4] ss:$24 sps:$4 sm:$0xff]  }
 0x43c   :  { %8513 = vmatprep.subr.bf16.mxu0 %v11538_v32  ;;  %v11614_v32 = vld [vmem:[%s15549_s3 + $0xe20] ss:$24 sps:$4 sm:$0xff]  }
 0x43d   :  { %8547 = vmatpush2.bf16.msra.mxu1 %v11533_v29  ;;  %v11622_v29 = vld [vmem:[%s15549_s3 + $0xdf4] ss:$24 sps:$4 sm:$0xff]  }
 0x43e   :  { %8548 = vmatprep.subr.bf16.mxu1 %v11541_v49  ;;  %v11617_v49 = vld [vmem:[%s15549_s3 + $0x11e0] ss:$24 sps:$4 sm:$0xff]  }
 0x43f   :  { %8514 = vmatpush2.bf16.msra.mxu0 %v11536_v51  ;;  %v8175_v51 = vpop.f32.mrf.mxu0 }
 0x440   :  { %8569 = vmatprep.subr.bf16.mxu0 %v11544_v19  ;;  %v11625_v19 = vld [vmem:[%s15549_s3 + $0x11b4] ss:$24 sps:$4 sm:$0xff]  }
 0x441   :  { %8549 = vmatpush2.bf16.msra.mxu1 %v11539_v41  ;;  %v11620_v41 = vld [vmem:[%s15549_s3 + $0xdf0] ss:$24 sps:$4 sm:$0xff]  }
 0x442   :  { %8516 = vmatmul.mubr.bf16.vlgmr.msra.gmra.mxu0 %v13499_v63  ;;  %8550 = vmatprep.subr.bf16.mxu1 %v11547_v20  ;;  %v11551_v63 = vld [vmem:[%s15549_s3 + $0xaf0] ss:$24 sps:$4 sm:$0xff]   ;;  %v11628_v20 = vld [vmem:[%s15549_s3 + $0xdc4] ss:$24 sps:$4 sm:$0xff]  }
 0x443   :  { %8570 = vmatpush1.bf16.msra.mxu0 %v11542_v34  ;;  %8601 = vmatprep.mubr.bf16.mxu0 %v14173_v38  ;;  %v11554_v38 = vld [vmem:[%s15549_s3 + $0xd00] ss:$24 sps:$4 sm:$0xff]   ;;  %v11623_v34 = vld [vmem:[%s15549_s3 + $0x11b0] ss:$24 sps:$4 sm:$0xff]  }
 0x444   :  { %8571 = vmatprep.subr.bf16.mxu0 %v11550_v59  ;;  %v8177_v59 = vpop.f32.mrf.mxu0 }
 0x445   :  { %8551 = vmatpush2.bf16.msra.mxu1 %v11545_v52  ;;  %v11631_v52 = vld [vmem:[%s15549_s3 + $0x1184] ss:$24 sps:$4 sm:$0xff]  }
 0x446   :  { %8552 = vmatprep.subr.bf16.mxu1 %v11553_v25  ;;  %v11626_v25 = vld [vmem:[%s15549_s3 + $0xdc0] ss:$24 sps:$4 sm:$0xff]  }
 0x447   :  { %8572 = vmatpush1.bf16.msra.mxu0 %v11548_v11  ;;  %v8216_v11 = vpop.f32.mrf.mxu1 }
 0x448   :  { %8573 = vmatprep.subr.bf16.mxu0 %v11556_v56  ;;  %v11634_v56 = vld [vmem:[%s15549_s3 + $0xd94] ss:$24 sps:$4 sm:$0xff]  }
 0x449   :  { %8553 = vmatpush2.bf16.msra.mxu1 %v11551_v63  ;;  %v11629_v63 = vld [vmem:[%s15549_s3 + $0x1180] ss:$24 sps:$4 sm:$0xff]  }
 0x44a   :  { %8554 = vmatprep.subr.bf16.mxu1 %v11559_v12  ;;  %v8179_v12 = vpop.f32.mrf.mxu0 }
 0x44b   :  { %8574 = vmatpush1.bf16.msra.mxu0 %v11554_v38  ;;  %v11637_v38 = vld [vmem:[%s15549_s3 + $0x1154] ss:$24 sps:$4 sm:$0xff]  }
 0x44c   :  { %8575 = vmatprep.subr.bf16.mxu0 %v11562_v26  ;;  %v11632_v26 = vld [vmem:[%s15549_s3 + $0xd90] ss:$24 sps:$4 sm:$0xff]  }
 0x44d   :  { %8555 = vmatpush2.bf16.msra.mxu1 %v11557_v28  ;;  %v8218_v28 = vpop.f32.mrf.mxu1 }
 0x44e   :  { %8556 = vmatprep.subr.bf16.mxu1 %v11565_v27  ;;  %v8259_v27 = vpop.f32.mrf.mxu0 }
 0x44f   :  { %8576 = vmatpush1.bf16.msra.mxu0 %v11560_v40  ;;  %v11635_v40 = vld [vmem:[%s15549_s3 + $0x1150] ss:$24 sps:$4 sm:$0xff]  }
 0x450   :  { %8577 = vmatprep.subr.bf16.mxu0 %v11568_v47  ;;  %v11640_v47 = vld [vmem:[%s15549_s3 + $0x1124] ss:$24 sps:$4 sm:$0xff]  }
 0x451   :  { %8557 = vmatpush2.bf16.msra.mxu1 %v11563_v17  ;;  %v8220_v17 = vpop.f32.mrf.mxu1 }
 0x452   :  { %8612 = vmatprep.subr.bf16.mxu1 %v11571_v21  ;;  %v8261_v21 = vpop.f32.mrf.mxu0 }
 0x453   :  { %8578 = vmatpush1.bf16.msra.mxu0 %v11566_v16  ;;  %v11638_v16 = vld [vmem:[%s15549_s3 + $0x1120] ss:$24 sps:$4 sm:$0xff]  }
 0x454   :  { %8559 = vmatmul.mubr.bf16.vlgmr.msra.gmra.mxu1 %v13751_v30  ;;  %8579 = vmatprep.subr.bf16.mxu0 %v11574_v33  ;;  %v11578_v30 = vld [vmem:[%s15549_s3 + $0xc40] ss:$24 sps:$4 sm:$0xff]   ;;  %v11643_v33 = vld [vmem:[%s15549_s3 + $0x10f4] ss:$24 sps:$4 sm:$0xff]  }
 0x455   :  { %8613 = vmatpush1.bf16.msra.mxu1 %v11569_v45  ;;  %8644 = vmatprep.mubr.bf16.mxu1 %v14366_v35  ;;  %v11581_v35 = vld [vmem:[%s15549_s3 + $0x1000] ss:$24 sps:$4 sm:$0xff]   ;;  %v8222_v45 = vpop.f32.mrf.mxu1 }
 0x456   :  { %8614 = vmatprep.subr.bf16.mxu1 %v11577_v55  ;;  %v8263_v55 = vpop.f32.mrf.mxu0 }
 0x457   :  { %8580 = vmatpush1.bf16.msra.mxu0 %v11572_v23  ;;  %v11641_v23 = vld [vmem:[%s15549_s3 + $0x10f0] ss:$24 sps:$4 sm:$0xff]  }
 0x458   :  { %8581 = vmatprep.subr.bf16.mxu0 %v11580_v46  ;;  %v8302_v46 = vpop.f32.mrf.mxu1 }
 0x459   :  { %8615 = vmatpush1.bf16.msra.mxu1 %v11575_v48  ;;  %v11646_v48 = vld [vmem:[%s15549_s3 + $0x10c4] ss:$24 sps:$4 sm:$0xff]  }
 0x45a   :  { %8616 = vmatprep.subr.bf16.mxu1 %v11583_v0  ;;  %v8265_v0 = vpop.f32.mrf.mxu0 }
 0x45b   :  { %8582 = vmatpush1.bf16.msra.mxu0 %v11578_v30  ;;  %v4986_v30 = vrot.slane %v14915_v60, %v13595_v44  ;;  %v11647_v44 = vld [vmem:[%s15549_s3 + $0x1090] ss:$24 sps:$4 sm:$0xff]  }
 0x45c   :  { %8583 = vmatprep.subr.bf16.mxu0 %v11586_v18  ;;  %v11644_v18 = vld [vmem:[%s15549_s3 + $0x10c0] ss:$24 sps:$4 sm:$0xff]  }
 0x45d   :  { %8617 = vmatpush1.bf16.msra.mxu1 %v11581_v35  ;;  %v8304_v35 = vpop.f32.mrf.mxu1 }
 0x45e   :  { %8618 = vmatprep.subr.bf16.mxu1 %v11589_v54 }
 0x45f   :  { %8584 = vmatpush1.bf16.msra.mxu0 %v11584_v37  ;;  %v11649_v37 = vld [vmem:[%s15549_s3 + $0x1094] ss:$24 sps:$4 sm:$0xff]  }
 0x460   :  { %8585 = vmatprep.subr.bf16.mxu0 %v11592_v62 }
 0x461   :  { %8619 = vmatpush1.bf16.msra.mxu1 %v11587_v58  ;;  %v8176_v58 = vadd.f32 %v8175_v51, %v4986_v30 }
 0x462   :  { %8620 = vmatprep.subr.bf16.mxu1 %v11595_v42 }
 0x463   :  { %8586 = vmatpush2.bf16.msra.mxu0 %v11590_v5 }
 0x464   :  { %8587 = vmatprep.subr.bf16.mxu0 %v11598_v61  ;;  %v8219_v61 = vadd.f32 %v8218_v28, %v8176_v58  ;;  %v11700_v58 = vld [vmem:[%s15550_s4] sm:$0x3f]  ;;  %s11723_s4 = smov [#allocation2]  }
 0x465   :  { %8621 = vmatpush1.bf16.msra.mxu1 %v11593_v53  ;;  %s8744_s30 = sshll.u32 %s11723_s4, 4  ;;  %s8745_s30 = int_to_ptr.vmem [resolvable:$true] %s8744_s30 }
 0x466   :  { %8622 = vmatprep.subr.bf16.mxu1 %v11601_v43  ;;  %v8180_v43 = vadd.f32 %v8179_v12, %v4986_v30  ;;  %s11701_s6 = scalar_lea.vmem %s8745_s30, 1536  ;;  %p11706_p1 = scmp.lt.s32.totalorder %s8745_s30, %s8745_s30 }
 0x467   :  { %8588 = vmatpush2.bf16.msra.mxu0 %v11596_v7  ;;  %p11702_p0 = scmp.ne.s32.totalorder %s8745_s30, %s11701_s6  ;;  %p11707_p2 = scmp.lt.s32.totalorder %s11701_s6, %s11701_s6 }
 0x468   :  { %8589 = vmatprep.subr.bf16.mxu0 %v11604_v2  ;;  %v8262_v2 = vadd.f32 %v8261_v21, %v8219_v61 }
 0x469   :  { %8623 = vmatpush1.bf16.msra.mxu1 %v11599_v3  ;;  %p11708_p3 = por %p11707_p2, %p11706_p1 }
 0x46a   :  { %8624 = vmatprep.subr.bf16.mxu1 %v11607_v6 }
 0x46b   :  { %8590 = vmatpush2.bf16.msra.mxu0 %v11602_v4  ;;  %p11709_p4 = pnand %p11708_p3, %p11702_p0 }
 0x46c   :  { %8591 = vmatprep.subr.bf16.mxu0 %v11610_v39  ;;  %v8223_v39 = vadd.f32 %v8222_v45, %v8180_v43 }
 0x46d   :  { %8625 = vmatpush1.bf16.msra.mxu1 %v11605_v13 }
 0x46e   :  { %8626 = vmatprep.subr.bf16.mxu1 %v11613_v8  ;;  %v8305_v8 = vadd.f32 %v8304_v35, %v8262_v2 }
 0x46f   :  { %8592 = vmatpush2.bf16.msra.mxu0 %v11608_v9 }
 0x470   :  { %8593 = vmatprep.subr.bf16.mxu0 %v11616_v50 }
 0x471   :  { %8627 = vmatpush1.bf16.msra.mxu1 %v11611_v14  ;;  %v8266_v14 = vadd.f32 %v8265_v0, %v8223_v39 }
 0x472   :  { %8628 = vmatprep.subr.bf16.mxu1 %v11619_v22 }
 0x473   :  { %8594 = vmatpush2.bf16.msra.mxu0 %v11614_v32 }
 0x474   :  { %8595 = vmatprep.subr.bf16.mxu0 %v11622_v29 }
 0x475   :  { %8629 = vmatpush2.bf16.msra.mxu1 %v11617_v49 }
 0x476   :  { %8630 = vmatprep.subr.bf16.mxu1 %v11625_v19 }
 0x477   :  { %8596 = vmatpush2.bf16.msra.mxu0 %v11620_v41 }
 0x478   :  { %8597 = vmatprep.subr.bf16.mxu0 %v11628_v20 }
 0x479   :  { %8631 = vmatpush2.bf16.msra.mxu1 %v11623_v34 }
 0x47a   :  { %8632 = vmatprep.subr.bf16.mxu1 %v11631_v52 }
 0x47b   :  { %8598 = vmatpush2.bf16.msra.mxu0 %v11626_v25 }
 0x47c   :  { %8599 = vmatprep.subr.bf16.mxu0 %v11634_v56 }
 0x47d   :  { %8633 = vmatpush2.bf16.msra.mxu1 %v11629_v63 }
 0x47e   :  { %8634 = vmatprep.subr.bf16.mxu1 %v11637_v38 }
 0x47f   :  { %8600 = vmatpush2.bf16.msra.mxu0 %v11632_v26 }
 0x481   :  { %8635 = vmatpush2.bf16.msra.mxu1 %v11635_v40 }
 0x482   :  { %8602 = vmatmul.mubr.bf16.vlgmr.msra.gmra.mxu0 %v14335_v10  ;;  %8636 = vmatprep.subr.bf16.mxu1 %v11640_v47  ;;  %v4982_v10 = vrot.slane %v14915_v60, %v13002_v1  ;;  %v8345_v54 = vpop.f32.mrf.mxu0  ;;  %v8306_v60 = vpop.f32.mrf.mxu1 }
 0x484   :  { %v8174_v62 = vadd.f32 %v15458_v15, %v4982_v10  ;;  %v8347_v42 = vpop.f32.mrf.mxu0  ;;  %v8178_v5 = vadd.f32 %v8177_v59, %v4982_v10  ;;  %v8308_v6 = vpop.f32.mrf.mxu1 }
 0x485   :  { %8637 = vmatpush2.bf16.msra.mxu1 %v11638_v16  ;;  %v8348_v22 = vadd.f32 %v8347_v42, %v8305_v8  ;;  %v8309_v51 = vadd.f32 %v8308_v6, %v8266_v14 }
 0x486   :  { %8638 = vmatprep.subr.bf16.mxu1 %v11643_v33  ;;  %v8217_v1 = vadd.f32 %v8216_v11, %v8174_v62  ;;  %v8221_v7 = vadd.f32 %v8220_v17, %v8178_v5  ;;  %v8349_v4 = vpop.f32.mrf.mxu0 }
 0x488   :  { %v8260_v53 = vadd.f32 %v8259_v27, %v8217_v1  ;;  %v8264_v13 = vadd.f32 %v8263_v55, %v8221_v7  ;;  %v8351_v29 = vpop.f32.mrf.mxu0  ;;  %v4990_v1 = vrot.slane %v11700_v58, %v637_v24 }
 0x489   :  { %8639 = vmatpush2.bf16.msra.mxu1 %v11641_v23  ;;  %v8352_v59 = vadd.f32 %v8351_v29, %v8309_v51 }
 0x48a   :  { %8640 = vmatprep.subr.bf16.mxu1 %v11646_v48  ;;  %v8303_v3 = vadd.f32 %v8302_v46, %v8260_v53  ;;  %v8307_v15 = vadd.f32 %v8306_v60, %v8264_v13  ;;  %v4994_v60 = vrot.slane %v11700_v58, %v641_v57 }
 0x48c   :  { %v8346_v9 = vadd.f32 %v8345_v54, %v8303_v3  ;;  %v8350_v19 = vadd.f32 %v8349_v4, %v8307_v15 }
 0x48d   :  { %8641 = vmatpush2.bf16.msra.mxu1 %v11644_v18 }
 0x48e   :  { %8642 = vmatprep.subr.bf16.mxu1 %v11649_v37 }
 0x491   :  { %8643 = vmatpush2.bf16.msra.mxu1 %v11647_v44 }
 0x494   :  { %v8388_v50 = vpop.f32.mrf.mxu1  ;;  %8645 = vmatmul.mubr.bf16.vlgmr.msra.gmra.mxu1 %v14371_v36 }
 0x495   :  { %v8389_v32 = vadd.f32 %v8388_v50, %v8346_v9 }
 0x496   :  { %v8390_v49 = vpop.f32.mrf.mxu1 }
 0x497   :  { %v9909_v41 = vmul.f32 -1.442695, %v8389_v32  ;;  %v8391_v20 = vadd.f32 %v8390_v49, %v8348_v22 }
 0x498   :  { %v8392_v34 = vpop.f32.mrf.mxu1 }
 0x499   :  { %11666 = vpow2.f32 %v9909_v41  ;;  %v9910_v52 = vmul.f32 -1.442695, %v8391_v20  ;;  %v8393_v25 = vadd.f32 %v8392_v34, %v8350_v19 }
 0x49a   :  { %v8394_v11 = vpop.f32.mrf.mxu1 }
 0x49b   :  { %11668 = vpow2.f32 %v9910_v52  ;;  %v9915_v56 = vmul.f32 -1.442695, %v8393_v25  ;;  %v8395_v63 = vadd.f32 %v8394_v11, %v8352_v59 }
 0x49d   :  { %11670 = vpow2.f32 %v9915_v56  ;;  %v9916_v36 = vmul.f32 -1.442695, %v8395_v63 }
 0x49f   :  { %11672 = vpow2.f32 %v9916_v36 }
 0x4a6   :  { %v11667_v12 = vpop.eup %11666 }
 0x4a7   :  { %v8693_v38 = vadd.f32 1.0, %v11667_v12 }
 0x4a8   :  { %v11669_v26 = vpop.eup %11668 }
 0x4a9   :  { %11674 = vrcp.f32 %v8693_v38  ;;  %v8694_v28 = vadd.f32 1.0, %v11669_v26 }
 0x4aa   :  { %v11671_v27 = vpop.eup %11670 }
 0x4ab   :  { %11676 = vrcp.f32 %v8694_v28  ;;  %v8699_v40 = vadd.f32 1.0, %v11671_v27 }
 0x4ac   :  { %v11673_v47 = vpop.eup %11672 }
 0x4ad   :  { %11678 = vrcp.f32 %v8699_v40  ;;  %v8700_v17 = vadd.f32 1.0, %v11673_v47 }
 0x4af   :  { %11680 = vrcp.f32 %v8700_v17 }
 0x4b6   :  { %v11675_v21 = vpop.eup %11674 }
 0x4b7   :  { %8729 = vst [vmem:[#allocation2 + $0x10] sm:$0xff] %v11675_v21 }
 0x4b8   :  { %v11677_v16 = vpop.eup %11676 }
 0x4b9   :  { %8730 = vst [vmem:[#allocation2 + $0x18] sm:$0xff] %v11677_v16 }
 0x4ba   :  { %v11679_v33 = vpop.eup %11678 }
 0x4bb   :  { %8735 = vst [vmem:[#allocation2 + $0x40] sm:$0xff] %v11679_v33 }
 0x4bc   :  { %v11681_v45 = vpop.eup %11680 }
 0x4bd   :  { %8736 = vst [vmem:[#allocation2 + $0x48] sm:$0xff] %v11681_v45 }
 0x4c2   :  { %v8431_v55 = vpop.f32.mrf.mxu0 }
 0x4c3   :  { %v8432_v61 = vadd.f32 %v8431_v55, %v4990_v1 }
 0x4c4   :  { %v8433_v23 = vpop.f32.mrf.mxu0 }
 0x4c5   :  { %v8434_v53 = vadd.f32 %v8433_v23, %v4994_v60 }
 0x4c6   :  { %v8435_v46 = vpop.f32.mrf.mxu0 }
 0x4c7   :  { %v8436_v3 = vadd.f32 %v8435_v46, %v4990_v1 }
 0x4c8   :  { %v8437_v10 = vpop.f32.mrf.mxu0 }
 0x4c9   :  { %v8438_v39 = vadd.f32 %v8437_v10, %v4994_v60 }
 0x4d4   :  { %v8474_v48 = vpop.f32.mrf.mxu1 }
 0x4d5   :  { %v8475_v43 = vadd.f32 %v8474_v48, %v8432_v61 }
 0x4d6   :  { %v8476_v0 = vpop.f32.mrf.mxu1 }
 0x4d7   :  { %v8477_v6 = vadd.f32 %v8476_v0, %v8434_v53 }
 0x4d8   :  { %v8478_v18 = vpop.f32.mrf.mxu1 }
 0x4d9   :  { %v8479_v13 = vadd.f32 %v8478_v18, %v8436_v3 }
 0x4da   :  { %v8480_v54 = vpop.f32.mrf.mxu1 }
 0x4db   :  { %v8481_v14 = vadd.f32 %v8480_v54, %v8438_v39 }
 0x502   :  { %v8517_v30 = vpop.f32.mrf.mxu0 }
 0x503   :  { %v8518_v4 = vadd.f32 %v8517_v30, %v8475_v43 }
 0x504   :  { %v8519_v35 = vpop.f32.mrf.mxu0 }
 0x505   :  { %v8520_v8 = vadd.f32 %v8519_v35, %v8477_v6 }
 0x506   :  { %v8521_v37 = vpop.f32.mrf.mxu0 }
 0x507   :  { %v8522_v15 = vadd.f32 %v8521_v37, %v8479_v13 }
 0x508   :  { %v8523_v44 = vpop.f32.mrf.mxu0 }
 0x509   :  { %v8524_v32 = vadd.f32 %v8523_v44, %v8481_v14 }
 0x514   :  { %v8560_v62 = vpop.f32.mrf.mxu1 }
 0x515   :  { %v8561_v9 = vadd.f32 %v8560_v62, %v8518_v4 }
 0x516   :  { %v8562_v42 = vpop.f32.mrf.mxu1 }
 0x517   :  { %v8563_v31 = vadd.f32 %v8562_v42, %v8520_v8 }
 0x518   :  { %v8564_v7 = vpop.f32.mrf.mxu1 }
 0x519   :  { %v8565_v29 = vadd.f32 %v8564_v7, %v8522_v15 }
 0x51a   :  { %v8566_v50 = vpop.f32.mrf.mxu1 }
 0x51b   :  { %v8567_v20 = vadd.f32 %v8566_v50, %v8524_v32 }
 0x542   :  { %v8603_v5 = vpop.f32.mrf.mxu0 }
 0x543   :  { %v8604_v57 = vadd.f32 %v8603_v5, %v8561_v9 }
 0x544   :  { %v8605_v2 = vpop.f32.mrf.mxu0 }
 0x545   :  { %v8606_v49 = vadd.f32 %v8605_v2, %v8563_v31 }
 0x546   :  { %v8607_v24 = vpop.f32.mrf.mxu0 }
 0x547   :  { %v8608_v34 = vadd.f32 %v8607_v24, %v8565_v29 }
 0x548   :  { %v8609_v19 = vpop.f32.mrf.mxu0 }
 0x549   :  { %v8610_v11 = vadd.f32 %v8609_v19, %v8567_v20 }
 0x554   :  { %v8646_v22 = vpop.f32.mrf.mxu1 }
 0x555   :  { %v8647_v51 = vadd.f32 %v8646_v22, %v8604_v57 }
 0x556   :  { %v8648_v41 = vpop.f32.mrf.mxu1 }
 0x557   :  { %v9911_v59 = vmul.f32 -1.442695, %v8647_v51  ;;  %v8649_v52 = vadd.f32 %v8648_v41, %v8606_v49 }
 0x558   :  { %v8650_v25 = vpop.f32.mrf.mxu1 }
 0x559   :  { %11682 = vpow2.f32 %v9911_v59  ;;  %v9912_v56 = vmul.f32 -1.442695, %v8649_v52  ;;  %v8651_v63 = vadd.f32 %v8650_v25, %v8608_v34 }
 0x55a   :  { %v8652_v36 = vpop.f32.mrf.mxu1 }
 0x55b   :  { %11684 = vpow2.f32 %v9912_v56  ;;  %v9917_v12 = vmul.f32 -1.442695, %v8651_v63  ;;  %v8653_v38 = vadd.f32 %v8652_v36, %v8610_v11 }
 0x55d   :  { %11686 = vpow2.f32 %v9917_v12  ;;  %v9918_v26 = vmul.f32 -1.442695, %v8653_v38 }
 0x55f   :  { %11688 = vpow2.f32 %v9918_v26 }
 0x566   :  { %v11683_v28 = vpop.eup %11682 }
 0x567   :  { %v8695_v27 = vadd.f32 1.0, %v11683_v28 }
 0x568   :  { %v11685_v40 = vpop.eup %11684 }
 0x569   :  { %11690 = vrcp.f32 %v8695_v27  ;;  %v8696_v47 = vadd.f32 1.0, %v11685_v40 }
 0x56a   :  { %v11687_v17 = vpop.eup %11686 }
 0x56b   :  { %11692 = vrcp.f32 %v8696_v47  ;;  %v8701_v21 = vadd.f32 1.0, %v11687_v17 }
 0x56c   :  { %v11689_v16 = vpop.eup %11688 }
 0x56d   :  { %11694 = vrcp.f32 %v8701_v21  ;;  %v8702_v33 = vadd.f32 1.0, %v11689_v16 }
 0x56f   :  { %11696 = vrcp.f32 %v8702_v33 }
 0x576   :  { %v11691_v45 = vpop.eup %11690 }
 0x577   :  { %8731 = vst [vmem:[#allocation2 + $0x20] sm:$0xff] %v11691_v45 }
 0x578   :  { %v11693_v55 = vpop.eup %11692 }
 0x579   :  { %8732 = vst [vmem:[#allocation2 + $0x28] sm:$0xff] %v11693_v55 }
 0x57a   :  { %v11695_v23 = vpop.eup %11694 }
 0x57b   :  { %8737 = vst [vmem:[#allocation2 + $0x50] sm:$0xff] %v11695_v23 }
 0x57c   :  { %v11697_v46 = vpop.eup %11696 }
 0x57d   :  { %8738 = vst [vmem:[#allocation2 + $0x58] sm:$0xff] %v11697_v46 }
 0x57e   :  { %11712 = shalt.err (!%p11709_p4)
}
 0x57f   :  { %s11724_s7 = smov 768   ;;  %s11725_s8 = smov 48  }
 0x580   :  { %8750 = dma.vmem_to_hbm [thread:$0]  %s8745_s30, 1536, %s15551_s5, [#allocation3], %s11724_s7, %s11724_s7, %s11725_s8  }
 0x581   :  { %11721 = dma.done.wait [#allocation3], 1536  }
 0x582   :  { %11722 = vsyncadd [#allocation3], 4294965760 }
 0x583   :  { %8754 = vsyncpa [#allocation3], 1 }

</bundles_post_ra>
